<compile_context>
chip_gen: v5e
topology: v5e:2x2
jax: 0.10.0
libtpu: 0.0.40
codegen_flags: <defaults>
</compile_context>

<pallas_src>
import functools
import math

import jax
import jax.numpy as jnp
from jax.experimental import pallas as pl
from jax.experimental.pallas import tpu as pltpu


def _round_up(x, m):
    return ((x + m - 1) // m) * m


def _ln(x, g, b, eps):
    mean = jnp.mean(x, axis=-1, keepdims=True)
    var = jnp.mean(jnp.square(x - mean), axis=-1, keepdims=True)
    return (x - mean) * jax.lax.rsqrt(var + eps) * g + b


# --------------------------------------------------------------------------
# single fused kernel: patch embed + ln_pre + L transformer layers + ln_post
# --------------------------------------------------------------------------

def _clip_kernel(xp_ref, cw_ref, bias_ref, lpg_ref, lpb_ref,
                 wqkv_ref, bqkv_ref, wo_ref, bo_ref,
                 ln1g_ref, ln1b_ref, ln2g_ref, ln2b_ref,
                 fcw_ref, fcb_ref, pw_ref, pb_ref,
                 lng_ref, lnb_ref, proj_ref,
                 out_ref, x_scr, ctx_scr,
                 *, heads, scale, n_valid, eps):
    l = pl.program_id(1)
    n_layers = pl.num_programs(1)

    # ---- layer-0 prologue: conv1 matmul + cls/pos bias + ln_pre -> scratch ----
    @pl.when(l == 0)
    def _():
        tok = jnp.dot(xp_ref[0], cw_ref[...],
                      preferred_element_type=jnp.float32) + bias_ref[...]
        x_scr[...] = _ln(tok, lpg_ref[...], lpb_ref[...], eps)

    x = x_scr[...]                       # [T_pad, W] f32 residual stream
    T, W = x.shape
    dh = W // heads

    # ---- attention sublayer ----
    xn = _ln(x, ln1g_ref[0], ln1b_ref[0], eps).astype(jnp.bfloat16)
    qkv = (jnp.dot(xn, wqkv_ref[0], preferred_element_type=jnp.float32)
           + bqkv_ref[0])                                  # [T, 3W] f32
    q = qkv[:, :W].astype(jnp.bfloat16)
    k = qkv[:, W:2 * W].astype(jnp.bfloat16)
    v = qkv[:, 2 * W:].astype(jnp.bfloat16)

    key_ok = jax.lax.broadcasted_iota(jnp.int32, (1, T), 1) < n_valid
    for h in range(heads):                                 # static unroll
        sl = slice(h * dh, (h + 1) * dh)
        s = jax.lax.dot_general(q[:, sl], k[:, sl], (((1,), (1,)), ((), ())),
                                preferred_element_type=jnp.float32) * scale
        s = jnp.where(key_ok, s, -1e30)                    # mask padded keys
        m = jnp.max(s, axis=-1, keepdims=True)
        p = jnp.exp(s - m)
        p = p * pl.reciprocal(jnp.sum(p, axis=-1, keepdims=True), approx=True)
        ctx_scr[:, sl] = jnp.dot(p.astype(jnp.bfloat16), v[:, sl],
                                 preferred_element_type=jnp.float32)

    attn = (jnp.dot(ctx_scr[...].astype(jnp.bfloat16), wo_ref[0],
                    preferred_element_type=jnp.float32) + bo_ref[0])
    x = x + attn

    # ---- MLP sublayer ----
    xn2 = _ln(x, ln2g_ref[0], ln2b_ref[0], eps).astype(jnp.bfloat16)
    h1 = (jnp.dot(xn2, fcw_ref[0], preferred_element_type=jnp.float32)
          + fcb_ref[0])
    h1 = h1 * jax.nn.sigmoid(1.702 * h1)                   # QuickGELU
    h2 = (jnp.dot(h1.astype(jnp.bfloat16), pw_ref[0],
                  preferred_element_type=jnp.float32) + pb_ref[0])
    x = x + h2
    x_scr[...] = x

    # ---- last-layer epilogue: ln_post on CLS row + final projection ----
    @pl.when(l == n_layers - 1)
    def _():
        cls = x[0:1, :]
        cls_n = _ln(cls, lng_ref[...], lnb_ref[...], eps).astype(jnp.bfloat16)
        out_ref[0] = jnp.dot(cls_n, proj_ref[...],
                             preferred_element_type=jnp.float32
                             ).astype(out_ref.dtype)


# --------------------------------------------------------------------------
# forward wrapper (CLIP ViT image encoder)
# --------------------------------------------------------------------------

def clip_encode_image(x, params):
    # x: [B, C, H, W] (NCHW, PyTorch convention)
    B, C, H, W_img = x.shape
    ps = params["patch_size"]
    width = params["width"]
    heads = params["heads"]
    gh, gw = H // ps, W_img // ps
    P = gh * gw
    T = P + 1
    T_pad = _round_up(T, 16)
    Cpp = C * ps * ps
    L = params["wqkv"].shape[0]
    mlp = params["fc_w"].shape[2]
    E = params["proj"].shape[1]

    # Patch extraction (one-time host layout glue). Row 0 (CLS slot) and rows
    # T..T_pad-1 (token padding) are zero patch rows; the class embedding and
    # positional embedding are added in-kernel via the precomputed tok_bias.
    xp = x.reshape(B, C, gh, ps, gw, ps).transpose(0, 2, 4, 1, 3, 5)
    xp = xp.reshape(B, P, Cpp)
    xp = jnp.pad(xp, ((0, 0), (1, T_pad - T), (0, 0))).astype(jnp.bfloat16)

    scale = 1.0 / math.sqrt(width // heads)
    kernel = functools.partial(_clip_kernel, heads=heads, scale=scale,
                               n_valid=T, eps=1e-5)

    full2 = lambda b, l: (0, 0)
    per_b = lambda b, l: (b, 0, 0)
    per_l = lambda b, l: (l, 0, 0)

    out = pl.pallas_call(
        kernel,
        out_shape=jax.ShapeDtypeStruct((B, 1, E), jnp.float32),
        grid=(B, L),
        in_specs=[
            pl.BlockSpec((1, T_pad, Cpp), per_b),          # padded patches
            pl.BlockSpec((Cpp, width), full2),             # conv1 weight
            pl.BlockSpec((T_pad, width), full2),           # cls/pos token bias
            pl.BlockSpec((1, width), full2),               # ln_pre gamma
            pl.BlockSpec((1, width), full2),               # ln_pre beta
            pl.BlockSpec((1, width, 3 * width), per_l),    # wqkv
            pl.BlockSpec((1, 1, 3 * width), per_l),        # bqkv
            pl.BlockSpec((1, width, width), per_l),        # wo
            pl.BlockSpec((1, 1, width), per_l),            # bo
            pl.BlockSpec((1, 1, width), per_l),            # ln1 gamma
            pl.BlockSpec((1, 1, width), per_l),            # ln1 beta
            pl.BlockSpec((1, 1, width), per_l),            # ln2 gamma
            pl.BlockSpec((1, 1, width), per_l),            # ln2 beta
            pl.BlockSpec((1, width, mlp), per_l),          # fc weight
            pl.BlockSpec((1, 1, mlp), per_l),              # fc bias
            pl.BlockSpec((1, mlp, width), per_l),          # proj weight (MLP)
            pl.BlockSpec((1, 1, width), per_l),            # proj bias (MLP)
            pl.BlockSpec((1, width), full2),               # ln_post gamma
            pl.BlockSpec((1, width), full2),               # ln_post beta
            pl.BlockSpec((width, E), full2),               # final projection
        ],
        out_specs=pl.BlockSpec((1, 1, E), per_b),
        scratch_shapes=[pltpu.VMEM((T_pad, width), jnp.float32),   # residual
                        pltpu.VMEM((T_pad, width), jnp.float32)],  # attn ctx
        compiler_params=pltpu.CompilerParams(
            dimension_semantics=("parallel", "arbitrary")),
    )(xp, params["conv_w"], params["tok_bias"],
      params["ln_pre_g"], params["ln_pre_b"],
      params["wqkv"], params["bqkv"], params["wo"], params["bo"],
      params["ln1_g"], params["ln1_b"], params["ln2_g"], params["ln2_b"],
      params["fc_w"], params["fc_b"], params["pw"], params["pb"],
      params["ln_post_g"], params["ln_post_b"], params["proj"])
    return out.reshape(B, E)


# --------------------------------------------------------------------------
# pure-JAX reference (same math, f32) for tolerance checking
# --------------------------------------------------------------------------

def clip_reference(x, params):
    f32 = lambda a: jnp.asarray(a, jnp.float32)
    B, C, H, W_img = x.shape
    ps = params["patch_size"]
    width = params["width"]
    heads = params["heads"]
    gh, gw = H // ps, W_img // ps
    P = gh * gw
    T = P + 1
    Cpp = C * ps * ps
    dh = width // heads

    xp = x.reshape(B, C, gh, ps, gw, ps).transpose(0, 2, 4, 1, 3, 5)
    xp = xp.reshape(B, P, Cpp).astype(jnp.bfloat16).astype(jnp.float32)
    pe = xp @ f32(params["conv_w"])
    tok = jnp.concatenate([jnp.zeros((B, 1, width), jnp.float32), pe], axis=1)
    tok = tok + f32(params["tok_bias"])[:T][None]

    def ln(z, g, b):
        m = z.mean(-1, keepdims=True)
        v = ((z - m) ** 2).mean(-1, keepdims=True)
        return (z - m) / jnp.sqrt(v + 1e-5) * g + b

    xs = ln(tok, f32(params["ln_pre_g"]), f32(params["ln_pre_b"]))
    L = params["wqkv"].shape[0]
    for l in range(L):
        xn = ln(xs, f32(params["ln1_g"][l]), f32(params["ln1_b"][l]))
        qkv = xn @ f32(params["wqkv"][l]) + f32(params["bqkv"][l])
        q, k, v = (qkv[..., :width], qkv[..., width:2 * width],
                   qkv[..., 2 * width:])
        qh = q.reshape(B, T, heads, dh).transpose(0, 2, 1, 3)
        kh = k.reshape(B, T, heads, dh).transpose(0, 2, 1, 3)
        vh = v.reshape(B, T, heads, dh).transpose(0, 2, 1, 3)
        s = jnp.einsum("bhqd,bhkd->bhqk", qh, kh) / math.sqrt(dh)
        p = jax.nn.softmax(s, axis=-1)
        ctx = jnp.einsum("bhqk,bhkd->bhqd", p, vh)
        ctx = ctx.transpose(0, 2, 1, 3).reshape(B, T, width)
        xs = xs + ctx @ f32(params["wo"][l]) + f32(params["bo"][l])
        xn2 = ln(xs, f32(params["ln2_g"][l]), f32(params["ln2_b"][l]))
        h1 = xn2 @ f32(params["fc_w"][l]) + f32(params["fc_b"][l])
        h1 = h1 * jax.nn.sigmoid(1.702 * h1)
        xs = xs + h1 @ f32(params["pw"][l]) + f32(params["pb"][l])
    cls = xs[:, 0, :]
    cls = ln(cls, f32(params["ln_post_g"])[0], f32(params["ln_post_b"])[0])
    return cls @ f32(params["proj"])


# --------------------------------------------------------------------------
# deterministic synthetic parameter init (no checkpoint load)
# --------------------------------------------------------------------------

def init_params(key, *, C=3, patch_size=4, width=128, heads=4, layers=2,
                image_size=16, embed_dim=128):
    gh = image_size // patch_size
    P = gh * gh
    T = P + 1
    T_pad = _round_up(T, 16)
    Cpp = C * patch_size * patch_size
    mlp = 4 * width

    keys = iter(jax.random.split(key, 8 + 12 * layers))

    def rnd(k, shape, scale=0.02, dtype=jnp.bfloat16):
        return (scale * jax.random.normal(k, shape, jnp.float32)).astype(dtype)

    def ln_pair(k1, k2, n):
        g = 1.0 + 0.1 * jax.random.normal(k1, (1, n), jnp.float32)
        b = 0.1 * jax.random.normal(k2, (1, n), jnp.float32)
        return g, b

    class_emb = 0.02 * jax.random.normal(next(keys), (width,), jnp.float32)
    pos_emb = 0.02 * jax.random.normal(next(keys), (T, width), jnp.float32)
    # cls/pos additive bias, padded to T_pad (row 0 = class_emb + pos[0]).
    tok_bias = jnp.zeros((T_pad, width), jnp.float32)
    tok_bias = tok_bias.at[:T].set(pos_emb)
    tok_bias = tok_bias.at[0].add(class_emb)

    ln_pre_g, ln_pre_b = ln_pair(next(keys), next(keys), width)
    ln_post_g, ln_post_b = ln_pair(next(keys), next(keys), width)

    params = {
        "patch_size": patch_size, "width": width, "heads": heads,
        "conv_w": rnd(next(keys), (Cpp, width)),        # conv1 (no bias)
        "tok_bias": tok_bias,
        "ln_pre_g": ln_pre_g, "ln_pre_b": ln_pre_b,
        "ln_post_g": ln_post_g, "ln_post_b": ln_post_b,
        "proj": rnd(next(keys), (width, embed_dim)),    # visual.proj (no bias)
    }

    wqkv, bqkv, wo, bo = [], [], [], []
    ln1g, ln1b, ln2g, ln2b = [], [], [], []
    fcw, fcb, pw, pb = [], [], [], []
    for _ in range(layers):
        wqkv.append(rnd(next(keys), (width, 3 * width)))      # q|k|v fused
        bqkv.append(0.02 * jax.random.normal(next(keys), (1, 3 * width),
                                             jnp.float32))
        wo.append(rnd(next(keys), (width, width)))
        bo.append(0.02 * jax.random.normal(next(keys), (1, width), jnp.float32))
        g1, b1 = ln_pair(next(keys), next(keys), width)
        g2, b2 = ln_pair(next(keys), next(keys), width)
        ln1g.append(g1); ln1b.append(b1); ln2g.append(g2); ln2b.append(b2)
        fcw.append(rnd(next(keys), (width, mlp)))
        fcb.append(0.02 * jax.random.normal(next(keys), (1, mlp), jnp.float32))
        pw.append(rnd(next(keys), (mlp, width)))
        pb.append(0.02 * jax.random.normal(next(keys), (1, width), jnp.float32))

    params.update({
        "wqkv": jnp.stack(wqkv), "bqkv": jnp.stack(bqkv),
        "wo": jnp.stack(wo), "bo": jnp.stack(bo),
        "ln1_g": jnp.stack(ln1g), "ln1_b": jnp.stack(ln1b),
        "ln2_g": jnp.stack(ln2g), "ln2_b": jnp.stack(ln2b),
        "fc_w": jnp.stack(fcw), "fc_b": jnp.stack(fcb),
        "pw": jnp.stack(pw), "pb": jnp.stack(pb),
    })
    return params


if __name__ == "__main__":
    key = jax.random.PRNGKey(0)
    k_x, k_p = jax.random.split(key)

    B, C, H, W = 2, 3, 16, 16          # patch=4 -> 16 patches + CLS = 17 tokens
    x = jax.random.normal(k_x, (B, C, H, W), jnp.float32)

    params = init_params(k_p, C=C, patch_size=4, width=128, heads=4,
                         layers=2, image_size=H, embed_dim=128)

    out = jax.block_until_ready(clip_encode_image(x, params))
    assert out.shape == (B, 128), out.shape
    assert bool(jnp.all(jnp.isfinite(out)))

    ref = clip_reference(x, params)
    err = float(jnp.max(jnp.abs(out - ref)))
    assert err < 0.1, f"max abs err vs reference: {err}"
    print("KERNEL_OK")
</pallas_src>

<mosaic_0001>
module attributes {stable_mosaic.version = 11 : i64} {
  func.func @_clip_kernel(%arg0: i32, %arg1: i32, %arg2: memref<1x32x48xbf16, #tpu.memory_space<vmem>>, %arg3: memref<48x128xbf16, #tpu.memory_space<vmem>>, %arg4: memref<32x128xf32, #tpu.memory_space<vmem>>, %arg5: memref<1x128xf32, #tpu.memory_space<vmem>>, %arg6: memref<1x128xf32, #tpu.memory_space<vmem>>, %arg7: memref<1x128x384xbf16, #tpu.memory_space<vmem>>, %arg8: memref<1x1x384xf32, #tpu.memory_space<vmem>>, %arg9: memref<1x128x128xbf16, #tpu.memory_space<vmem>>, %arg10: memref<1x1x128xf32, #tpu.memory_space<vmem>>, %arg11: memref<1x1x128xf32, #tpu.memory_space<vmem>>, %arg12: memref<1x1x128xf32, #tpu.memory_space<vmem>>, %arg13: memref<1x1x128xf32, #tpu.memory_space<vmem>>, %arg14: memref<1x1x128xf32, #tpu.memory_space<vmem>>, %arg15: memref<1x128x512xbf16, #tpu.memory_space<vmem>>, %arg16: memref<1x1x512xf32, #tpu.memory_space<vmem>>, %arg17: memref<1x512x128xbf16, #tpu.memory_space<vmem>>, %arg18: memref<1x1x128xf32, #tpu.memory_space<vmem>>, %arg19: memref<1x128xf32, #tpu.memory_space<vmem>>, %arg20: memref<1x128xf32, #tpu.memory_space<vmem>>, %arg21: memref<128x128xbf16, #tpu.memory_space<vmem>>, %arg22: memref<1x1x128xf32, #tpu.memory_space<vmem>>, %arg23: memref<32x128xf32, #tpu.memory_space<vmem>>, %arg24: memref<32x128xf32, #tpu.memory_space<vmem>>) attributes {dimension_semantics = [#tpu.dimension_semantics<parallel>, #tpu.dimension_semantics<arbitrary>], iteration_bounds = array<i64: 2, 2>, scalar_prefetch = 0 : i64, scratch_operands = 2 : i64, tpu.core_type = #tpu.core_type<tc>, window_params = [{transform_indices = @transform_0, window_bounds = array<i64: 1, 32, 48>}, {pipeline_mode = #tpu.pipeline_mode<synchronous>, transform_indices = @transform_1, window_bounds = array<i64: 48, 128>}, {pipeline_mode = #tpu.pipeline_mode<synchronous>, transform_indices = @transform_2, window_bounds = array<i64: 32, 128>}, {pipeline_mode = #tpu.pipeline_mode<synchronous>, transform_indices = @transform_3, window_bounds = array<i64: 1, 128>}, {pipeline_mode = #tpu.pipeline_mode<synchronous>, transform_indices = @transform_4, window_bounds = array<i64: 1, 128>}, {transform_indices = @transform_5, window_bounds = array<i64: 1, 128, 384>}, {transform_indices = @transform_6, window_bounds = array<i64: 1, 1, 384>}, {transform_indices = @transform_7, window_bounds = array<i64: 1, 128, 128>}, {transform_indices = @transform_8, window_bounds = array<i64: 1, 1, 128>}, {transform_indices = @transform_9, window_bounds = array<i64: 1, 1, 128>}, {transform_indices = @transform_10, window_bounds = array<i64: 1, 1, 128>}, {transform_indices = @transform_11, window_bounds = array<i64: 1, 1, 128>}, {transform_indices = @transform_12, window_bounds = array<i64: 1, 1, 128>}, {transform_indices = @transform_13, window_bounds = array<i64: 1, 128, 512>}, {transform_indices = @transform_14, window_bounds = array<i64: 1, 1, 512>}, {transform_indices = @transform_15, window_bounds = array<i64: 1, 512, 128>}, {transform_indices = @transform_16, window_bounds = array<i64: 1, 1, 128>}, {pipeline_mode = #tpu.pipeline_mode<synchronous>, transform_indices = @transform_17, window_bounds = array<i64: 1, 128>}, {pipeline_mode = #tpu.pipeline_mode<synchronous>, transform_indices = @transform_18, window_bounds = array<i64: 1, 128>}, {pipeline_mode = #tpu.pipeline_mode<synchronous>, transform_indices = @transform_19, window_bounds = array<i64: 128, 128>}, {transform_indices = @transform_20, window_bounds = array<i64: 1, 1, 128>}]} {
    %c0_i32 = arith.constant 0 : i32
    %0 = arith.cmpi eq, %arg1, %c0_i32 : i32
    %1 = arith.extui %0 : i1 to i32
    %c0_i32_0 = arith.constant 0 : i32
    %2 = arith.cmpi ne, %1, %c0_i32_0 : i32
    scf.if %2 {
      %c0_87 = arith.constant 0 : index
      %c0_88 = arith.constant 0 : index
      %c0_89 = arith.constant 0 : index
      %204 = vector.load %arg2[%c0_87, %c0_88, %c0_89] : memref<1x32x48xbf16, #tpu.memory_space<vmem>>, vector<1x32x48xbf16>
      %205 = vector.shape_cast %204 : vector<1x32x48xbf16> to vector<32x48xbf16>
      %c0_90 = arith.constant 0 : index
      %c0_91 = arith.constant 0 : index
      %206 = vector.load %arg3[%c0_90, %c0_91] : memref<48x128xbf16, #tpu.memory_space<vmem>>, vector<48x128xbf16>
      %cst_92 = arith.constant dense<0.000000e+00> : vector<32x128xf32>
      %207 = tpu.matmul %205, %206, %cst_92 {dimension_numbers = #tpu.dot_dimension_numbers<[1], [0], [0], [1], [0, 0, 1, 1], [], []>} : vector<32x48xbf16>, vector<48x128xbf16>, vector<32x128xf32> -> vector<32x128xf32>
      %c0_93 = arith.constant 0 : index
      %c0_94 = arith.constant 0 : index
      %208 = vector.load %arg4[%c0_93, %c0_94] : memref<32x128xf32, #tpu.memory_space<vmem>>, vector<32x128xf32>
      %209 = arith.addf %207, %208 : vector<32x128xf32>
      %c0_95 = arith.constant 0 : index
      %c0_96 = arith.constant 0 : index
      %210 = vector.load %arg5[%c0_95, %c0_96] : memref<1x128xf32, #tpu.memory_space<vmem>>, vector<1x128xf32>
      %c0_97 = arith.constant 0 : index
      %c0_98 = arith.constant 0 : index
      %211 = vector.load %arg6[%c0_97, %c0_98] : memref<1x128xf32, #tpu.memory_space<vmem>>, vector<1x128xf32>
      %cst_99 = arith.constant dense<0.000000e+00> : vector<32xf32>
      %212 = vector.multi_reduction <add>, %209, %cst_99 [1] : vector<32x128xf32> to vector<32xf32>
      %213 = vector.shape_cast %212 : vector<32xf32> to vector<32x1xf32>
      %cst_100 = arith.constant 1.280000e+02 : f32
      %214 = vector.broadcast %cst_100 : f32 to vector<32x1xf32>
      %215 = arith.divf %213, %214 : vector<32x1xf32>
      %216 = vector.broadcast %215 : vector<32x1xf32> to vector<32x128xf32>
      %217 = arith.subf %209, %216 : vector<32x128xf32>
      %218 = arith.mulf %217, %217 : vector<32x128xf32>
      %cst_101 = arith.constant dense<0.000000e+00> : vector<32xf32>
      %219 = vector.multi_reduction <add>, %218, %cst_101 [1] : vector<32x128xf32> to vector<32xf32>
      %220 = vector.shape_cast %219 : vector<32xf32> to vector<32x1xf32>
      %cst_102 = arith.constant 1.280000e+02 : f32
      %221 = vector.broadcast %cst_102 : f32 to vector<32x1xf32>
      %222 = arith.divf %220, %221 : vector<32x1xf32>
      %223 = vector.broadcast %215 : vector<32x1xf32> to vector<32x128xf32>
      %224 = arith.subf %209, %223 : vector<32x128xf32>
      %cst_103 = arith.constant 9.99999974E-6 : f32
      %225 = vector.broadcast %cst_103 : f32 to vector<32x1xf32>
      %226 = arith.addf %222, %225 : vector<32x1xf32>
      %227 = math.rsqrt %226 : vector<32x1xf32>
      %228 = vector.broadcast %227 : vector<32x1xf32> to vector<32x128xf32>
      %229 = arith.mulf %224, %228 : vector<32x128xf32>
      %230 = vector.broadcast %210 : vector<1x128xf32> to vector<32x128xf32>
      %231 = arith.mulf %229, %230 : vector<32x128xf32>
      %232 = vector.broadcast %211 : vector<1x128xf32> to vector<32x128xf32>
      %233 = arith.addf %231, %232 : vector<32x128xf32>
      %c0_104 = arith.constant 0 : index
      %c0_105 = arith.constant 0 : index
      %234 = vector.load %arg23[%c0_104, %c0_105] : memref<32x128xf32, #tpu.memory_space<vmem>>, vector<32x128xf32>
      tpu.vector_store %arg23[%c0_104, %c0_105], %233 {strides = array<i32>} : memref<32x128xf32, #tpu.memory_space<vmem>>, vector<32x128xf32>,
    } else {
    }
    %c0 = arith.constant 0 : index
    %c0_1 = arith.constant 0 : index
    %3 = vector.load %arg23[%c0, %c0_1] : memref<32x128xf32, #tpu.memory_space<vmem>>, vector<32x128xf32>
    %c0_2 = arith.constant 0 : index
    %c0_3 = arith.constant 0 : index
    %c0_4 = arith.constant 0 : index
    %4 = vector.load %arg11[%c0_2, %c0_3, %c0_4] : memref<1x1x128xf32, #tpu.memory_space<vmem>>, vector<1x1x128xf32>
    %5 = vector.shape_cast %4 : vector<1x1x128xf32> to vector<1x128xf32>
    %c0_5 = arith.constant 0 : index
    %c0_6 = arith.constant 0 : index
    %c0_7 = arith.constant 0 : index
    %6 = vector.load %arg12[%c0_5, %c0_6, %c0_7] : memref<1x1x128xf32, #tpu.memory_space<vmem>>, vector<1x1x128xf32>
    %7 = vector.shape_cast %6 : vector<1x1x128xf32> to vector<1x128xf32>
    %cst = arith.constant dense<0.000000e+00> : vector<32xf32>
    %8 = vector.multi_reduction <add>, %3, %cst [1] : vector<32x128xf32> to vector<32xf32>
    %9 = vector.shape_cast %8 : vector<32xf32> to vector<32x1xf32>
    %cst_8 = arith.constant 1.280000e+02 : f32
    %10 = vector.broadcast %cst_8 : f32 to vector<32x1xf32>
    %11 = arith.divf %9, %10 : vector<32x1xf32>
    %12 = vector.broadcast %11 : vector<32x1xf32> to vector<32x128xf32>
    %13 = arith.subf %3, %12 : vector<32x128xf32>
    %14 = arith.mulf %13, %13 : vector<32x128xf32>
    %cst_9 = arith.constant dense<0.000000e+00> : vector<32xf32>
    %15 = vector.multi_reduction <add>, %14, %cst_9 [1] : vector<32x128xf32> to vector<32xf32>
    %16 = vector.shape_cast %15 : vector<32xf32> to vector<32x1xf32>
    %cst_10 = arith.constant 1.280000e+02 : f32
    %17 = vector.broadcast %cst_10 : f32 to vector<32x1xf32>
    %18 = arith.divf %16, %17 : vector<32x1xf32>
    %19 = vector.broadcast %11 : vector<32x1xf32> to vector<32x128xf32>
    %20 = arith.subf %3, %19 : vector<32x128xf32>
    %cst_11 = arith.constant 9.99999974E-6 : f32
    %21 = vector.broadcast %cst_11 : f32 to vector<32x1xf32>
    %22 = arith.addf %18, %21 : vector<32x1xf32>
    %23 = math.rsqrt %22 : vector<32x1xf32>
    %24 = vector.broadcast %23 : vector<32x1xf32> to vector<32x128xf32>
    %25 = arith.mulf %20, %24 : vector<32x128xf32>
    %26 = vector.broadcast %5 : vector<1x128xf32> to vector<32x128xf32>
    %27 = arith.mulf %25, %26 : vector<32x128xf32>
    %28 = vector.broadcast %7 : vector<1x128xf32> to vector<32x128xf32>
    %29 = arith.addf %27, %28 : vector<32x128xf32>
    %30 = arith.truncf %29 : vector<32x128xf32> to vector<32x128xbf16>
    %c0_12 = arith.constant 0 : index
    %c0_13 = arith.constant 0 : index
    %c0_14 = arith.constant 0 : index
    %31 = vector.load %arg7[%c0_12, %c0_13, %c0_14] : memref<1x128x384xbf16, #tpu.memory_space<vmem>>, vector<1x128x384xbf16>
    %32 = vector.shape_cast %31 : vector<1x128x384xbf16> to vector<128x384xbf16>
    %cst_15 = arith.constant dense<0.000000e+00> : vector<32x384xf32>
    %33 = tpu.matmul %30, %32, %cst_15 {dimension_numbers = #tpu.dot_dimension_numbers<[1], [0], [0], [1], [0, 0, 1, 1], [], []>} : vector<32x128xbf16>, vector<128x384xbf16>, vector<32x384xf32> -> vector<32x384xf32>
    %c0_16 = arith.constant 0 : index
    %c0_17 = arith.constant 0 : index
    %c0_18 = arith.constant 0 : index
    %34 = vector.load %arg8[%c0_16, %c0_17, %c0_18] : memref<1x1x384xf32, #tpu.memory_space<vmem>>, vector<1x1x384xf32>
    %35 = vector.shape_cast %34 : vector<1x1x384xf32> to vector<1x384xf32>
    %36 = vector.broadcast %35 : vector<1x384xf32> to vector<32x384xf32>
    %37 = arith.addf %33, %36 : vector<32x384xf32>
    %38 = vector.extract_strided_slice %37 {offsets = [0, 0], sizes = [32, 128], strides = [1, 1]} : vector<32x384xf32> to vector<32x128xf32>
    %39 = arith.truncf %38 : vector<32x128xf32> to vector<32x128xbf16>
    %40 = vector.extract_strided_slice %37 {offsets = [0, 128], sizes = [32, 128], strides = [1, 1]} : vector<32x384xf32> to vector<32x128xf32>
    %41 = arith.truncf %40 : vector<32x128xf32> to vector<32x128xbf16>
    %42 = vector.extract_strided_slice %37 {offsets = [0, 256], sizes = [32, 128], strides = [1, 1]} : vector<32x384xf32> to vector<32x128xf32>
    %43 = arith.truncf %42 : vector<32x128xf32> to vector<32x128xbf16>
    %44 = tpu.iota {dimensions = array<i32: 1>} : vector<1x32xi32>
    %c17_i32 = arith.constant 17 : i32
    %45 = vector.broadcast %c17_i32 : i32 to vector<1x32xi32>
    %46 = arith.cmpi slt, %44, %45 : vector<1x32xi32>
    %47 = vector.extract_strided_slice %39 {offsets = [0, 0], sizes = [32, 32], strides = [1, 1]} : vector<32x128xbf16> to vector<32x32xbf16>
    %48 = vector.extract_strided_slice %41 {offsets = [0, 0], sizes = [32, 32], strides = [1, 1]} : vector<32x128xbf16> to vector<32x32xbf16>
    %cst_19 = arith.constant dense<0.000000e+00> : vector<32x32xf32>
    %49 = tpu.matmul %47, %48, %cst_19 {dimension_numbers = #tpu.dot_dimension_numbers<[1], [1], [0], [0], [0, 0, 1, 0], [], []>} : vector<32x32xbf16>, vector<32x32xbf16>, vector<32x32xf32> -> vector<32x32xf32>
    %cst_20 = arith.constant 0.176776692 : f32
    %50 = vector.broadcast %cst_20 : f32 to vector<32x32xf32>
    %51 = arith.mulf %49, %50 : vector<32x32xf32>
    %cst_21 = arith.constant -1.000000e+30 : f32
    %52 = vector.shape_cast %46 : vector<1x32xi1> to vector<1x32xi1>
    %53 = vector.broadcast %52 : vector<1x32xi1> to vector<32x32xi1>
    %54 = vector.broadcast %cst_21 : f32 to vector<32x32xf32>
    %55 = arith.select %53, %51, %54 : vector<32x32xi1>, vector<32x32xf32>
    %cst_22 = arith.constant dense<0xFF800000> : vector<32xf32>
    %56 = vector.multi_reduction <maximumf>, %55, %cst_22 [1] : vector<32x32xf32> to vector<32xf32>
    %57 = vector.shape_cast %56 : vector<32xf32> to vector<32x1xf32>
    %58 = vector.broadcast %57 : vector<32x1xf32> to vector<32x32xf32>
    %59 = arith.subf %55, %58 : vector<32x32xf32>
    %60 = math.exp %59 : vector<32x32xf32>
    %cst_23 = arith.constant dense<0.000000e+00> : vector<32xf32>
    %61 = vector.multi_reduction <add>, %60, %cst_23 [1] : vector<32x32xf32> to vector<32xf32>
    %62 = vector.shape_cast %61 : vector<32xf32> to vector<32x1xf32>
    %63 = tpu.reciprocal %62 {approx = true} : vector<32x1xf32> -> vector<32x1xf32>
    %64 = vector.broadcast %63 : vector<32x1xf32> to vector<32x32xf32>
    %65 = arith.mulf %60, %64 : vector<32x32xf32>
    %66 = arith.truncf %65 : vector<32x32xf32> to vector<32x32xbf16>
    %67 = vector.extract_strided_slice %43 {offsets = [0, 0], sizes = [32, 32], strides = [1, 1]} : vector<32x128xbf16> to vector<32x32xbf16>
    %cst_24 = arith.constant dense<0.000000e+00> : vector<32x32xf32>
    %68 = tpu.matmul %66, %67, %cst_24 {dimension_numbers = #tpu.dot_dimension_numbers<[1], [0], [0], [1], [0, 0, 1, 1], [], []>} : vector<32x32xbf16>, vector<32x32xbf16>, vector<32x32xf32> -> vector<32x32xf32>
    %c0_25 = arith.constant 0 : index
    %c0_26 = arith.constant 0 : index
    %69 = vector.load %arg24[%c0_25, %c0_26] : memref<32x128xf32, #tpu.memory_space<vmem>>, vector<32x32xf32>
    tpu.vector_store %arg24[%c0_25, %c0_26], %68 {strides = array<i32>} : memref<32x128xf32, #tpu.memory_space<vmem>>, vector<32x32xf32>,
    %70 = vector.extract_strided_slice %39 {offsets = [0, 32], sizes = [32, 32], strides = [1, 1]} : vector<32x128xbf16> to vector<32x32xbf16>
    %71 = vector.extract_strided_slice %41 {offsets = [0, 32], sizes = [32, 32], strides = [1, 1]} : vector<32x128xbf16> to vector<32x32xbf16>
    %cst_27 = arith.constant dense<0.000000e+00> : vector<32x32xf32>
    %72 = tpu.matmul %70, %71, %cst_27 {dimension_numbers = #tpu.dot_dimension_numbers<[1], [1], [0], [0], [0, 0, 1, 0], [], []>} : vector<32x32xbf16>, vector<32x32xbf16>, vector<32x32xf32> -> vector<32x32xf32>
    %cst_28 = arith.constant 0.176776692 : f32
    %73 = vector.broadcast %cst_28 : f32 to vector<32x32xf32>
    %74 = arith.mulf %72, %73 : vector<32x32xf32>
    %cst_29 = arith.constant -1.000000e+30 : f32
    %75 = vector.shape_cast %46 : vector<1x32xi1> to vector<1x32xi1>
    %76 = vector.broadcast %75 : vector<1x32xi1> to vector<32x32xi1>
    %77 = vector.broadcast %cst_29 : f32 to vector<32x32xf32>
    %78 = arith.select %76, %74, %77 : vector<32x32xi1>, vector<32x32xf32>
    %cst_30 = arith.constant dense<0xFF800000> : vector<32xf32>
    %79 = vector.multi_reduction <maximumf>, %78, %cst_30 [1] : vector<32x32xf32> to vector<32xf32>
    %80 = vector.shape_cast %79 : vector<32xf32> to vector<32x1xf32>
    %81 = vector.broadcast %80 : vector<32x1xf32> to vector<32x32xf32>
    %82 = arith.subf %78, %81 : vector<32x32xf32>
    %83 = math.exp %82 : vector<32x32xf32>
    %cst_31 = arith.constant dense<0.000000e+00> : vector<32xf32>
    %84 = vector.multi_reduction <add>, %83, %cst_31 [1] : vector<32x32xf32> to vector<32xf32>
    %85 = vector.shape_cast %84 : vector<32xf32> to vector<32x1xf32>
    %86 = tpu.reciprocal %85 {approx = true} : vector<32x1xf32> -> vector<32x1xf32>
    %87 = vector.broadcast %86 : vector<32x1xf32> to vector<32x32xf32>
    %88 = arith.mulf %83, %87 : vector<32x32xf32>
    %89 = arith.truncf %88 : vector<32x32xf32> to vector<32x32xbf16>
    %90 = vector.extract_strided_slice %43 {offsets = [0, 32], sizes = [32, 32], strides = [1, 1]} : vector<32x128xbf16> to vector<32x32xbf16>
    %cst_32 = arith.constant dense<0.000000e+00> : vector<32x32xf32>
    %91 = tpu.matmul %89, %90, %cst_32 {dimension_numbers = #tpu.dot_dimension_numbers<[1], [0], [0], [1], [0, 0, 1, 1], [], []>} : vector<32x32xbf16>, vector<32x32xbf16>, vector<32x32xf32> -> vector<32x32xf32>
    %c0_33 = arith.constant 0 : index
    %c32 = arith.constant 32 : index
    %92 = vector.load %arg24[%c0_33, %c32] : memref<32x128xf32, #tpu.memory_space<vmem>>, vector<32x32xf32>
    tpu.vector_store %arg24[%c0_33, %c32], %91 {strides = array<i32>} : memref<32x128xf32, #tpu.memory_space<vmem>>, vector<32x32xf32>,
    %93 = vector.extract_strided_slice %39 {offsets = [0, 64], sizes = [32, 32], strides = [1, 1]} : vector<32x128xbf16> to vector<32x32xbf16>
    %94 = vector.extract_strided_slice %41 {offsets = [0, 64], sizes = [32, 32], strides = [1, 1]} : vector<32x128xbf16> to vector<32x32xbf16>
    %cst_34 = arith.constant dense<0.000000e+00> : vector<32x32xf32>
    %95 = tpu.matmul %93, %94, %cst_34 {dimension_numbers = #tpu.dot_dimension_numbers<[1], [1], [0], [0], [0, 0, 1, 0], [], []>} : vector<32x32xbf16>, vector<32x32xbf16>, vector<32x32xf32> -> vector<32x32xf32>
    %cst_35 = arith.constant 0.176776692 : f32
    %96 = vector.broadcast %cst_35 : f32 to vector<32x32xf32>
    %97 = arith.mulf %95, %96 : vector<32x32xf32>
    %cst_36 = arith.constant -1.000000e+30 : f32
    %98 = vector.shape_cast %46 : vector<1x32xi1> to vector<1x32xi1>
    %99 = vector.broadcast %98 : vector<1x32xi1> to vector<32x32xi1>
    %100 = vector.broadcast %cst_36 : f32 to vector<32x32xf32>
    %101 = arith.select %99, %97, %100 : vector<32x32xi1>, vector<32x32xf32>
    %cst_37 = arith.constant dense<0xFF800000> : vector<32xf32>
    %102 = vector.multi_reduction <maximumf>, %101, %cst_37 [1] : vector<32x32xf32> to vector<32xf32>
    %103 = vector.shape_cast %102 : vector<32xf32> to vector<32x1xf32>
    %104 = vector.broadcast %103 : vector<32x1xf32> to vector<32x32xf32>
    %105 = arith.subf %101, %104 : vector<32x32xf32>
    %106 = math.exp %105 : vector<32x32xf32>
    %cst_38 = arith.constant dense<0.000000e+00> : vector<32xf32>
    %107 = vector.multi_reduction <add>, %106, %cst_38 [1] : vector<32x32xf32> to vector<32xf32>
    %108 = vector.shape_cast %107 : vector<32xf32> to vector<32x1xf32>
    %109 = tpu.reciprocal %108 {approx = true} : vector<32x1xf32> -> vector<32x1xf32>
    %110 = vector.broadcast %109 : vector<32x1xf32> to vector<32x32xf32>
    %111 = arith.mulf %106, %110 : vector<32x32xf32>
    %112 = arith.truncf %111 : vector<32x32xf32> to vector<32x32xbf16>
    %113 = vector.extract_strided_slice %43 {offsets = [0, 64], sizes = [32, 32], strides = [1, 1]} : vector<32x128xbf16> to vector<32x32xbf16>
    %cst_39 = arith.constant dense<0.000000e+00> : vector<32x32xf32>
    %114 = tpu.matmul %112, %113, %cst_39 {dimension_numbers = #tpu.dot_dimension_numbers<[1], [0], [0], [1], [0, 0, 1, 1], [], []>} : vector<32x32xbf16>, vector<32x32xbf16>, vector<32x32xf32> -> vector<32x32xf32>
    %c0_40 = arith.constant 0 : index
    %c64 = arith.constant 64 : index
    %115 = vector.load %arg24[%c0_40, %c64] : memref<32x128xf32, #tpu.memory_space<vmem>>, vector<32x32xf32>
    tpu.vector_store %arg24[%c0_40, %c64], %114 {strides = array<i32>} : memref<32x128xf32, #tpu.memory_space<vmem>>, vector<32x32xf32>,
    %116 = vector.extract_strided_slice %39 {offsets = [0, 96], sizes = [32, 32], strides = [1, 1]} : vector<32x128xbf16> to vector<32x32xbf16>
    %117 = vector.extract_strided_slice %41 {offsets = [0, 96], sizes = [32, 32], strides = [1, 1]} : vector<32x128xbf16> to vector<32x32xbf16>
    %cst_41 = arith.constant dense<0.000000e+00> : vector<32x32xf32>
    %118 = tpu.matmul %116, %117, %cst_41 {dimension_numbers = #tpu.dot_dimension_numbers<[1], [1], [0], [0], [0, 0, 1, 0], [], []>} : vector<32x32xbf16>, vector<32x32xbf16>, vector<32x32xf32> -> vector<32x32xf32>
    %cst_42 = arith.constant 0.176776692 : f32
    %119 = vector.broadcast %cst_42 : f32 to vector<32x32xf32>
    %120 = arith.mulf %118, %119 : vector<32x32xf32>
    %cst_43 = arith.constant -1.000000e+30 : f32
    %121 = vector.shape_cast %46 : vector<1x32xi1> to vector<1x32xi1>
    %122 = vector.broadcast %121 : vector<1x32xi1> to vector<32x32xi1>
    %123 = vector.broadcast %cst_43 : f32 to vector<32x32xf32>
    %124 = arith.select %122, %120, %123 : vector<32x32xi1>, vector<32x32xf32>
    %cst_44 = arith.constant dense<0xFF800000> : vector<32xf32>
    %125 = vector.multi_reduction <maximumf>, %124, %cst_44 [1] : vector<32x32xf32> to vector<32xf32>
    %126 = vector.shape_cast %125 : vector<32xf32> to vector<32x1xf32>
    %127 = vector.broadcast %126 : vector<32x1xf32> to vector<32x32xf32>
    %128 = arith.subf %124, %127 : vector<32x32xf32>
    %129 = math.exp %128 : vector<32x32xf32>
    %cst_45 = arith.constant dense<0.000000e+00> : vector<32xf32>
    %130 = vector.multi_reduction <add>, %129, %cst_45 [1] : vector<32x32xf32> to vector<32xf32>
    %131 = vector.shape_cast %130 : vector<32xf32> to vector<32x1xf32>
    %132 = tpu.reciprocal %131 {approx = true} : vector<32x1xf32> -> vector<32x1xf32>
    %133 = vector.broadcast %132 : vector<32x1xf32> to vector<32x32xf32>
    %134 = arith.mulf %129, %133 : vector<32x32xf32>
    %135 = arith.truncf %134 : vector<32x32xf32> to vector<32x32xbf16>
    %136 = vector.extract_strided_slice %43 {offsets = [0, 96], sizes = [32, 32], strides = [1, 1]} : vector<32x128xbf16> to vector<32x32xbf16>
    %cst_46 = arith.constant dense<0.000000e+00> : vector<32x32xf32>
    %137 = tpu.matmul %135, %136, %cst_46 {dimension_numbers = #tpu.dot_dimension_numbers<[1], [0], [0], [1], [0, 0, 1, 1], [], []>} : vector<32x32xbf16>, vector<32x32xbf16>, vector<32x32xf32> -> vector<32x32xf32>
    %c0_47 = arith.constant 0 : index
    %c96 = arith.constant 96 : index
    %138 = vector.load %arg24[%c0_47, %c96] : memref<32x128xf32, #tpu.memory_space<vmem>>, vector<32x32xf32>
    tpu.vector_store %arg24[%c0_47, %c96], %137 {strides = array<i32>} : memref<32x128xf32, #tpu.memory_space<vmem>>, vector<32x32xf32>,
    %c0_48 = arith.constant 0 : index
    %c0_49 = arith.constant 0 : index
    %139 = vector.load %arg24[%c0_48, %c0_49] : memref<32x128xf32, #tpu.memory_space<vmem>>, vector<32x128xf32>
    %140 = arith.truncf %139 : vector<32x128xf32> to vector<32x128xbf16>
    %c0_50 = arith.constant 0 : index
    %c0_51 = arith.constant 0 : index
    %c0_52 = arith.constant 0 : index
    %141 = vector.load %arg9[%c0_50, %c0_51, %c0_52] : memref<1x128x128xbf16, #tpu.memory_space<vmem>>, vector<1x128x128xbf16>
    %142 = vector.shape_cast %141 : vector<1x128x128xbf16> to vector<128x128xbf16>
    %cst_53 = arith.constant dense<0.000000e+00> : vector<32x128xf32>
    %143 = tpu.matmul %140, %142, %cst_53 {dimension_numbers = #tpu.dot_dimension_numbers<[1], [0], [0], [1], [0, 0, 1, 1], [], []>} : vector<32x128xbf16>, vector<128x128xbf16>, vector<32x128xf32> -> vector<32x128xf32>
    %c0_54 = arith.constant 0 : index
    %c0_55 = arith.constant 0 : index
    %c0_56 = arith.constant 0 : index
    %144 = vector.load %arg10[%c0_54, %c0_55, %c0_56] : memref<1x1x128xf32, #tpu.memory_space<vmem>>, vector<1x1x128xf32>
    %145 = vector.shape_cast %144 : vector<1x1x128xf32> to vector<1x128xf32>
    %146 = vector.broadcast %145 : vector<1x128xf32> to vector<32x128xf32>
    %147 = arith.addf %143, %146 : vector<32x128xf32>
    %148 = arith.addf %3, %147 : vector<32x128xf32>
    %c0_57 = arith.constant 0 : index
    %c0_58 = arith.constant 0 : index
    %c0_59 = arith.constant 0 : index
    %149 = vector.load %arg13[%c0_57, %c0_58, %c0_59] : memref<1x1x128xf32, #tpu.memory_space<vmem>>, vector<1x1x128xf32>
    %150 = vector.shape_cast %149 : vector<1x1x128xf32> to vector<1x128xf32>
    %c0_60 = arith.constant 0 : index
    %c0_61 = arith.constant 0 : index
    %c0_62 = arith.constant 0 : index
    %151 = vector.load %arg14[%c0_60, %c0_61, %c0_62] : memref<1x1x128xf32, #tpu.memory_space<vmem>>, vector<1x1x128xf32>
    %152 = vector.shape_cast %151 : vector<1x1x128xf32> to vector<1x128xf32>
    %cst_63 = arith.constant dense<0.000000e+00> : vector<32xf32>
    %153 = vector.multi_reduction <add>, %148, %cst_63 [1] : vector<32x128xf32> to vector<32xf32>
    %154 = vector.shape_cast %153 : vector<32xf32> to vector<32x1xf32>
    %cst_64 = arith.constant 1.280000e+02 : f32
    %155 = vector.broadcast %cst_64 : f32 to vector<32x1xf32>
    %156 = arith.divf %154, %155 : vector<32x1xf32>
    %157 = vector.broadcast %156 : vector<32x1xf32> to vector<32x128xf32>
    %158 = arith.subf %148, %157 : vector<32x128xf32>
    %159 = arith.mulf %158, %158 : vector<32x128xf32>
    %cst_65 = arith.constant dense<0.000000e+00> : vector<32xf32>
    %160 = vector.multi_reduction <add>, %159, %cst_65 [1] : vector<32x128xf32> to vector<32xf32>
    %161 = vector.shape_cast %160 : vector<32xf32> to vector<32x1xf32>
    %cst_66 = arith.constant 1.280000e+02 : f32
    %162 = vector.broadcast %cst_66 : f32 to vector<32x1xf32>
    %163 = arith.divf %161, %162 : vector<32x1xf32>
    %164 = vector.broadcast %156 : vector<32x1xf32> to vector<32x128xf32>
    %165 = arith.subf %148, %164 : vector<32x128xf32>
    %cst_67 = arith.constant 9.99999974E-6 : f32
    %166 = vector.broadcast %cst_67 : f32 to vector<32x1xf32>
    %167 = arith.addf %163, %166 : vector<32x1xf32>
    %168 = math.rsqrt %167 : vector<32x1xf32>
    %169 = vector.broadcast %168 : vector<32x1xf32> to vector<32x128xf32>
    %170 = arith.mulf %165, %169 : vector<32x128xf32>
    %171 = vector.broadcast %150 : vector<1x128xf32> to vector<32x128xf32>
    %172 = arith.mulf %170, %171 : vector<32x128xf32>
    %173 = vector.broadcast %152 : vector<1x128xf32> to vector<32x128xf32>
    %174 = arith.addf %172, %173 : vector<32x128xf32>
    %175 = arith.truncf %174 : vector<32x128xf32> to vector<32x128xbf16>
    %c0_68 = arith.constant 0 : index
    %c0_69 = arith.constant 0 : index
    %c0_70 = arith.constant 0 : index
    %176 = vector.load %arg15[%c0_68, %c0_69, %c0_70] : memref<1x128x512xbf16, #tpu.memory_space<vmem>>, vector<1x128x512xbf16>
    %177 = vector.shape_cast %176 : vector<1x128x512xbf16> to vector<128x512xbf16>
    %cst_71 = arith.constant dense<0.000000e+00> : vector<32x512xf32>
    %178 = tpu.matmul %175, %177, %cst_71 {dimension_numbers = #tpu.dot_dimension_numbers<[1], [0], [0], [1], [0, 0, 1, 1], [], []>} : vector<32x128xbf16>, vector<128x512xbf16>, vector<32x512xf32> -> vector<32x512xf32>
    %c0_72 = arith.constant 0 : index
    %c0_73 = arith.constant 0 : index
    %c0_74 = arith.constant 0 : index
    %179 = vector.load %arg16[%c0_72, %c0_73, %c0_74] : memref<1x1x512xf32, #tpu.memory_space<vmem>>, vector<1x1x512xf32>
    %180 = vector.shape_cast %179 : vector<1x1x512xf32> to vector<1x512xf32>
    %181 = vector.broadcast %180 : vector<1x512xf32> to vector<32x512xf32>
    %182 = arith.addf %178, %181 : vector<32x512xf32>
    %cst_75 = arith.constant 1.702000e+00 : f32
    %183 = vector.broadcast %cst_75 : f32 to vector<32x512xf32>
    %184 = arith.mulf %183, %182 : vector<32x512xf32>
    %185 = arith.negf %184 : vector<32x512xf32>
    %186 = math.exp %185 : vector<32x512xf32>
    %cst_76 = arith.constant 1.000000e+00 : f32
    %187 = vector.broadcast %cst_76 : f32 to vector<32x512xf32>
    %188 = arith.addf %187, %186 : vector<32x512xf32>
    %189 = arith.divf %187, %188 : vector<32x512xf32>
    %190 = arith.mulf %182, %189 : vector<32x512xf32>
    %191 = arith.truncf %190 : vector<32x512xf32> to vector<32x512xbf16>
    %c0_77 = arith.constant 0 : index
    %c0_78 = arith.constant 0 : index
    %c0_79 = arith.constant 0 : index
    %192 = vector.load %arg17[%c0_77, %c0_78, %c0_79] : memref<1x512x128xbf16, #tpu.memory_space<vmem>>, vector<1x512x128xbf16>
    %193 = vector.shape_cast %192 : vector<1x512x128xbf16> to vector<512x128xbf16>
    %cst_80 = arith.constant dense<0.000000e+00> : vector<32x128xf32>
    %194 = tpu.matmul %191, %193, %cst_80 {dimension_numbers = #tpu.dot_dimension_numbers<[1], [0], [0], [1], [0, 0, 1, 1], [], []>} : vector<32x512xbf16>, vector<512x128xbf16>, vector<32x128xf32> -> vector<32x128xf32>
    %c0_81 = arith.constant 0 : index
    %c0_82 = arith.constant 0 : index
    %c0_83 = arith.constant 0 : index
    %195 = vector.load %arg18[%c0_81, %c0_82, %c0_83] : memref<1x1x128xf32, #tpu.memory_space<vmem>>, vector<1x1x128xf32>
    %196 = vector.shape_cast %195 : vector<1x1x128xf32> to vector<1x128xf32>
    %197 = vector.broadcast %196 : vector<1x128xf32> to vector<32x128xf32>
    %198 = arith.addf %194, %197 : vector<32x128xf32>
    %199 = arith.addf %148, %198 : vector<32x128xf32>
    %c0_84 = arith.constant 0 : index
    %c0_85 = arith.constant 0 : index
    %200 = vector.load %arg23[%c0_84, %c0_85] : memref<32x128xf32, #tpu.memory_space<vmem>>, vector<32x128xf32>
    tpu.vector_store %arg23[%c0_84, %c0_85], %199 {strides = array<i32>} : memref<32x128xf32, #tpu.memory_space<vmem>>, vector<32x128xf32>,
    %c1_i32 = arith.constant 1 : i32
    %201 = arith.cmpi eq, %arg1, %c1_i32 : i32
    %202 = arith.extui %201 : i1 to i32
    %c0_i32_86 = arith.constant 0 : i32
    %203 = arith.cmpi ne, %202, %c0_i32_86 : i32
    scf.if %203 {
      %204 = vector.extract_strided_slice %199 {offsets = [0, 0], sizes = [1, 128], strides = [1, 1]} : vector<32x128xf32> to vector<1x128xf32>
      %c0_87 = arith.constant 0 : index
      %c0_88 = arith.constant 0 : index
      %205 = vector.load %arg19[%c0_87, %c0_88] : memref<1x128xf32, #tpu.memory_space<vmem>>, vector<1x128xf32>
      %c0_89 = arith.constant 0 : index
      %c0_90 = arith.constant 0 : index
      %206 = vector.load %arg20[%c0_89, %c0_90] : memref<1x128xf32, #tpu.memory_space<vmem>>, vector<1x128xf32>
      %cst_91 = arith.constant dense<0.000000e+00> : vector<1xf32>
      %207 = vector.multi_reduction <add>, %204, %cst_91 [1] : vector<1x128xf32> to vector<1xf32>
      %208 = vector.shape_cast %207 : vector<1xf32> to vector<1x1xf32>
      %cst_92 = arith.constant 1.280000e+02 : f32
      %209 = vector.broadcast %cst_92 : f32 to vector<1x1xf32>
      %210 = arith.divf %208, %209 : vector<1x1xf32>
      %211 = vector.broadcast %210 : vector<1x1xf32> to vector<1x128xf32>
      %212 = arith.subf %204, %211 : vector<1x128xf32>
      %213 = arith.mulf %212, %212 : vector<1x128xf32>
      %cst_93 = arith.constant dense<0.000000e+00> : vector<1xf32>
      %214 = vector.multi_reduction <add>, %213, %cst_93 [1] : vector<1x128xf32> to vector<1xf32>
      %215 = vector.shape_cast %214 : vector<1xf32> to vector<1x1xf32>
      %cst_94 = arith.constant 1.280000e+02 : f32
      %216 = vector.broadcast %cst_94 : f32 to vector<1x1xf32>
      %217 = arith.divf %215, %216 : vector<1x1xf32>
      %218 = vector.broadcast %210 : vector<1x1xf32> to vector<1x128xf32>
      %219 = arith.subf %204, %218 : vector<1x128xf32>
      %cst_95 = arith.constant 9.99999974E-6 : f32
      %220 = vector.broadcast %cst_95 : f32 to vector<1x1xf32>
      %221 = arith.addf %217, %220 : vector<1x1xf32>
      %222 = math.rsqrt %221 : vector<1x1xf32>
      %223 = vector.broadcast %222 : vector<1x1xf32> to vector<1x128xf32>
      %224 = arith.mulf %219, %223 : vector<1x128xf32>
      %225 = arith.mulf %224, %205 : vector<1x128xf32>
      %226 = arith.addf %225, %206 : vector<1x128xf32>
      %227 = arith.truncf %226 : vector<1x128xf32> to vector<1x128xbf16>
      %c0_96 = arith.constant 0 : index
      %c0_97 = arith.constant 0 : index
      %228 = vector.load %arg21[%c0_96, %c0_97] : memref<128x128xbf16, #tpu.memory_space<vmem>>, vector<128x128xbf16>
      %cst_98 = arith.constant dense<0.000000e+00> : vector<1x128xf32>
      %229 = tpu.matmul %227, %228, %cst_98 {dimension_numbers = #tpu.dot_dimension_numbers<[1], [0], [0], [1], [0, 0, 1, 1], [], []>} : vector<1x128xbf16>, vector<128x128xbf16>, vector<1x128xf32> -> vector<1x128xf32>
      %c0_99 = arith.constant 0 : index
      %c0_100 = arith.constant 0 : index
      %c0_101 = arith.constant 0 : index
      %230 = vector.load %arg22[%c0_99, %c0_100, %c0_101] : memref<1x1x128xf32, #tpu.memory_space<vmem>>, vector<1x1x128xf32>
      %231 = vector.shape_cast %230 : vector<1x1x128xf32> to vector<1x128xf32>
      %232 = vector.shape_cast %229 : vector<1x128xf32> to vector<1x1x128xf32>
      tpu.vector_store %arg22[%c0_99, %c0_100, %c0_101], %232 {strides = array<i32>} : memref<1x1x128xf32, #tpu.memory_space<vmem>>, vector<1x1x128xf32>,
    } else {
    }
    return
  }
  func.func @transform_0(%arg0: i32, %arg1: i32) -> (i32, i32, i32) {
    %c0_i32 = arith.constant 0 : i32
    %c0_i32_0 = arith.constant 0 : i32
    %c0_i32_1 = arith.constant 0 : i32
    return %arg0, %c0_i32, %c0_i32_0 : i32, i32, i32
  }
  func.func @transform_1(%arg0: i32, %arg1: i32) -> (i32, i32) {
    %c0_i32 = arith.constant 0 : i32
    %c0_i32_0 = arith.constant 0 : i32
    %c0_i32_1 = arith.constant 0 : i32
    return %c0_i32, %c0_i32_0 : i32, i32
  }
  func.func @transform_2(%arg0: i32, %arg1: i32) -> (i32, i32) {
    %c0_i32 = arith.constant 0 : i32
    %c0_i32_0 = arith.constant 0 : i32
    %c0_i32_1 = arith.constant 0 : i32
    return %c0_i32, %c0_i32_0 : i32, i32
  }
  func.func @transform_3(%arg0: i32, %arg1: i32) -> (i32, i32) {
    %c0_i32 = arith.constant 0 : i32
    %c0_i32_0 = arith.constant 0 : i32
    %c0_i32_1 = arith.constant 0 : i32
    return %c0_i32, %c0_i32_0 : i32, i32
  }
  func.func @transform_4(%arg0: i32, %arg1: i32) -> (i32, i32) {
    %c0_i32 = arith.constant 0 : i32
    %c0_i32_0 = arith.constant 0 : i32
    %c0_i32_1 = arith.constant 0 : i32
    return %c0_i32, %c0_i32_0 : i32, i32
  }
  func.func @transform_5(%arg0: i32, %arg1: i32) -> (i32, i32, i32) {
    %c0_i32 = arith.constant 0 : i32
    %c0_i32_0 = arith.constant 0 : i32
    %c0_i32_1 = arith.constant 0 : i32
    return %arg1, %c0_i32, %c0_i32_0 : i32, i32, i32
  }
  func.func @transform_6(%arg0: i32, %arg1: i32) -> (i32, i32, i32) {
    %c0_i32 = arith.constant 0 : i32
    %c0_i32_0 = arith.constant 0 : i32
    %c0_i32_1 = arith.constant 0 : i32
    return %arg1, %c0_i32, %c0_i32_0 : i32, i32, i32
  }
  func.func @transform_7(%arg0: i32, %arg1: i32) -> (i32, i32, i32) {
    %c0_i32 = arith.constant 0 : i32
    %c0_i32_0 = arith.constant 0 : i32
    %c0_i32_1 = arith.constant 0 : i32
    return %arg1, %c0_i32, %c0_i32_0 : i32, i32, i32
  }
  func.func @transform_8(%arg0: i32, %arg1: i32) -> (i32, i32, i32) {
    %c0_i32 = arith.constant 0 : i32
    %c0_i32_0 = arith.constant 0 : i32
    %c0_i32_1 = arith.constant 0 : i32
    return %arg1, %c0_i32, %c0_i32_0 : i32, i32, i32
  }
  func.func @transform_9(%arg0: i32, %arg1: i32) -> (i32, i32, i32) {
    %c0_i32 = arith.constant 0 : i32
    %c0_i32_0 = arith.constant 0 : i32
    %c0_i32_1 = arith.constant 0 : i32
    return %arg1, %c0_i32, %c0_i32_0 : i32, i32, i32
  }
  func.func @transform_10(%arg0: i32, %arg1: i32) -> (i32, i32, i32) {
    %c0_i32 = arith.constant 0 : i32
    %c0_i32_0 = arith.constant 0 : i32
    %c0_i32_1 = arith.constant 0 : i32
    return %arg1, %c0_i32, %c0_i32_0 : i32, i32, i32
  }
  func.func @transform_11(%arg0: i32, %arg1: i32) -> (i32, i32, i32) {
    %c0_i32 = arith.constant 0 : i32
    %c0_i32_0 = arith.constant 0 : i32
    %c0_i32_1 = arith.constant 0 : i32
    return %arg1, %c0_i32, %c0_i32_0 : i32, i32, i32
  }
  func.func @transform_12(%arg0: i32, %arg1: i32) -> (i32, i32, i32) {
    %c0_i32 = arith.constant 0 : i32
    %c0_i32_0 = arith.constant 0 : i32
    %c0_i32_1 = arith.constant 0 : i32
    return %arg1, %c0_i32, %c0_i32_0 : i32, i32, i32
  }
  func.func @transform_13(%arg0: i32, %arg1: i32) -> (i32, i32, i32) {
    %c0_i32 = arith.constant 0 : i32
    %c0_i32_0 = arith.constant 0 : i32
    %c0_i32_1 = arith.constant 0 : i32
    return %arg1, %c0_i32, %c0_i32_0 : i32, i32, i32
  }
  func.func @transform_14(%arg0: i32, %arg1: i32) -> (i32, i32, i32) {
    %c0_i32 = arith.constant 0 : i32
    %c0_i32_0 = arith.constant 0 : i32
    %c0_i32_1 = arith.constant 0 : i32
    return %arg1, %c0_i32, %c0_i32_0 : i32, i32, i32
  }
  func.func @transform_15(%arg0: i32, %arg1: i32) -> (i32, i32, i32) {
    %c0_i32 = arith.constant 0 : i32
    %c0_i32_0 = arith.constant 0 : i32
    %c0_i32_1 = arith.constant 0 : i32
    return %arg1, %c0_i32, %c0_i32_0 : i32, i32, i32
  }
  func.func @transform_16(%arg0: i32, %arg1: i32) -> (i32, i32, i32) {
    %c0_i32 = arith.constant 0 : i32
    %c0_i32_0 = arith.constant 0 : i32
    %c0_i32_1 = arith.constant 0 : i32
    return %arg1, %c0_i32, %c0_i32_0 : i32, i32, i32
  }
  func.func @transform_17(%arg0: i32, %arg1: i32) -> (i32, i32) {
    %c0_i32 = arith.constant 0 : i32
    %c0_i32_0 = arith.constant 0 : i32
    %c0_i32_1 = arith.constant 0 : i32
    return %c0_i32, %c0_i32_0 : i32, i32
  }
  func.func @transform_18(%arg0: i32, %arg1: i32) -> (i32, i32) {
    %c0_i32 = arith.constant 0 : i32
    %c0_i32_0 = arith.constant 0 : i32
    %c0_i32_1 = arith.constant 0 : i32
    return %c0_i32, %c0_i32_0 : i32, i32
  }
  func.func @transform_19(%arg0: i32, %arg1: i32) -> (i32, i32) {
    %c0_i32 = arith.constant 0 : i32
    %c0_i32_0 = arith.constant 0 : i32
    %c0_i32_1 = arith.constant 0 : i32
    return %c0_i32, %c0_i32_0 : i32, i32
  }
  func.func @transform_20(%arg0: i32, %arg1: i32) -> (i32, i32, i32) {
    %c0_i32 = arith.constant 0 : i32
    %c0_i32_0 = arith.constant 0 : i32
    %c0_i32_1 = arith.constant 0 : i32
    return %arg0, %c0_i32, %c0_i32_0 : i32, i32, i32
  }
}

</mosaic_0001>

<bundles_post_ra>
// kernel: tpu_custom_call.1
= control target key start
LH: loop header
LB: loop body
LE: loop exit
PB: predicated region body
PF: predicated region fallthrough
CT: control target
= control target key end

     0   :  { %s6852_s0 = inlined_call_operand.hbm [shape: bf16[2,32,48], index: 0, kind: input, shape index: {}]   ;;  %s6853_s1 = inlined_call_operand.hbm [shape: bf16[48,128], index: 1, kind: input, shape index: {}]   ;;  %s6854_s2 = inlined_call_operand.hbm [shape: f32[32,128], index: 2, kind: input, shape index: {}]   ;;  %s6855_s3 = inlined_call_operand.hbm [shape: f32[1,128], index: 3, kind: input, shape index: {}]   ;;  %s6856_s4 = inlined_call_operand.hbm [shape: f32[1,128], index: 4, kind: input, shape index: {}]   ;;  %s6857_s5 = inlined_call_operand.hbm [shape: bf16[2,128,384], index: 5, kind: input, shape index: {}]   ;;  %s6858_s6 = inlined_call_operand.hbm [shape: f32[2,1,384], index: 6, kind: input, shape index: {}]   ;;  %s6859_s7 = inlined_call_operand.hbm [shape: bf16[2,128,128], index: 7, kind: input, shape index: {}]   ;;  %s6860_s8 = inlined_call_operand.vmem [shape: f32[2,1,128], index: 8, kind: input, shape index: {}]   ;;  %s6861_s9 = inlined_call_operand.vmem [shape: f32[2,1,128], index: 9, kind: input, shape index: {}]   ;;  %s6862_s10 = inlined_call_operand.hbm [shape: f32[2,1,128], index: 10, kind: input, shape index: {}]   ;;  %s6863_s11 = inlined_call_operand.hbm [shape: f32[2,1,128], index: 11, kind: input, shape index: {}]   ;;  %s6864_s12 = inlined_call_operand.hbm [shape: f32[2,1,128], index: 12, kind: input, shape index: {}]   ;;  %s6865_s13 = inlined_call_operand.hbm [shape: bf16[2,128,512], index: 13, kind: input, shape index: {}]   ;;  %s6866_s14 = inlined_call_operand.vmem [shape: f32[2,1,512], index: 14, kind: input, shape index: {}]   ;;  %s6867_s15 = inlined_call_operand.hbm [shape: bf16[2,512,128], index: 15, kind: input, shape index: {}]   ;;  %s6868_s16 = inlined_call_operand.vmem [shape: f32[2,1,128], index: 16, kind: input, shape index: {}]   ;;  %s6869_s17 = inlined_call_operand.vmem [shape: f32[1,128], index: 17, kind: input, shape index: {}]   ;;  %s6870_s18 = inlined_call_operand.vmem [shape: f32[1,128], index: 18, kind: input, shape index: {}]   ;;  %s6871_s19 = inlined_call_operand.hbm [shape: bf16[128,128], index: 19, kind: input, shape index: {}]   ;;  %s6872_s20 = inlined_call_operand.hbm [shape: f32[2,1,128], index: 20, kind: output, shape index: {}]  }
   0x1   :  { %6903 = sst [smem:[#allocation54_spill]] %s6852_s0 }
   0x2   :  { %6904 = sst [smem:[#allocation55_spill]] %s6853_s1 }
   0x3   :  { %6905 = sst [smem:[#allocation56_spill]] %s6854_s2 }
   0x4   :  { %6906 = sst [smem:[#allocation57_spill]] %s6855_s3 }
   0x5   :  { %6907 = sst [smem:[#allocation58_spill]] %s6856_s4 }
   0x6   :  { %6908 = sst [smem:[#allocation59_spill]] %s6857_s5 }
   0x7   :  { %6909 = sst [smem:[#allocation60_spill]] %s6858_s6 }
   0x8   :  { %6910 = sst [smem:[#allocation61_spill]] %s6859_s7 }
   0x9   :  { %6911 = sst [smem:[#allocation62_spill]] %s6860_s8 }
   0xa   :  { %6912 = sst [smem:[#allocation63_spill]] %s6861_s9 }
   0xb   :  { %6913 = sst [smem:[#allocation64_spill]] %s6862_s10 }
   0xc   :  { %6914 = sst [smem:[#allocation65_spill]] %s6863_s11 }
   0xd   :  { %6915 = sst [smem:[#allocation66_spill]] %s6864_s12 }
   0xe   :  { %6916 = sst [smem:[#allocation67_spill]] %s6865_s13 }
   0xf   :  { %6917 = sst [smem:[#allocation68_spill]] %s6866_s14 }
  0x10   :  { %6918 = sst [smem:[#allocation69_spill]] %s6867_s15 }
  0x11   :  { %6919 = sst [smem:[#allocation70_spill]] %s6868_s16 }
  0x12   :  { %6920 = sst [smem:[#allocation71_spill]] %s6869_s17 }
  0x13   :  { %6921 = sst [smem:[#allocation72_spill]] %s6870_s18 }
  0x14   :  { %6922 = sst [smem:[#allocation73_spill]] %s6871_s19 }
  0x15   :  { %6923 = sst [smem:[#allocation74_spill]] %s6872_s20 }
  0x16   :  { %25 = vsyncpa [#allocation5], 0 }
  0x17   :  { %27 = vsyncpa [#allocation5 + $0x1], 0 }
  0x18   :  { %28 = vsyncpa [#allocation8], 0 }
  0x19   :  { %29 = vsyncpa [#allocation11], 0 }
  0x1a   :  { %30 = vsyncpa [#allocation14], 0 }
  0x1b   :  { %32 = vsyncpa [#allocation14 + $0x1], 0 }
  0x1c   :  { %33 = vsyncpa [#allocation17], 0 }
  0x1d   :  { %35 = vsyncpa [#allocation17 + $0x1], 0 }
  0x1e   :  { %36 = vsyncpa [#allocation20], 0 }
  0x1f   :  { %38 = vsyncpa [#allocation20 + $0x1], 0 }
  0x20   :  { %39 = vsyncpa [#allocation23], 0 }
  0x21   :  { %41 = vsyncpa [#allocation23 + $0x1], 0 }
  0x22   :  { %42 = vsyncpa [#allocation26], 0 }
  0x23   :  { %43 = vsyncpa [#allocation6], 0 }
  0x24   :  { %45 = vsyncpa [#allocation6 + $0x1], 0  ;;  %s5520_s1 = smov 0   ;;  %s5522_s22 = smov 0  }
  0x25   :  { %s5524_s23 = smov 0   ;;  %s5526_s24 = smov 0  }
  0x26   :  { %s5528_s2 = smov 0   ;;  %s5530_s25 = smov 0  }
  0x27   :  { %s5532_s3 = smov 0   ;;  %s5534_s26 = smov 0  }
  0x28   :  { %s5536_s27 = smov 0   ;;  %s5538_s28 = smov 0  }
  0x29   :  { %s5540_s4 = smov 0  }
  0x2a LB: > { %6924 = sst [smem:[#allocation37_spill]] %s5359_s22  ;;  %s5574_s29 = sadd.s32 4294967295, %s5395_s4   ;;  %s5395_s4 = sphi %s5540_s4, %s51_s4   ;;  %s5391_s28 = sphi %s5538_s28, %s7038_s28   ;;  %s5387_s27 = sphi %s5536_s27, %s7037_s27   ;;  %s5383_s26 = sphi %s5534_s26, %s7036_s26   ;;  %s5379_s3 = sphi %s5532_s3, %s7035_s3   ;;  %s5375_s25 = sphi %s5530_s25, %s7034_s25   ;;  %s5371_s2 = sphi %s5528_s2, %s7033_s2   ;;  %s5367_s24 = sphi %s5526_s24, %s7032_s24   ;;  %s5363_s23 = sphi %s5524_s23, %s7031_s23   ;;  %s5359_s22 = sphi %s5522_s22, %s7030_s22   ;;  %s5355_s1 = sphi %s5520_s1, %s7029_s1  }
  0x2b   : > { %6925 = sst [smem:[#allocation38_spill]] %s5363_s23  ;;  %p193_p0 = scmp.ne.s32.totalorder %s5359_s22, %s5355_s1 }
  0x2c   : > { %6926 = sst [smem:[#allocation39_spill]] %s5371_s2  ;;  %p6894_p1 = scmp.eq.s32.totalorder %s5574_s29, 0 }
  0x2d   : > { %6927 = sst [smem:[#allocation40_spill]] %s5375_s25  ;;  %p3822_p2 = scmp.ge.s32.totalorder %s5395_s4, 1 }
  0x2e   : > { %6928 = sst [smem:[#allocation41_spill]] %s5379_s3  ;;  %p579_p3 = scmp.lt.s32.totalorder %s5395_s4, 5 }
  0x2f   : > { %6929 = sst [smem:[#allocation42_spill]] %s5383_s26  ;;  %p5582_p4 = por %p193_p0, %p6894_p1 }
  0x30   : > { %6930 = sst [smem:[#allocation43_spill]] %s5387_s27  ;;  %p5589_p5 = pnand %p3822_p2, %p579_p3 }
  0x31   : > { %6931 = sst [smem:[#allocation44_spill]] %s5391_s28  ;;  %s5397_s1 = smov [#allocation7]  }
  0x32   : > { %s6932_s30 = scalar_select %p5582_p4, 1, 0 }
  0x33   : > { %s6934_s20 = sld [smem:[#allocation55_spill]]  ;;  %p4489_p6 = pneg %p5589_p5 }
  0x34   : > { %6933 = sst [smem:[#allocation45_spill]] %s6932_s30  ;;  %s592_s17 = sshll.u32 %s5397_s1, 4  ;;  %s593_s17 = int_to_ptr.vmem [resolvable:$true] %s592_s17 }
  0x35   : > { %s6935_s18 = scalar_select %p5589_p5, 1, 0 }
  0x36   : > { %p5597_p7 = pnand %p4489_p6, %p6894_p1  ;;  %s6938_s14 = sld [smem:[#allocation57_spill]] }
  0x37   : > { %6936 = sst [smem:[#allocation46_spill]] %s6935_s18  ;;  %s6875_s9 = smov 64  }
  0x38   : > { %s6877_s1 = smov 4   ;;  %s5400_s8 = smov [#allocation10]  }
  0x39   : > { %s590_s26 = sshll.u32 %s6934_s20, 4  ;;  %s621_s3 = sshll.u32 %s5400_s8, 4  ;;  %s591_s26 = int_to_ptr.hbm [resolvable:$true] %s590_s26  ;;  %s622_s3 = int_to_ptr.vmem [resolvable:$true] %s621_s3 }
  0x3a   : > { %4492 = dma.hbm_to_vmem [thread:$0]  (!%p5597_p7), %s591_s26, 384, %s593_s17, [#allocation8], %s6875_s9, %s6875_s9, %s6877_s1  }
  0x3b   : > { %p78_p8 = scmp.eq.s32.totalorder %s5395_s4, 0  ;;  %p187_p9 = scmp.ne.s32.totalorder %s5363_s23, %s5359_s22 }
  0x3c   : > { %s619_s16 = sshll.u32 %s6938_s14, 4  ;;  %p4542_p10 = scmp.lt.s32.totalorder %s5395_s4, 4  ;;  %s620_s16 = int_to_ptr.hbm [resolvable:$true] %s619_s16 }
  0x3d   : > { %4498 = dma.hbm_to_vmem [thread:$0]  (!%p5597_p7), %s620_s16, 16, %s622_s3, [#allocation11]  }
  0x3e   : > { %s5617_s14 = sand.u32 1, %s5395_s4   ;;  %s5620_s21 = sand.u32 1, %s5363_s23  }
  0x3f   : > { %6939 = sst [smem:[#allocation47_spill]] %s5617_s14  ;;  %p189_p11 = por %p187_p9, %p78_p8 }
  0x40   : > { %6940 = sst [smem:[#allocation48_spill]] %s5620_s21  ;;  %s4443_s17 = smul.u32 192, %s5620_s21 }
  0x41   : > { %s4444_s8 = smul.u32 192, %s5387_s27  ;;  %p5628_p12 = pnand %p4542_p10, %p189_p11 }
  0x42   : > { %s6943_s5 = sld [smem:[#allocation59_spill]]  ;;  %s690_s9 = scalar_lea.vmem [#allocation13], %s4443_s17 }
  0x43   : > { %s6941_s16 = scalar_select %p5628_p12, 1, 0 }
  0x44   : > { %s698_s1 = sshll.u32 %s690_s9, 4  ;;  %s6885_s22 = scalar_lea.sflag [#allocation14], %s5617_s14  ;;  %s699_s1 = int_to_ptr.vmem [resolvable:$true] %s698_s1 }
  0x45   : > { %6942 = sst [smem:[#allocation49_spill]] %s6941_s16  ;;  %s5401_s18 = smov 192  }
  0x46   : > { %s5402_s12 = smov 12   ;;  %s3833_s10 = sshll.u32 %s5620_s21, 6 }
  0x47   : > { %s4328_s3 = sshll.u32 %s5387_s27, 6  ;;  %s6944_s7 = sld [smem:[#allocation61_spill]] }
  0x48   : > { %s695_s0 = scalar_lea.hbm %s6943_s5, %s4444_s8  ;;  %s6886_s6 = scalar_lea.sflag [#allocation17], %s5617_s14 }
  0x49   : > { %s696_s30 = sshll.u32 %s695_s0, 4  ;;  %s731_s0 = scalar_lea.vmem [#allocation16], %s3833_s10  ;;  %s697_s30 = int_to_ptr.hbm [resolvable:$true] %s696_s30 }
  0x4a   : > { %4511 = dma.hbm_to_vmem [thread:$0]  (!%p5628_p12), %s697_s30, 3072, %s699_s1, %s6885_s22, %s5401_s18, %s5401_s18, %s5402_s12  }
  0x4b   : > { %s739_s26 = sshll.u32 %s731_s0, 4  ;;  %s6945_s23 = smov 4   ;;  %s740_s26 = int_to_ptr.vmem [resolvable:$true] %s739_s26 }
  0x4c   : > { %s6946_s12 = smov 64   ;;  %s6947_s11 = sld [smem:[#allocation65_spill]] }
  0x4d   : > { %s736_s9 = scalar_lea.hbm %s6944_s7, %s4328_s3  ;;  %s781_s8 = scalar_lea.vmem [#allocation19], %s5620_s21 }
  0x4e   : > { %s737_s5 = sshll.u32 %s736_s9, 4  ;;  %s788_s10 = sshll.u32 %s781_s8, 4  ;;  %s738_s5 = int_to_ptr.hbm [resolvable:$true] %s737_s5  ;;  %s789_s10 = int_to_ptr.vmem [resolvable:$true] %s788_s10 }
  0x4f   : > { %4517 = dma.hbm_to_vmem [thread:$0]  (!%p5628_p12), %s738_s5, 1024, %s740_s26, %s6886_s6, %s6946_s12, %s6946_s12, %s6945_s23  }
  0x50   : > { %s6887_s17 = scalar_lea.sflag [#allocation20], %s5617_s14  ;;  %s3836_s9 = sshll.u32 %s5620_s21, 8 }
  0x51   : > { %s4329_s0 = sshll.u32 %s5387_s27, 8  ;;  %s6948_s13 = sld [smem:[#allocation67_spill]] }
  0x52   : > { %s784_s1 = scalar_lea.hbm %s6947_s11, %s5387_s27  ;;  %s816_s18 = scalar_lea.vmem [#allocation22], %s3836_s9 }
  0x53   : > { %s786_s3 = sshll.u32 %s784_s1, 4  ;;  %s824_s30 = sshll.u32 %s816_s18, 4  ;;  %s787_s3 = int_to_ptr.hbm [resolvable:$true] %s786_s3  ;;  %s825_s30 = int_to_ptr.vmem [resolvable:$true] %s824_s30 }
  0x54   : > { %4523 = dma.hbm_to_vmem [thread:$0]  (!%p5628_p12), %s787_s3, 16, %s789_s10, %s6887_s17  }
  0x55   : > { %s6895_s1 = scalar_lea.sflag [#allocation23], %s5617_s14  ;;  %s5403_s8 = smov 256  }
  0x56   : > { %s5404_s7 = smov 16   ;;  %s6949_s15 = sld [smem:[#allocation69_spill]] }
  0x57   : > { %s821_s26 = scalar_lea.hbm %s6948_s13, %s4329_s0  ;;  %s845_s17 = scalar_lea.vmem [#allocation24], %s3836_s9 }
  0x58   : > { %s822_s6 = sshll.u32 %s821_s26, 4  ;;  %s853_s21 = sshll.u32 %s845_s17, 4  ;;  %s823_s6 = int_to_ptr.hbm [resolvable:$true] %s822_s6  ;;  %s5676_s21 = int_to_ptr.vmem [resolvable:$true] %s853_s21 }
  0x59   : > { %4529 = dma.hbm_to_vmem [thread:$0]  (!%p5628_p12), %s823_s6, 4096, %s825_s30, %s6895_s1, %s5403_s8, %s5403_s8, %s5404_s7  }
  0x5a   : > { %s6950_s18 = sld [smem:[#allocation56_spill]]  ;;  %s5405_s16 = smov [#allocation9]  }
  0x5b   : > { %s606_s14 = sshll.u32 %s5405_s16, 4  ;;  %s5406_s6 = smov 128   ;;  %s607_s14 = int_to_ptr.vmem [resolvable:$true] %s606_s14 }
  0x5c   : > { %s850_s10 = scalar_lea.hbm %s6949_s15, %s4329_s0  ;;  %s5407_s7 = smov 8  }
  0x5d   : > { %s851_s22 = sshll.u32 %s850_s10, 4  ;;  %s6951_s9 = sld [smem:[#allocation58_spill]]  ;;  %s5678_s22 = int_to_ptr.hbm [resolvable:$true] %s851_s22 }
  0x5e   : > { %s5408_s30 = smov [#allocation12]   ;;  %s6952_s19 = sld [smem:[#allocation73_spill]] }
  0x5f   : > { %s633_s8 = sshll.u32 %s5408_s30, 4  ;;  %s6953_s5 = sld [smem:[#allocation38_spill]]  ;;  %s634_s8 = int_to_ptr.vmem [resolvable:$true] %s633_s8 }
  0x60   : > { %s604_s13 = sshll.u32 %s6950_s18, 4  ;;  %s3821_s26 = sadd.s32 4294967294, %s5395_s4   ;;  %s605_s13 = int_to_ptr.hbm [resolvable:$true] %s604_s13 }
  0x61   : > { %4495 = dma.hbm_to_vmem [thread:$0]  (!%p5597_p7), %s605_s13, 512, %s607_s14, [#allocation8], %s5406_s6, %s5406_s6, %s5407_s7  }
  0x62   : > { %s5409_s14 = smov [#allocation25]   ;;  %s60_s18 = sadd.s32 1, %s5387_s27 }
  0x63   : > { %s631_s0 = sshll.u32 %s6951_s9, 4  ;;  %s650_s10 = sshll.u32 %s5409_s14, 4  ;;  %s632_s0 = int_to_ptr.hbm [resolvable:$true] %s631_s0  ;;  %s651_s10 = int_to_ptr.vmem [resolvable:$true] %s650_s10 }
  0x64   : > { %s648_s13 = sshll.u32 %s6952_s19, 4  ;;  %p61_p13 = scmp.ge.s32.totalorder %s60_s18, 2  ;;  %s649_s13 = int_to_ptr.hbm [resolvable:$true] %s648_s13 }
  0x65   : > { %4501 = dma.hbm_to_vmem [thread:$0]  (!%p5597_p7), %s632_s0, 16, %s634_s8, [#allocation11]  }
  0x66   : > { %4504 = dma.hbm_to_vmem [thread:$0]  (!%p5597_p7), %s649_s13, 1024, %s651_s10, [#allocation26], %s6946_s12, %s6946_s12, %s6945_s23  }
  0x67   : > { %s63_s6 = sadd.s32 1, %s5391_s28  ;;  %s70_s7 = sadd.s32 1, %s5375_s25 }
  0x68   : > { %p77_p0 = scmp.ne.s32.totalorder %s5375_s25, %s5371_s2  ;;  %s7040_s18 = smov (%p61_p13, %s60_s18), 0 }
  0x69   : > { %6954 = sst [smem:[#allocation50_spill]] %s7040_s18  ;;  %s7042_s6 = smov (!%p61_p13, %s63_s6), %s5391_s28 }
  0x6a   : > { %p5712_p2 = por %p78_p8, %p77_p0  ;;  %p83_p3 = scmp.ne.s32.totalorder %s5371_s2, %s5367_s24 }
  0x6b   : > { %p65_p6 = scmp.ge.s32.totalorder %s7042_s6, 2  ;;  %s177_s11 = ssub.s32 %s5387_s27, %s7040_s18 }
  0x6c   : > { %p5725_p7 = por %p6894_p1, %p83_p3  ;;  %p178_p9 = scmp.eq.s32.totalorder %s177_s11, 0 }
  0x6d   : > { %s7044_s6 = smov (%p65_p6, %s7042_s6), 0  ;;  %s6958_s9 = sadd.s32 1, %s6953_s5 }
  0x6e   : > { %6957 = sst [smem:[#allocation51_spill]] %s7044_s6  ;;  %s7046_s5 = smov (!%p178_p9, %s6953_s5), %s6958_s9 }
  0x6f   : > { %6959 = sst [smem:[#allocation52_spill]] %s7046_s5  ;;  %s67_s0 = ssub.s32 %s5391_s28, %s7044_s6 }
  0x70   : > { %p566_p8 = scmp.eq.s32.totalorder %s5574_s29, 3  ;;  %s6960_s30 = sld [smem:[#allocation48_spill]] }
  0x71   : > { %p68_p11 = scmp.eq.s32.totalorder %s67_s0, 0  ;;  %p572_p13 = scmp.eq.s32.totalorder %s3821_s26, 3 }
  0x72   : > { %p5742_p1 = por %p566_p8, %p77_p0  ;;  %s664_s16 = sand.u32 1, %s5375_s25  }
  0x73   : > { %s5748_s3 = scalar_select %p68_p11, %s5375_s25, %s70_s7  }
  0x74   : > { %p5753_p6 = por %p572_p13, %p83_p3  ;;  %s3829_s14 = sshll.u32 %s664_s16, 4 }
  0x75   : > { %6962 = sst [smem:[#allocation53_spill]] %s5748_s3  ;;  %s4327_s10 = sshll.u32 %s5391_s28, 4 }
  0x76   : > { %s6963_s13 = scalar_select %p5753_p6, 1, 0 }
  0x77   : > { %s6965_s0 = sld [smem:[#allocation54_spill]]  ;;  %s668_s15 = scalar_lea.vmem [#allocation4], %s3829_s14 }
  0x78   : > { %6964 = sst [smem:[#allocation48_spill]] %s6963_s13  ;;  %s676_s18 = sshll.u32 %s668_s15, 4  ;;  %s677_s18 = int_to_ptr.vmem [resolvable:$true] %s676_s18 }
  0x79   : > { %s6967_s6 = sld [smem:[#allocation47_spill]]  ;;  %p4506_p0 = pnand %p4542_p10, %p5712_p2 }
  0x7a   : > { %s4445_s7 = smul.u32 3, %s6960_s30  ;;  %s665_s28 = scalar_lea.sflag [#allocation5], %s664_s16 }
  0x7b   : > { %s4446_s3 = smul.u32 3, %s5387_s27  ;;  %s6969_s16 = sld [smem:[#allocation64_spill]] }
  0x7c   : > { %s712_s11 = scalar_lea.vmem [#allocation15], %s4445_s7 }
  0x7d   : > { %s673_s1 = scalar_lea.hbm %s6965_s0, %s4327_s10  ;;  %s6968_s10 = sld [smem:[#allocation60_spill]] }
  0x7e   : > { %s674_s26 = sshll.u32 %s673_s1, 4  ;;  %s720_s9 = sshll.u32 %s712_s11, 4  ;;  %s675_s26 = int_to_ptr.hbm [resolvable:$true] %s674_s26  ;;  %s721_s9 = int_to_ptr.vmem [resolvable:$true] %s720_s9 }
  0x7f   : > { %4508 = dma.hbm_to_vmem [thread:$0]  (!%p4506_p0), %s675_s26, 256, %s677_s18, %s665_s28, %s6946_s12, %s6946_s12, %s6945_s23  }
  0x80   : > { %s6970_s18 = scalar_lea.sflag [#allocation14], %s6967_s6  ;;  %s764_s26 = scalar_lea.vmem [#allocation18], %s6960_s30 }
  0x81   : > { %s767_s28 = scalar_lea.hbm %s6969_s16, %s5387_s27  ;;  %s771_s7 = sshll.u32 %s764_s26, 4  ;;  %s772_s7 = int_to_ptr.vmem [resolvable:$true] %s771_s7 }
  0x82   : > { %s6971_s1 = scalar_lea.sflag [#allocation17], %s6967_s6  ;;  %s798_s0 = scalar_lea.vmem [#allocation21], %s6960_s30 }
  0x83   : > { %s716_s15 = scalar_lea.hbm %s6968_s10, %s4446_s3  ;;  %s769_s3 = sshll.u32 %s767_s28, 4  ;;  %s770_s3 = int_to_ptr.hbm [resolvable:$true] %s769_s3 }
  0x84   : > { %s718_s20 = sshll.u32 %s716_s15, 4  ;;  %s6972_s15 = sld [smem:[#allocation66_spill]]  ;;  %s719_s20 = int_to_ptr.hbm [resolvable:$true] %s718_s20 }
  0x85   : > { %4514 = dma.hbm_to_vmem [thread:$0]  (!%p5628_p12), %s719_s20, 48, %s721_s9, %s6970_s18  }
  0x86   : > { %4520 = dma.hbm_to_vmem [thread:$0]  (!%p5628_p12), %s770_s3, 16, %s772_s7, %s6971_s1  }
  0x87   : > { %s805_s5 = sshll.u32 %s798_s0, 4  ;;  %s6973_s16 = scalar_lea.sflag [#allocation20], %s6967_s6  ;;  %s806_s5 = int_to_ptr.vmem [resolvable:$true] %s805_s5 }
  0x88   : > { %s6974_s9 = scalar_lea.sflag [#allocation23], %s6967_s6  ;;  %871 = sbr.rel (%p5589_p5) target bundleno = 3077 (0xc05), region = 100 }
  0x89   : > { %4532 = dma.hbm_to_vmem [thread:$0]  (!%p5628_p12), %s5678_s22, 4096, %s5676_s21, %s6974_s9, %s6946_s12, %s6946_s12, %s6945_s23  }
  0x8a   : > { %s801_s25 = scalar_lea.hbm %s6972_s15, %s5387_s27  ;;  %s5807_s28 = sand.u32 (!%p5589_p5), 1, %s5371_s2  }
  0x8b   : > { %s803_s11 = sshll.u32 %s801_s25, 4  ;;  %s3843_s30 = sshll.u32 (!%p5589_p5), %s5807_s28, 4  ;;  %s804_s11 = int_to_ptr.hbm [resolvable:$true] %s803_s11 }
  0x8c   : > { %4526 = dma.hbm_to_vmem [thread:$0]  (!%p5628_p12), %s804_s11, 16, %s806_s5, %s6973_s16  }
  0x8d   : > { %s874_s18 = scalar_lea.sflag [#allocation5], %s5807_s28  ;;  %s5811_s3 = scalar_lea.vmem [#allocation4], %s3843_s30 }
  0x8e   : > { %5318 = dma.done.wait (%p5725_p7), %s874_s18, 256  }
  0x8f   : > { %5320 = vsyncadd (%p5725_p7), %s874_s18, 4294967040  ;;  %p6976_p10 = scmp.eq.s32.totalorder %s5574_s29, 0 }
  0x91   : > { %5322 = dma.done.wait (%p6976_p10), [#allocation8], 896   ;;  %p6977_p5 = pmov %p6976_p10 }
  0x93   : > { %5324 = vsyncadd (%p6977_p5), [#allocation8], 4294966400  ;;  %p6978_p12 = pmov %p6977_p5 }
  0x94   : > { %p6979_p2 = pmov %p6977_p5 }
  0x95   : > { %5326 = dma.done.wait (%p6978_p12), [#allocation11], 32  }
  0x96   : > { %5328 = vsyncadd (%p6979_p2), [#allocation11], 4294967264  ;;  %s6980_s19 = sld [smem:[#allocation37_spill]]  ;;  %s903_s21 = sand.u32 1, %s5574_s29  }
  0x97   : > { %s904_s5 = scalar_lea.sflag [#allocation14], %s903_s21 }
  0x9c   : > { %s5827_s12 = sand.u32 1, %s6980_s19  }
  0x9d   : > { %s4447_s22 = smul.u32 192, %s5827_s12 }
  0x9f   : > { %s5830_s6 = scalar_lea.vmem [#allocation13], %s4447_s22 }
  0xa0   : > { %5330 = dma.done.wait (%p5582_p4), %s904_s5, 3120  }
  0xa1   : > { %5332 = vsyncadd (%p5582_p4), %s904_s5, 4294964176  ;;  %s4448_s17 = smul.u32 3, %s5827_s12  ;;  %s3848_s26 = sshll.u32 %s5827_s12, 6 }
  0xa2   : > { %s924_s1 = scalar_lea.sflag [#allocation17], %s903_s21  ;;  %s5840_s14 = scalar_lea.vmem [#allocation16], %s3848_s26 }
  0xa3   : > { %s5838_s7 = scalar_lea.vmem [#allocation15], %s4448_s17 }
  0xa4   : > { %5334 = dma.done.wait (%p5582_p4), %s924_s1, 1040  }
  0xa5   : > { %5336 = vsyncadd (%p5582_p4), %s924_s1, 4294966256  ;;  %s943_s15 = scalar_lea.sflag [#allocation20], %s903_s21 }
  0xa6   : > { %5338 = dma.done.wait (%p5582_p4), %s943_s15, 32  }
  0xa7   : > { %5340 = vsyncadd (%p5582_p4), %s943_s15, 4294967264  ;;  %s3849_s11 = sshll.u32 %s5827_s12, 8  ;;  %s961_s16 = scalar_lea.sflag [#allocation23], %s903_s21 }
  0xa8   : > { %s5854_s9 = scalar_lea.vmem [#allocation22], %s3849_s11 }
  0xa9   : > { %5342 = dma.done.wait (%p5582_p4), %s961_s16, 8192  }
  0xaa   : > { %5344 = vsyncadd (%p5582_p4), %s961_s16, 4294959104  ;;  %s5860_s20 = scalar_lea.vmem [#allocation24], %s3849_s11  ;;  %p6982_p3 = pmov %p6979_p2 }
  0xab   : > { %p6983_p7 = pmov %p6979_p2 }
  0xac   : > { %5346 = dma.done.wait (%p6982_p3), [#allocation26], 1024  }
  0xad   : > { %5348 = vsyncadd (%p6983_p7), [#allocation26], 4294966272  ;;  %s6984_s30 = sld [smem:[#allocation41_spill]]  ;;  %s1085_s13 = scalar_lea.vmem [#allocation27], %s5807_s28 }
  0xae   : > { %s6985_s22 = sld [smem:[#allocation62_spill]] }
  0xaf   : > { %s6986_s26 = sld [smem:[#allocation63_spill]] }
  0xb0   : > { %s6987_s16 = sld [smem:[#allocation70_spill]] }
  0xb1   : > { %s6988_s27 = sld [smem:[#allocation68_spill]] }
  0xb3   : > { %p1086_p9 = scmp.lt.s32.totalorder %s6984_s30, 1  ;;  %p3853_p4 = scmp.ne.s32.totalorder %s6984_s30, 0 }
  0xb5   : > { %s5868_s18 = scalar_select %p1086_p9, %s6984_s30, 1 }
  0xb6   : > { %1103 = sbr.rel (%p3853_p4) target bundleno = 603 (0x25b), region = 160 }
  0xb7   : > { %s1088_s23 = scalar_lea.vmem %s6985_s22, %s5868_s18  ;;  %s1091_s1 = scalar_lea.vmem %s6986_s26, %s5868_s18 }
  0xb8   : > { %s3852_s29 = sshll.u32 %s5868_s18, 2  ;;  %s1098_s0 = scalar_lea.vmem %s6987_s16, %s5868_s18 }
  0xb9   : > { %s5886_s2 = scalar_lea.vmem %s6988_s27, %s3852_s29 }
  0xbb   : > { %v4335_v0 = vld [vmem:[#allocation7 + $0x10] sm:$0xff]  ;;  %v4334_v1 = vld [vmem:[#allocation7 + $0x8] sm:$0xff]  ;;  %v4333_v2 = vld [vmem:[#allocation7] sm:$0xff]  ;;  %vm1146_vm0 = vcmask 392192   ;;  %v5410_v17 = vmov 128.0  }
  0xbc   : > { %1158 = vmatpush.bf16.msra.mxu0 %v4335_v0  ;;  %4440 = vmatpush.bf16.msra.mxu1 %v4335_v0  ;;  %v4331_v3 = vld [vmem:[%s5811_s3] sm:$0xff]  ;;  %v4332_v4 = vld [vmem:[%s5811_s3 + $0x8] sm:$0xff]  ;;  %4657 = vrcp.f32 %v5410_v17 }
  0xbd   : > { %v1114_v5 = vld [vmem:[#allocation9] sm:$0xff]  ;;  %v1116_v6 = vld [vmem:[#allocation9 + $0x10] sm:$0xff]  ;;  %v1115_v11 = vld [vmem:[#allocation9 + $0x8] sm:$0xff] }
  0xbe   : > { %v1117_v12 = vld [vmem:[#allocation9 + $0x18] sm:$0xff] }
  0xc0   : > { %1159 = vmatpush.bf16.msra.mxu0 %v4334_v1  ;;  %4441 = vmatpush.bf16.msra.mxu1 %v4334_v1 }
  0xc2   : > { %v4658_v18 = vpop.eup %4657 }
  0xc3   : > { %v1183_v19 = vmul.f32 128.0, %v4658_v18  ;;  %vm1187_vm1 = vweird.f32 %v4658_v18 }
  0xc4   : > { %1160 = vmatpush.bf16.msra.mxu0 %v4333_v2  ;;  %4442 = vmatpush.bf16.msra.mxu1 %v4333_v2  ;;  %v4655_v2 = vld [vmem:[#allocation10] ss:$0 sm:$0xff] }
  0xc5   : > { %v1184_v20 = vsub.f32 1.0, %v1183_v19 }
  0xc7   : > { %3874 = vmatmul.msk.bf16.vlgmr.msra.gmra.mxu0 %vm1146_vm0, %v4331_v3  ;;  %3875 = vmatmul.msk.bf16.vlgmr.msra.gmra.mxu1 %vm1146_vm0, %v4332_v4  ;;  %v1185_v21 = vmul.f32 %v4658_v18, %v1184_v20 }
  0xc9   : > { %v1186_v22 = vadd.f32 %v4658_v18, %v1185_v21 }
  0xcb   : > { %v1188_v23 = vsel %vm1187_vm1, %v4658_v18, %v1186_v22 }
 0x144   : > { %v1162_v7 = vpop.f32.mrf.mxu0  ;;  %v1167_v8 = vpop.f32.mrf.mxu1 }
 0x145   : > { %v1163_v9 = vadd.f32 %v1162_v7, %v1114_v5  ;;  %v1168_v10 = vadd.f32 %v1167_v8, %v1116_v6  ;;  %v4656_v7 = vld [vmem:[#allocation12] ss:$0 sm:$0xff] }
 0x147   : > { %1178 = vadd.xlane.f32.xlu1 %v1168_v10  ;;  %1174 = vadd.xlane.f32.xlu0 %v1163_v9 }
 0x14c   : > { %v1164_v13 = vpop.f32.mrf.mxu0  ;;  %v1169_v14 = vpop.f32.mrf.mxu1 }
 0x14d   : > { %v1165_v15 = vadd.f32 %v1164_v13, %v1115_v11  ;;  %v1170_v16 = vadd.f32 %v1169_v14, %v1117_v12 }
 0x14f   : > { %1180 = vadd.xlane.f32.xlu1 %v1170_v16  ;;  %1176 = vadd.xlane.f32.xlu0 %v1165_v15 }
 0x1ba   : > { %v1179_v24 = vpop.xlane.xlu1 %1178  ;;  %v1175_v25 = vpop.xlane.xlu0 %1174 }
 0x1bb   : > { %v1191_v26 = vmul.f32 %v1188_v23, %v1179_v24  ;;  %v1189_v27 = vmul.f32 %v1188_v23, %v1175_v25 }
 0x1bd   : > { %v1195_v28 = vsub.f32 %v1168_v10, %v1191_v26  ;;  %v1193_v29 = vsub.f32 %v1163_v9, %v1189_v27 }
 0x1bf   : > { %v1199_v30 = vmul.f32 %v1195_v28, %v1195_v28  ;;  %v1197_v31 = vmul.f32 %v1193_v29, %v1193_v29 }
 0x1c1   : > { %1205 = vadd.xlane.f32.xlu0 %v1199_v30  ;;  %1201 = vadd.xlane.f32.xlu2 %v1197_v31 }
 0x1c2   : > { %v1181_v32 = vpop.xlane.xlu1 %1180  ;;  %v1177_v33 = vpop.xlane.xlu0 %1176 }
 0x1c3   : > { %v1192_v34 = vmul.f32 %v1188_v23, %v1181_v32  ;;  %v1190_v35 = vmul.f32 %v1188_v23, %v1177_v33 }
 0x1c5   : > { %v5892_v36 = vsub.f32 %v1170_v16, %v1192_v34  ;;  %v5894_v37 = vsub.f32 %v1165_v15, %v1190_v35 }
 0x1c7   : > { %v1200_v38 = vmul.f32 %v5892_v36, %v5892_v36  ;;  %v1198_v39 = vmul.f32 %v5894_v37, %v5894_v37 }
 0x1c9   : > { %1207 = vadd.xlane.f32.xlu1 %v1200_v38  ;;  %1203 = vadd.xlane.f32.xlu2 %v1198_v39 }
 0x234   : > { %v1202_v40 = vpop.xlane.xlu2 %1201  ;;  %v1206_v41 = vpop.xlane.xlu0 %1205 }
 0x235   : > { %v1209_v42 = vmul.f32 %v1202_v40, %v1188_v23  ;;  %v1211_v43 = vmul.f32 %v1206_v41, %v1188_v23 }
 0x237   : > { %v1213_v44 = vadd.f32 1e-05, %v1209_v42  ;;  %v1215_v45 = vadd.f32 1e-05, %v1211_v43 }
 0x239   : > { %4659 = vrsqrt.f32 %v1213_v44  ;;  %vm1223_vm4 = vweird.f32 %v1213_v44  ;;  %vm1243_vm6 = vweird.f32 %v1215_v45 }
 0x23a   : > { %4661 = vrsqrt.f32 %v1215_v45 }
 0x23c   : > { %v1208_v46 = vpop.xlane.xlu1 %1207  ;;  %v1204_v47 = vpop.xlane.xlu2 %1203 }
 0x23d   : > { %v1212_v48 = vmul.f32 %v1208_v46, %v1188_v23  ;;  %v1210_v49 = vmul.f32 %v1204_v47, %v1188_v23 }
 0x23f   : > { %v4660_v50 = vpop.eup %4659  ;;  %v1216_v51 = vadd.f32 1e-05, %v1212_v48  ;;  %v1214_v52 = vadd.f32 1e-05, %v1210_v49 }
 0x240   : > { %v4662_v53 = vpop.eup %4661  ;;  %v1218_v54 = vmul.f32 %v4660_v50, %v1213_v44  ;;  %vm1224_vm2 = vweird.f32 %v4660_v50 }
 0x241   : > { %v1238_v55 = vmul.f32 %v4662_v53, %v1215_v45  ;;  %4663 = vrsqrt.f32 %v1216_v51  ;;  %vm1244_vm3 = vweird.f32 %v4662_v53  ;;  %vm1225_vm5 = vmor %vm1223_vm4, %vm1224_vm2  ;;  %vm1253_vm10 = vweird.f32 %v1216_v51 }
 0x242   : > { %v1219_v56 = vmul.f32 %v4660_v50, %v1218_v54  ;;  %4665 = vrsqrt.f32 %v1214_v52  ;;  %vm1245_vm7 = vmor %vm1243_vm6, %vm1244_vm3  ;;  %vm1233_vm12 = vweird.f32 %v1214_v52 }
 0x243   : > { %v1239_v57 = vmul.f32 %v4662_v53, %v1238_v55 }
 0x244   : > { %v1220_v58 = vmul.f32 0.5, %v1219_v56 }
 0x245   : > { %v1240_v59 = vmul.f32 0.5, %v1239_v57 }
 0x246   : > { %v1221_v60 = vsub.f32 1.5, %v1220_v58 }
 0x247   : > { %v4664_v61 = vpop.eup %4663  ;;  %v1241_v62 = vsub.f32 1.5, %v1240_v59 }
 0x248   : > { %v4666_v63 = vpop.eup %4665  ;;  %v1222_v0 = vmul.f32 %v4660_v50, %v1221_v60  ;;  %v1248_v1 = vmul.f32 %v4664_v61, %v1216_v51  ;;  %vm1254_vm8 = vweird.f32 %v4664_v61 }
 0x249   : > { %v1242_v3 = vmul.f32 %v4662_v53, %v1241_v62  ;;  %v1228_v4 = vmul.f32 %v4666_v63, %v1214_v52  ;;  %vm1234_vm9 = vweird.f32 %v4666_v63  ;;  %vm1255_vm11 = vmor %vm1253_vm10, %vm1254_vm8 }
 0x24a   : > { %v1226_v5 = vsel %vm1225_vm5, %v4660_v50, %v1222_v0  ;;  %v1249_v6 = vmul.f32 %v4664_v61, %v1248_v1  ;;  %vm1235_vm13 = vmor %vm1233_vm12, %vm1234_vm9 }
 0x24b   : > { %v1257_v8 = vmul.f32 %v1226_v5, %v1193_v29  ;;  %v1246_v9 = vsel %vm1245_vm7, %v4662_v53, %v1242_v3  ;;  %v1229_v10 = vmul.f32 %v4666_v63, %v1228_v4 }
 0x24c   : > { %v1259_v11 = vmul.f32 %v1246_v9, %v1195_v28  ;;  %v1250_v12 = vmul.f32 0.5, %v1249_v6 }
 0x24d   : > { %v1264_v13 = vmul.f32 %v4655_v2, %v1257_v8  ;;  %v1230_v14 = vmul.f32 0.5, %v1229_v10 }
 0x24e   : > { %v1266_v15 = vmul.f32 %v4655_v2, %v1259_v11  ;;  %v1251_v16 = vsub.f32 1.5, %v1250_v12 }
 0x24f   : > { %v1271_v17 = vadd.f32 %v4656_v7, %v1264_v13  ;;  %v1231_v18 = vsub.f32 1.5, %v1230_v14 }
 0x250   : > { %v1273_v19 = vadd.f32 %v4656_v7, %v1266_v15  ;;  %v1252_v20 = vmul.f32 %v4664_v61, %v1251_v16 }
 0x251   : > { %1275 = vst [vmem:[#allocation2 + $0x10] sm:$0xff] %v1271_v17  ;;  %v1232_v21 = vmul.f32 %v4666_v63, %v1231_v18 }
 0x252   : > { %1277 = vst [vmem:[#allocation2 + $0x18] sm:$0xff] %v1273_v19  ;;  %v1256_v22 = vsel %vm1255_vm11, %v4664_v61, %v1252_v20 }
 0x253   : > { %v1260_v23 = vmul.f32 %v1256_v22, %v5892_v36  ;;  %v1236_v24 = vsel %vm1235_vm13, %v4666_v63, %v1232_v21 }
 0x254   : > { %v1258_v25 = vmul.f32 %v1236_v24, %v5894_v37 }
 0x255   : > { %v1267_v26 = vmul.f32 %v4655_v2, %v1260_v23 }
 0x256   : > { %v1265_v27 = vmul.f32 %v4655_v2, %v1258_v25 }
 0x257   : > { %v1274_v28 = vadd.f32 %v4656_v7, %v1267_v26 }
 0x258   : > { %v1272_v29 = vadd.f32 %v4656_v7, %v1265_v27 }
 0x259   : > { %1278 = vst [vmem:[#allocation2 + $0x8] sm:$0xff] %v1274_v28 }
 0x25a   : > { %1276 = vst [vmem:[#allocation2] sm:$0xff] %v1272_v29 }
 0x25b PF: > { %v1281_v30 = vld [vmem:[#allocation2 + $0x18] sm:$0xff]  ;;  %v1279_v31 = vld [vmem:[#allocation2 + $0x10] sm:$0xff]  ;;  %v5411_v34 = vmov 128.0   ;;  %v3962_v57 = vld [vmem:[%s5830_s6 + $0xa8] sm:$0xf]  ;;  %s6990_s10 = scalar_lea.vmem [#allocation18], %s5827_s12 }
 0x25c   : > { %1289 = vadd.xlane.f32.xlu1 %v1281_v30  ;;  %1285 = vadd.xlane.f32.xlu0 %v1279_v31  ;;  %4673 = vrcp.f32 %v5411_v34  ;;  %v4358_v58 = vld [vmem:[%s5830_s6 + $0xb0] sm:$0xf0]  ;;  %v4357_v59 = vld [vmem:[%s5830_s6 + $0xac] sm:$0xf]  ;;  %v3964_v61 = vld [vmem:[%s5830_s6 + $0xb4] sm:$0xf0] }
 0x25d   : > { %v3963_v60 = vor.u32 %v4358_v58, %v3962_v57  ;;  %v3970_v62 = vld [vmem:[%s5830_s6 + $0xb0] sm:$0xf]  ;;  %v4359_v63 = vld [vmem:[%s5830_s6 + $0xb8] sm:$0xf0]  ;;  %v3967_v0 = vor.u32 %v4357_v59, %v3964_v61  ;;  %v4354_v4 = vld [vmem:[%s5830_s6 + $0x94] sm:$0xf] }
 0x25e   : > { %v3971_v1 = vor.u32 %v4359_v63, %v3970_v62  ;;  %v3950_v2 = vld [vmem:[%s5830_s6 + $0x90] sm:$0xf]  ;;  %v4355_v3 = vld [vmem:[%s5830_s6 + $0x98] sm:$0xf0]  ;;  %v3952_v6 = vld [vmem:[%s5830_s6 + $0x9c] sm:$0xf0] }
 0x25f   : > { %1556 = vmatpush.bf16.msra.mxu0 %v3963_v60  ;;  %1575 = vmatpush.bf16.msra.mxu1 %v3967_v0  ;;  %v3951_v5 = vor.u32 %v4355_v3, %v3950_v2  ;;  %v3958_v7 = vld [vmem:[%s5830_s6 + $0x98] sm:$0xf]  ;;  %v4356_v8 = vld [vmem:[%s5830_s6 + $0xa0] sm:$0xf0]  ;;  %v3955_v9 = vor.u32 %v4354_v4, %v3952_v6  ;;  %v4351_v13 = vld [vmem:[%s5830_s6 + $0x7c] sm:$0xf] }
 0x260   : > { %v1282_v32 = vld [vmem:[#allocation2 + $0x8] sm:$0xff]  ;;  %1594 = vmatpush.bf16.msra.mxu2 %v3971_v1  ;;  %v3959_v10 = vor.u32 %v4356_v8, %v3958_v7  ;;  %v3938_v11 = vld [vmem:[%s5830_s6 + $0x78] sm:$0xf]  ;;  %v4352_v12 = vld [vmem:[%s5830_s6 + $0x80] sm:$0xf0]  ;;  %s5413_s25 = smov 64  }
 0x261   : > { %v1280_v33 = vld [vmem:[#allocation2] sm:$0xff]  ;;  %v3939_v14 = vor.u32 %v4352_v12, %v3938_v11  ;;  %v3946_v16 = vld [vmem:[%s5830_s6 + $0x80] sm:$0xf]  ;;  %v4353_v17 = vld [vmem:[%s5830_s6 + $0x88] sm:$0xf0]  ;;  %vm1648_vm11 = vcmask 261120  }
 0x262   : > { %v4674_v35 = vpop.eup %4673  ;;  %v3940_v15 = vld [vmem:[%s5830_s6 + $0x84] sm:$0xf0]  ;;  %v3947_v19 = vor.u32 %v4353_v17, %v3946_v16  ;;  %v3926_v20 = vld [vmem:[%s5830_s6 + $0x60] sm:$0xf]  ;;  %v4349_v21 = vld [vmem:[%s5830_s6 + $0x68] sm:$0xf0] }
 0x263   : > { %v1294_v36 = vmul.f32 128.0, %v4674_v35  ;;  %vm1298_vm14 = vweird.f32 %v4674_v35  ;;  %1557 = vmatpush.bf16.msra.mxu0 %v3951_v5  ;;  %1576 = vmatpush.bf16.msra.mxu1 %v3955_v9  ;;  %v3943_v18 = vor.u32 %v4351_v13, %v3940_v15  ;;  %v4348_v22 = vld [vmem:[%s5830_s6 + $0x64] sm:$0xf]  ;;  %v3927_v23 = vor.u32 %v4349_v21, %v3926_v20  ;;  %v3928_v24 = vld [vmem:[%s5830_s6 + $0x6c] sm:$0xf0]  ;;  %s5414_s30 = smov 32  }
 0x264   : > { %1291 = vadd.xlane.f32.xlu1 %v1282_v32  ;;  %1287 = vadd.xlane.f32.xlu0 %v1280_v33  ;;  %v3934_v25 = vld [vmem:[%s5830_s6 + $0x68] sm:$0xf]  ;;  %v4350_v26 = vld [vmem:[%s5830_s6 + $0x70] sm:$0xf0]  ;;  %v3931_v27 = vor.u32 %v4348_v22, %v3928_v24  ;;  %v3922_v34 = vld [vmem:[%s5830_s6 + $0x50] sm:$0xf] }
 0x265   : > { %v1295_v37 = vsub.f32 1.0, %v1294_v36  ;;  %1595 = vmatpush.bf16.msra.mxu2 %v3959_v10  ;;  %v3935_v28 = vor.u32 %v4350_v26, %v3934_v25  ;;  %v3914_v29 = vld [vmem:[%s5830_s6 + $0x48] sm:$0xf]  ;;  %v3898_v57 = vld [vmem:[%s5830_s6 + $0x20] sm:$0xf]  ;;  %vm1917_vm13 = vcmask 523520  }
 0x266   : > { %v4341_v58 = vld [vmem:[%s5830_s6 + $0x28] sm:$0xf0]  ;;  %v3878_v62 = vld [vmem:[%s5830_s6] sm:$0xf]  ;;  %v4336_v0 = vld [vmem:[%s5830_s6 + $0x4] sm:$0xf] }
 0x267   : > { %v1296_v38 = vmul.f32 %v4674_v35, %v1295_v37  ;;  %1558 = vmatpush.bf16.msra.mxu0 %v3939_v14  ;;  %1577 = vmatpush.bf16.msra.mxu1 %v3943_v18  ;;  %v3899_v61 = vor.u32 %v4341_v58, %v3898_v57  ;;  %v4337_v63 = vld [vmem:[%s5830_s6 + $0x8] sm:$0xf0]  ;;  %v3880_v4 = vld [vmem:[%s5830_s6 + $0xc] sm:$0xf0]  ;;  %v3886_v5 = vld [vmem:[%s5830_s6 + $0x8] sm:$0xf] }
 0x268   : > { %v3879_v3 = vor.u32 %v4337_v63, %v3878_v62  ;;  %v4338_v6 = vld [vmem:[%s5830_s6 + $0x10] sm:$0xf0]  ;;  %v3883_v7 = vor.u32 %v4336_v0, %v3880_v4  ;;  %s6993_s22 = scalar_lea.vmem [#allocation21], %s5827_s12 }
 0x269   : > { %v1297_v39 = vadd.f32 %v4674_v35, %v1296_v38  ;;  %1596 = vmatpush.bf16.msra.mxu2 %v3947_v19  ;;  %v3902_v38 = vld [vmem:[%s5830_s6 + $0x30] sm:$0xf]  ;;  %v3887_v8 = vor.u32 %v4338_v6, %v3886_v5 }
 0x26b   : > { %v5902_v40 = vsel %vm1298_vm14, %v4674_v35, %v1297_v39  ;;  %1559 = vmatpush.bf16.msra.mxu0 %v3927_v23  ;;  %1578 = vmatpush.bf16.msra.mxu1 %v3931_v27  ;;  %v4347_v35 = vld [vmem:[%s5830_s6 + $0x58] sm:$0xf0]  ;;  %vm2062_vm14 = vcmask 785920  }
 0x26c   : > { %v3923_v37 = vor.u32 %v4347_v35, %v3922_v34  ;;  %v4343_v39 = vld [vmem:[%s5830_s6 + $0x38] sm:$0xf0] }
 0x26d   : > { %1597 = vmatpush.bf16.msra.mxu2 %v3935_v28 }
 0x271   : > { %1598 = vmatpush.bf16.msra.mxu2 %v3923_v37 }
 0x2cf   : > { %v1290_v41 = vpop.xlane.xlu1 %1289  ;;  %v1286_v42 = vpop.xlane.xlu0 %1285 }
 0x2d0   : > { %v1302_v43 = vmul.f32 %v5902_v40, %v1290_v41  ;;  %v1300_v44 = vmul.f32 %v5902_v40, %v1286_v42  ;;  %v4342_v41 = vld [vmem:[%s5830_s6 + $0x34] sm:$0xf]  ;;  %v3903_v42 = vor.u32 %v4343_v39, %v3902_v38  ;;  %v4667_v38 = vld [vmem:[%s1091_s1] ss:$0 sm:$0xff] }
 0x2d2   : > { %v5906_v45 = vsub.f32 %v1281_v30, %v1302_v43  ;;  %v5908_v46 = vsub.f32 %v1279_v31, %v1300_v44  ;;  %v4346_v30 = vld [vmem:[%s5830_s6 + $0x50] sm:$0xf0]  ;;  %v4345_v31 = vld [vmem:[%s5830_s6 + $0x4c] sm:$0xf]  ;;  %v3904_v43 = vld [vmem:[%s5830_s6 + $0x3c] sm:$0xf0] }
 0x2d3   : > { %v3910_v44 = vld [vmem:[%s5830_s6 + $0x38] sm:$0xf] }
 0x2d4   : > { %v1310_v47 = vmul.f32 %v5906_v45, %v5906_v45  ;;  %v1308_v48 = vmul.f32 %v5908_v46, %v5908_v46 }
 0x2d6   : > { %1316 = vadd.xlane.f32.xlu0 %v1310_v47  ;;  %1312 = vadd.xlane.f32.xlu2 %v1308_v48  ;;  %v4344_v47 = vld [vmem:[%s5830_s6 + $0x40] sm:$0xf0]  ;;  %v3907_v48 = vor.u32 %v4342_v41, %v3904_v43 }
 0x2d7   : > { %v1292_v49 = vpop.xlane.xlu1 %1291  ;;  %v1288_v50 = vpop.xlane.xlu0 %1287 }
 0x2d8   : > { %v1303_v51 = vmul.f32 %v5902_v40, %v1292_v49  ;;  %v1301_v52 = vmul.f32 %v5902_v40, %v1288_v50  ;;  %v3911_v49 = vor.u32 %v4344_v47, %v3910_v44  ;;  %v3890_v50 = vld [vmem:[%s5830_s6 + $0x18] sm:$0xf] }
 0x2da   : > { %v5916_v53 = vsub.f32 %v1282_v32, %v1303_v51  ;;  %v5918_v54 = vsub.f32 %v1280_v33, %v1301_v52  ;;  %v3915_v32 = vor.u32 %v4346_v30, %v3914_v29  ;;  %v3916_v33 = vld [vmem:[%s5830_s6 + $0x54] sm:$0xf0]  ;;  %1599 = vmatpush.bf16.msra.mxu2 %v3911_v49  ;;  %v4340_v51 = vld [vmem:[%s5830_s6 + $0x20] sm:$0xf0]  ;;  %v4339_v52 = vld [vmem:[%s5830_s6 + $0x1c] sm:$0xf] }
 0x2db   : > { %v3919_v36 = vor.u32 %v4345_v31, %v3916_v33 }
 0x2dc   : > { %v1311_v55 = vmul.f32 %v5916_v53, %v5916_v53  ;;  %v1309_v56 = vmul.f32 %v5918_v54, %v5918_v54  ;;  %1560 = vmatpush.bf16.msra.mxu0 %v3915_v32 }
 0x2dd   : > { %1579 = vmatpush.bf16.msra.mxu1 %v3919_v36 }
 0x2de   : > { %1318 = vadd.xlane.f32.xlu1 %v1311_v55  ;;  %1314 = vadd.xlane.f32.xlu2 %v1309_v56  ;;  %v3891_v55 = vor.u32 %v4340_v51, %v3890_v50  ;;  %v3892_v56 = vld [vmem:[%s5830_s6 + $0x24] sm:$0xf0] }
 0x2df   : > { %v3895_v60 = vor.u32 %v4339_v52, %v3892_v56  ;;  %1600 = vmatpush.bf16.msra.mxu2 %v3899_v61 }
 0x2e0   : > { %1561 = vmatpush.bf16.msra.mxu0 %v3903_v42 }
 0x2e1   : > { %1580 = vmatpush.bf16.msra.mxu1 %v3907_v48  ;;  %v4668_v48 = vld [vmem:[%s6990_s10] ss:$0 sm:$0xff] }
 0x2e3   : > { %1601 = vmatpush.bf16.msra.mxu2 %v3887_v8 }
 0x2e4   : > { %1562 = vmatpush.bf16.msra.mxu0 %v3891_v55 }
 0x2e5   : > { %1581 = vmatpush.bf16.msra.mxu1 %v3895_v60 }
 0x2e8   : > { %1563 = vmatpush.bf16.msra.mxu0 %v3879_v3 }
 0x2e9   : > { %1582 = vmatpush.bf16.msra.mxu1 %v3883_v7 }
 0x349   : > { %v1313_v59 = vpop.xlane.xlu2 %1312  ;;  %v1317_v2 = vpop.xlane.xlu0 %1316 }
 0x34a   : > { %v1320_v1 = vmul.f32 %v1313_v59, %v5902_v40  ;;  %v1322_v10 = vmul.f32 %v1317_v2, %v5902_v40 }
 0x34c   : > { %v1324_v9 = vadd.f32 1e-05, %v1320_v1  ;;  %v1326_v11 = vadd.f32 1e-05, %v1322_v10  ;;  %v1420_v1 = vld [vmem:[%s5838_s7] sm:$0x7] }
 0x34d   : > { %v1422_v4 = vperm.slane %v1420_v1, 0  ;;  %v1423_v5 = vperm.slane %v1420_v1, 1  ;;  %s5412_s7 = smov 96  }
 0x34e   : > { %4675 = vrsqrt.f32 %v1324_v9  ;;  %vm1334_vm0 = vweird.f32 %v1324_v9  ;;  %vm1354_vm7 = vweird.f32 %v1326_v11 }
 0x34f   : > { %4677 = vrsqrt.f32 %v1326_v11 }
 0x351   : > { %v1319_v12 = vpop.xlane.xlu1 %1318  ;;  %v1315_v13 = vpop.xlane.xlu2 %1314 }
 0x352   : > { %v1323_v14 = vmul.f32 %v1319_v12, %v5902_v40  ;;  %v1321_v15 = vmul.f32 %v1315_v13, %v5902_v40 }
 0x354   : > { %v4676_v16 = vpop.eup %4675  ;;  %v1327_v17 = vadd.f32 1e-05, %v1323_v14  ;;  %v1325_v18 = vadd.f32 1e-05, %v1321_v15 }
 0x355   : > { %v1329_v19 = vmul.f32 %v4676_v16, %v1324_v9  ;;  %v4678_v22 = vpop.eup %4677  ;;  %vm1335_vm15 = vweird.f32 %v4676_v16 }
 0x356   : > { %4679 = vrsqrt.f32 %v1327_v17  ;;  %v1349_v28 = vmul.f32 %v4678_v22, %v1326_v11  ;;  %vm1336_vm1 = vmor %vm1334_vm0, %vm1335_vm15  ;;  %vm1344_vm3 = vweird.f32 %v1325_v18  ;;  %vm1364_vm5 = vweird.f32 %v1327_v17 }
 0x357   : > { %v1330_v20 = vmul.f32 %v4676_v16, %v1329_v19  ;;  %4681 = vrsqrt.f32 %v1325_v18  ;;  %vm1355_vm8 = vweird.f32 %v4678_v22  ;;  %vm2207_vm15 = vcmask 1048320  }
 0x358   : > { %v1350_v33 = vmul.f32 %v4678_v22, %v1349_v28  ;;  %vm1356_vm10 = vmor %vm1354_vm7, %vm1355_vm8 }
 0x359   : > { %v1331_v21 = vmul.f32 0.5, %v1330_v20 }
 0x35a   : > { %v1351_v39 = vmul.f32 0.5, %v1350_v33 }
 0x35b   : > { %v1332_v23 = vsub.f32 1.5, %v1331_v21 }
 0x35c   : > { %v4680_v24 = vpop.eup %4679  ;;  %v1352_v49 = vsub.f32 1.5, %v1351_v39 }
 0x35d   : > { %v4682_v25 = vpop.eup %4681  ;;  %v1359_v26 = vmul.f32 %v4680_v24, %v1327_v17  ;;  %v1333_v27 = vmul.f32 %v4676_v16, %v1332_v23  ;;  %vm1365_vm6 = vweird.f32 %v4680_v24 }
 0x35e   : > { %v1339_v29 = vmul.f32 %v4682_v25, %v1325_v18  ;;  %vm1345_vm2 = vweird.f32 %v4682_v25  ;;  %vm1366_vm9 = vmor %vm1364_vm5, %vm1365_vm6  ;;  %v1353_v55 = vmul.f32 %v4678_v22, %v1352_v49 }
 0x35f   : > { %v1360_v30 = vmul.f32 %v4680_v24, %v1359_v26  ;;  %v1337_v32 = vsel %vm1336_vm1, %v4676_v16, %v1333_v27  ;;  %vm1346_vm4 = vmor %vm1344_vm3, %vm1345_vm2 }
 0x360   : > { %v1340_v31 = vmul.f32 %v4682_v25, %v1339_v29  ;;  %v1368_v37 = vmul.f32 %v1337_v32, %v5908_v46  ;;  %v1424_v32 = vperm.slane %v1420_v1, 2 }
 0x361   : > { %v1361_v35 = vmul.f32 0.5, %v1360_v30 }
 0x362   : > { %v1341_v34 = vmul.f32 0.5, %v1340_v31  ;;  %v1375_v47 = vmul.f32 %v4667_v38, %v1368_v37 }
 0x363   : > { %v1362_v42 = vsub.f32 1.5, %v1361_v35 }
 0x364   : > { %v1342_v36 = vsub.f32 1.5, %v1341_v34  ;;  %v1382_v51 = vadd.f32 %v4668_v48, %v1375_v47 }
 0x365   : > { %v1363_v50 = vmul.f32 %v4680_v24, %v1362_v42 }
 0x366   : > { %v1343_v41 = vmul.f32 %v4682_v25, %v1342_v36 }
 0x367   : > { %v1367_v57 = vsel %vm1366_vm9, %v4680_v24, %v1363_v50 }
 0x368   : > { %v1347_v43 = vsel %vm1346_vm4, %v4682_v25, %v1343_v41  ;;  %v1371_v58 = vmul.f32 %v1367_v57, %v5916_v53 }
 0x369   : > { %v1369_v44 = vmul.f32 %v1347_v43, %v5918_v54  ;;  %v1357_v54 = vsel %vm1356_vm10, %v4678_v22, %v1353_v55 }
 0x36a   : > { %v1370_v59 = vmul.f32 %v1357_v54, %v5906_v45  ;;  %v1378_v60 = vmul.f32 %v4667_v38, %v1371_v58 }
 0x36b   : > { %v1376_v46 = vmul.f32 %v4667_v38, %v1369_v44 }
 0x36c   : > { %v1377_v61 = vmul.f32 %v4667_v38, %v1370_v59  ;;  %v1385_v62 = vadd.f32 %v4668_v48, %v1378_v60 }
 0x36d   : > { %v1383_v52 = vadd.f32 %v4668_v48, %v1376_v46 }
 0x36e   : > { %v1384_v63 = vadd.f32 %v4668_v48, %v1377_v61 }
 0x36f   : > { %v1386_v56 = vpack.c.bf16 %v1383_v52, %v1382_v51 }
 0x370   : > { %v1387_v0 = vpack.c.bf16 %v1385_v62, %v1384_v63 }
 0x371   : > { %1564 = vmatmul.bf16.vlgmr.msra.gmra.mxu0 %v1386_v56  ;;  %1583 = vmatmul.bf16.vlgmr.msra.gmra.mxu1 %v1386_v56 }
 0x372   : > { %1602 = vmatmul.bf16.vlgmr.msra.gmra.mxu2 %v1386_v56 }
 0x381   : > { %1569 = vmatmul.bf16.gmra.mxu0 %v1387_v0  ;;  %1588 = vmatmul.bf16.gmra.mxu1 %v1387_v0 }
 0x382   : > { %1607 = vmatmul.bf16.gmra.mxu2 %v1387_v0 }
 0x3ee   : > { %v1565_v2 = vpop.f32.mrf.mxu0  ;;  %v1584_v3 = vpop.f32.mrf.mxu1 }
 0x3ef   : > { %v1566_v6 = vadd.f32 %v1565_v2, %v1422_v4  ;;  %v1585_v7 = vadd.f32 %v1584_v3, %v1423_v5 }
 0x3f1   : > { %v1613_v10 = vpack.c.bf16 %v1566_v6, %v1566_v6  ;;  %v1617_v45 = vpack.c.bf16 %v1585_v7, %v1585_v7 }
 0x3f3   : > { %v1632_v15 = vunpack.c.l.b16 %v1613_v10  ;;  %v1642_v16 = vunpack.c.l.b16 %v1617_v45 }
 0x3f5   : > { %v1603_v8 = vpop.f32.mrf.mxu2 }
 0x3f6   : > { %v1567_v9 = vpop.f32.mrf.mxu0  ;;  %v1586_v53 = vpop.f32.mrf.mxu1  ;;  %v1604_v48 = vadd.f32 %v1603_v8, %v1424_v32 }
 0x3f7   : > { %v1568_v11 = vadd.f32 %v1567_v9, %v1422_v4  ;;  %v1587_v12 = vadd.f32 %v1586_v53, %v1423_v5 }
 0x3f8   : > { %v1621_v55 = vpack.c.bf16 %v1604_v48, %v1604_v48 }
 0x3f9   : > { %v1614_v13 = vpack.c.bf16 %v1568_v11, %v1568_v11  ;;  %v1618_v14 = vpack.c.bf16 %v1587_v12, %v1587_v12 }
 0x3fa   : > { %v1740_v60 = vunpack.c.l.b16 %v1621_v55 }
 0x3fb   : > { %v1633_v17 = vunpack.c.l.b16 %v1614_v13  ;;  %v1643_v18 = vunpack.c.l.b16 %v1618_v14  ;;  %v1625_v13 = vlaneseq }
 0x3fd   : > { %v1636_v19 = vpack.c.b16 %v1633_v17, %v1632_v15  ;;  %v1646_v20 = vpack.c.b16 %v1643_v18, %v1642_v16  ;;  %v1605_v21 = vpop.f32.mrf.mxu2  ;;  %v6021_v14 = vand.u32 127, %v1625_v13 }
 0x3fe   : > { %v1570_v22 = vpop.f32.mrf.mxu0  ;;  %v1589_v23 = vpop.f32.mrf.mxu1  ;;  %v1606_v42 = vadd.f32 %v1605_v21, %v1424_v32 }
 0x3ff   : > { %1781 = vrot.lane.b32.xlu0 %v1646_v20, %s5412_s7  ;;  %1777 = vrot.lane.b32.xlu1 %v1636_v19, %s5412_s7  ;;  %v1590_v24 = vadd.f32 %v1589_v23, %v1423_v5  ;;  %v1571_v33 = vadd.f32 %v1570_v22, %v1422_v4  ;;  %v1656_v59 = vsel %vm1648_vm11, %v1646_v20, 0  ;;  %vm1627_vm12 = vcmp.lt.s32.totalorder %v6021_v14, 17 }
 0x400   : > { %v1622_v50 = vpack.c.bf16 %v1606_v42, %v1606_v42 }
 0x401   : > { %v1619_v28 = vpack.c.bf16 %v1590_v24, %v1590_v24  ;;  %v1615_v43 = vpack.c.bf16 %v1571_v33, %v1571_v33 }
 0x402   : > { %v1741_v54 = vunpack.c.l.b16 %v1622_v50 }
 0x403   : > { %v1644_v34 = vunpack.c.l.b16 %v1619_v28  ;;  %v1634_v51 = vunpack.c.l.b16 %v1615_v43 }
 0x404   : > { %v6002_v61 = vpack.c.b16 %v1741_v54, %v1740_v60 }
 0x405   : > { %v1608_v25 = vpop.f32.mrf.mxu2 }
 0x406   : > { %v1572_v26 = vpop.f32.mrf.mxu0  ;;  %v1591_v27 = vpop.f32.mrf.mxu1  ;;  %v1609_v36 = vadd.f32 %v1608_v25, %v1424_v32 }
 0x407   : > { %v1592_v29 = vadd.f32 %v1591_v27, %v1423_v5  ;;  %1926 = vrot.lane.b32.xlu0 %v1646_v20, %s5413_s25  ;;  %v1573_v30 = vadd.f32 %v1572_v26, %v1422_v4 }
 0x408   : > { %v1623_v49 = vpack.c.bf16 %v1609_v36, %v1609_v36 }
 0x409   : > { %v1620_v31 = vpack.c.bf16 %v1592_v29, %v1592_v29  ;;  %v1616_v37 = vpack.c.bf16 %v1573_v30, %v1573_v30 }
 0x40a   : > { %v1742_v56 = vunpack.c.l.b16 %v1623_v49 }
 0x40b   : > { %v1645_v35 = vunpack.c.l.b16 %v1620_v31  ;;  %v1635_v46 = vunpack.c.l.b16 %v1616_v37 }
 0x40d   : > { %v1647_v38 = vpack.c.b16 %v1645_v35, %v1644_v34  ;;  %v1610_v39 = vpop.f32.mrf.mxu2  ;;  %v1637_v57 = vpack.c.b16 %v1635_v46, %v1634_v51 }
 0x40e   : > { %v1611_v41 = vadd.f32 %v1610_v39, %v1424_v32 }
 0x40f   : > { %1922 = vrot.lane.b32.xlu0 %v1636_v19, %s5413_s25  ;;  %2073 = vrot.lane.b32.xlu1 %v1647_v38, %s5414_s30  ;;  %v1659_v44 = vsel %vm1648_vm11, %v1647_v38, 0 }
 0x410   : > { %v1624_v47 = vpack.c.bf16 %v1611_v41, %v1611_v41  ;;  %1783 = vrot.lane.b32.xlu2 %v1647_v38, %s5412_s7  ;;  %1667 = vmatpush.bf16.xpose.msra.mxu3 %v1659_v44 }
 0x412   : > { %v1743_v52 = vunpack.c.l.b16 %v1624_v47 }
 0x414   : > { %v5995_v58 = vpack.c.b16 %v1743_v52, %v1742_v56 }
 0x417   : > { %2067 = vrot.lane.b32.xlu1 %v1636_v19, %s5414_s30  ;;  %1924 = vrot.lane.b32.xlu0 %v1637_v57, %s5413_s25 }
 0x418   : > { %1928 = vrot.lane.b32.xlu2 %v1647_v38, %s5413_s25  ;;  %1668 = vmatpush.bf16.xpose.msra.mxu3 %v1656_v59 }
 0x41f   : > { %3972 = vmatmul.msk.bf16.vlgmr.msra.gmra.mxu3 %vm1648_vm11, %v1636_v19 }
 0x420   : > { %1760 = vmatpush.bf16.msrb.mxu3 %v5995_v58  ;;  %1779 = vrot.lane.b32.xlu2 %v1637_v57, %s5412_s7 }
 0x424   : > { %1761 = vmatpush.bf16.msrb.mxu3 %v6002_v61 }
 0x428   : > { %2071 = vrot.lane.b32.xlu2 %v1646_v20, %s5414_s30 }
 0x42f   : > { %3973 = vmatmul.msk.bf16.gmra.mxu3 %vm1648_vm11, %v1637_v57 }
 0x430   : > { %2069 = vrot.lane.b32.xlu2 %v1637_v57, %s5414_s30 }
 0x46a   : > { %v1784_v62 = vpop.permute.xlu2 %1783 }
 0x46b   : > { %v1795_v63 = vsel %vm1648_vm11, %v1784_v62, 0 }
 0x46c   : > { %1803 = vmatpush.bf16.xpose.msrb.mxu0 %v1795_v63 }
 0x471   : > { %v1782_v0 = vpop.permute.xlu0 %1781  ;;  %v1778_v4 = vpop.permute.xlu1 %1777 }
 0x472   : > { %v1929_v1 = vpop.permute.xlu2 %1928  ;;  %v1792_v2 = vsel %vm1648_vm11, %v1782_v0, 0 }
 0x473   : > { %v1940_v3 = vsel %vm1648_vm11, %v1929_v1, 0 }
 0x474   : > { %1804 = vmatpush.bf16.xpose.msrb.mxu0 %v1792_v2  ;;  %1948 = vmatpush.bf16.xpose.msrb.mxu2 %v1940_v3 }
 0x479   : > { %v1927_v5 = vpop.permute.xlu0 %1926 }
 0x47a   : > { %v1937_v6 = vsel %vm1648_vm11, %v1927_v5, 0  ;;  %v1780_v7 = vpop.permute.xlu2 %1779 }
 0x47b   : > { %3976 = vmatmul.msk.bf16.vlgmr.msrb.gmra.mxu0 %vm1648_vm11, %v1778_v4 }
 0x47c   : > { %1949 = vmatpush.bf16.xpose.msrb.mxu2 %v1937_v6 }
 0x481   : > { %v2074_v8 = vpop.permute.xlu1 %2073  ;;  %v1923_v9 = vpop.permute.xlu0 %1922 }
 0x482   : > { %v2085_v53 = vsel %vm1648_vm11, %v2074_v8, 0  ;;  %v2072_v10 = vpop.permute.xlu2 %2071 }
 0x483   : > { %3980 = vmatmul.msk.bf16.vlgmr.msrb.gmra.mxu2 %vm1648_vm11, %v1923_v9  ;;  %2093 = vmatpush.bf16.xpose.msra.mxu0 %v2085_v53  ;;  %v2082_v45 = vsel %vm1648_vm11, %v2072_v10, 0 }
 0x489   : > { %v1925_v11 = vpop.permute.xlu0 %1924  ;;  %v2068_v12 = vpop.permute.xlu1 %2067 }
 0x48a   : > { %v2070_v19 = vpop.permute.xlu2 %2069 }
 0x48b   : > { %3977 = vmatmul.msk.bf16.gmra.mxu0 %vm1648_vm11, %v1780_v7 }
 0x48c   : > { %2094 = vmatpush.bf16.xpose.msra.mxu0 %v2082_v45 }
 0x493   : > { %3981 = vmatmul.msk.bf16.gmra.mxu2 %vm1648_vm11, %v1925_v11 }
 0x49b   : > { %3984 = vmatmul.msk.bf16.vlgmr.msra.gmra.mxu0 %vm1648_vm11, %v2068_v12 }
 0x4a2   : > { %v1670_v15 = vpop.f32.mrf.mxu3 }
 0x4a3   : > { %v1680_v16 = vmul.f32 0.17677669, %v1670_v15 }
 0x4a5   : > { %v6026_v17 = vsel %vm1627_vm12, %v1680_v16, -1e+30 }
 0x4a6   : > { %v1690_v18 = vsel %vm1648_vm11, %v6026_v17, -inf }
 0x4a7   : > { %1691 = vmax.xlane.f32.xlu1 %v1690_v18 }
 0x4aa   : > { %v1672_v20 = vpop.f32.mrf.mxu3 }
 0x4ab   : > { %v1681_v21 = vmul.f32 0.17677669, %v1672_v20  ;;  %3985 = vmatmul.msk.bf16.gmra.mxu0 %vm1648_vm11, %v2070_v19 }
 0x4ad   : > { %v1687_v22 = vsel %vm1627_vm12, %v1681_v21, -1e+30 }
 0x4ae   : > { %v1693_v23 = vsel %vm1648_vm11, %v1687_v22, -inf }
 0x4af   : > { %1694 = vmax.xlane.f32.xlu0 %v1693_v23 }
 0x4b2   : > { %v1675_v24 = vpop.f32.mrf.mxu3 }
 0x4b3   : > { %v1682_v25 = vmul.f32 0.17677669, %v1675_v24 }
 0x4b5   : > { %v1688_v26 = vsel %vm1627_vm12, %v1682_v25, -1e+30 }
 0x4b6   : > { %v1696_v27 = vsel %vm1648_vm11, %v1688_v26, -inf }
 0x4b7   : > { %1697 = vmax.xlane.f32.xlu0 %v1696_v27 }
 0x4ba   : > { %v1677_v28 = vpop.f32.mrf.mxu3 }
 0x4bb   : > { %v1683_v29 = vmul.f32 0.17677669, %v1677_v28 }
 0x4bd   : > { %v6039_v30 = vsel %vm1627_vm12, %v1683_v29, -1e+30 }
 0x4be   : > { %v1699_v31 = vsel %vm1648_vm11, %v6039_v30, -inf }
 0x4bf   : > { %1700 = vmax.xlane.f32.xlu2 %v1699_v31 }
 0x4c0   : > { %1870 = vrot.lane.b32.xlu1 %v6002_v61, %s5412_s7 }
 0x4f8   : > { %v1806_v32 = vpop.f32.mrf.mxu0 }
 0x4f9   : > { %v1816_v33 = vmul.f32 0.17677669, %v1806_v32 }
 0x4fb   : > { %v6047_v34 = vsel %vm1627_vm12, %v1816_v33, -1e+30 }
 0x4fc   : > { %v1824_v35 = vsel %vm1648_vm11, %v6047_v34, -inf }
 0x4fd   : > { %1825 = vmax.xlane.f32.xlu2 %v1824_v35 }
 0x500   : > { %v1808_v36 = vpop.f32.mrf.mxu0 }
 0x501   : > { %v1817_v37 = vmul.f32 0.17677669, %v1808_v36 }
 0x503   : > { %v6053_v38 = vsel %vm1627_vm12, %v1817_v37, -1e+30 }
 0x504   : > { %v1827_v39 = vsel %vm1648_vm11, %v6053_v38, -inf }
 0x505   : > { %1828 = vmax.xlane.f32.xlu1 %v1827_v39 }
 0x506   : > { %v1951_v41 = vpop.f32.mrf.mxu2 }
 0x507   : > { %v1961_v21 = vmul.f32 0.17677669, %v1951_v41 }
 0x508   : > { %v1811_v42 = vpop.f32.mrf.mxu0 }
 0x509   : > { %v1818_v50 = vmul.f32 0.17677669, %v1811_v42  ;;  %v6107_v24 = vsel %vm1627_vm12, %v1961_v21, -1e+30 }
 0x50b   : > { %v6073_v56 = vsel %vm1627_vm12, %v1818_v50, -1e+30 }
 0x50c   : > { %v1830_v57 = vsel %vm1648_vm11, %v6073_v56, -inf }
 0x50e   : > { %v1953_v43 = vpop.f32.mrf.mxu2 }
 0x50f   : > { %v1962_v44 = vmul.f32 0.17677669, %v1953_v43 }
 0x510   : > { %v1813_v47 = vpop.f32.mrf.mxu0 }
 0x511   : > { %v1819_v48 = vmul.f32 0.17677669, %v1813_v47  ;;  %v6059_v49 = vsel %vm1627_vm12, %v1962_v44, -1e+30 }
 0x512   : > { %v1972_v46 = vsel %vm1648_vm11, %v6059_v49, -inf }
 0x513   : > { %1973 = vmax.xlane.f32.xlu1 %v1972_v46  ;;  %v6065_v51 = vsel %vm1627_vm12, %v1819_v48, -1e+30 }
 0x514   : > { %v1833_v52 = vsel %vm1648_vm11, %v6065_v51, -inf }
 0x515   : > { %1872 = vrot.lane.b32.xlu2 %v5995_v58, %s5412_s7  ;;  %1834 = vmax.xlane.f32.xlu0 %v1833_v52 }
 0x516   : > { %v1956_v55 = vpop.f32.mrf.mxu2 }
 0x517   : > { %v1963_v54 = vmul.f32 0.17677669, %v1956_v55 }
 0x518   : > { %v2096_v63 = vpop.f32.mrf.mxu0 }
 0x519   : > { %v6079_v62 = vsel %vm1627_vm12, %v1963_v54, -1e+30  ;;  %v2106_v4 = vmul.f32 0.17677669, %v2096_v63 }
 0x51a   : > { %v1975_v1 = vsel %vm1648_vm11, %v6079_v62, -inf  ;;  %v1692_v12 = vpop.xlane.xlu1 %1691 }
 0x51b   : > { %1831 = vmax.xlane.f32.xlu1 %v1830_v57  ;;  %v6091_v7 = vsel %vm1627_vm12, %v2106_v4, -1e+30  ;;  %v1702_v18 = vsub.f32 %v6026_v17, %v1692_v12  ;;  %v1969_v17 = vsel %vm1648_vm11, %v6107_v24, -inf }
 0x51c   : > { %v2114_v8 = vsel %vm1648_vm11, %v6091_v7, -inf }
 0x51d   : > { %v1706_v23 = vmul.f32 1.442695, %v1702_v18 }
 0x51e   : > { %v1958_v59 = vpop.f32.mrf.mxu2 }
 0x51f   : > { %v1964_v60 = vmul.f32 0.17677669, %v1958_v59 }
 0x520   : > { %v2098_v13 = vpop.f32.mrf.mxu0 }
 0x521   : > { %v6083_v0 = vsel %vm1627_vm12, %v1964_v60, -1e+30  ;;  %v2107_v32 = vmul.f32 0.17677669, %v2098_v13 }
 0x522   : > { %v1978_v2 = vsel %vm1648_vm11, %v6083_v0, -inf  ;;  %v1695_v3 = vpop.xlane.xlu0 %1694 }
 0x523   : > { %1976 = vmax.xlane.f32.xlu1 %v1975_v1  ;;  %1979 = vmax.xlane.f32.xlu0 %v1978_v2  ;;  %v1703_v5 = vsub.f32 %v1687_v22, %v1695_v3  ;;  %v6127_v35 = vsel %vm1627_vm12, %v2107_v32, -1e+30 }
 0x524   : > { %v2117_v37 = vsel %vm1648_vm11, %v6127_v35, -inf }
 0x525   : > { %v1708_v6 = vmul.f32 1.442695, %v1703_v5 }
 0x527   : > { %4683 = vpow2.f32 %v1708_v6 }
 0x528   : > { %v2101_v25 = vpop.f32.mrf.mxu0 }
 0x529   : > { %v2108_v28 = vmul.f32 0.17677669, %v2101_v25 }
 0x52a   : > { %v1698_v9 = vpop.xlane.xlu0 %1697 }
 0x52b   : > { %2115 = vmax.xlane.f32.xlu0 %v2114_v8  ;;  %v1704_v53 = vsub.f32 %v1688_v26, %v1698_v9 }
 0x52d   : > { %v6095_v10 = vpop.eup %4683  ;;  %v1710_v45 = vmul.f32 1.442695, %v1704_v53 }
 0x52e   : > { %v1717_v11 = vsel %vm1648_vm11, %v6095_v10, 0.0 }
 0x52f   : > { %4685 = vpow2.f32 %v1710_v45  ;;  %1718 = vadd.xlane.f32.xlu1 %v1717_v11 }
 0x530   : > { %v2103_v36 = vpop.f32.mrf.mxu0 }
 0x531   : > { %v2109_v39 = vmul.f32 0.17677669, %v2103_v36 }
 0x532   : > { %v1701_v15 = vpop.xlane.xlu2 %1700  ;;  %v1871_v43 = vpop.permute.xlu1 %1870 }
 0x533   : > { %v1705_v16 = vsub.f32 %v6039_v30, %v1701_v15  ;;  %v6119_v30 = vsel %vm1627_vm12, %v2108_v28, -1e+30  ;;  %v6133_v41 = vsel %vm1627_vm12, %v2109_v39, -1e+30 }
 0x534   : > { %v2120_v33 = vsel %vm1648_vm11, %v6119_v30, -inf  ;;  %v2123_v42 = vsel %vm1648_vm11, %v6133_v41, -inf }
 0x535   : > { %v6101_v19 = vpop.eup %4685  ;;  %v1712_v20 = vmul.f32 1.442695, %v1705_v16 }
 0x536   : > { %v1720_v22 = vsel %vm1648_vm11, %v6101_v19, 0.0 }
 0x537   : > { %4687 = vpow2.f32 %v1712_v20  ;;  %1721 = vadd.xlane.f32.xlu1 %v1720_v22 }
 0x538   : > { %4689 = vpow2.f32 %v1706_v23 }
 0x53d   : > { %v6109_v26 = vpop.eup %4687 }
 0x53e   : > { %1970 = vmax.xlane.f32.xlu2 %v1969_v17  ;;  %v1723_v27 = vsel %vm1648_vm11, %v6109_v26, 0.0  ;;  %v6115_v29 = vpop.eup %4689 }
 0x53f   : > { %1724 = vadd.xlane.f32.xlu0 %v1723_v27  ;;  %v1714_v31 = vsel %vm1648_vm11, %v6115_v29, 0.0 }
 0x546   : > { %1715 = vadd.xlane.f32.xlu2 %v1714_v31 }
 0x547   : > { %2121 = vmax.xlane.f32.xlu0 %v2120_v33 }
 0x54e   : > { %2118 = vmax.xlane.f32.xlu2 %v2117_v37 }
 0x556   : > { %2124 = vmax.xlane.f32.xlu2 %v2123_v42 }
 0x55b   : > { %2015 = vrot.lane.b32.xlu0 %v6002_v61, %s5413_s25 }
 0x570   : > { %v1826_v44 = vpop.xlane.xlu2 %1825 }
 0x571   : > { %v1836_v47 = vsub.f32 %v6047_v34, %v1826_v44 }
 0x573   : > { %v1840_v48 = vmul.f32 1.442695, %v1836_v47 }
 0x575   : > { %4691 = vpow2.f32 %v1840_v48 }
 0x578   : > { %v1873_v46 = vpop.permute.xlu2 %1872  ;;  %v1829_v50 = vpop.xlane.xlu1 %1828 }
 0x579   : > { %v1837_v52 = vsub.f32 %v6053_v38, %v1829_v50  ;;  %1888 = vmatpush.bf16.msrb.mxu1 %v1873_v46 }
 0x57b   : > { %v6141_v14 = vpop.eup %4691  ;;  %v1842_v55 = vmul.f32 1.442695, %v1837_v52 }
 0x57c   : > { %v1848_v57 = vsel %vm1648_vm11, %v6141_v14, 0.0 }
 0x57d   : > { %4693 = vpow2.f32 %v1842_v55  ;;  %1889 = vmatpush.bf16.msrb.mxu1 %v1871_v43  ;;  %1849 = vadd.xlane.f32.xlu1 %v1848_v57 }
 0x583   : > { %v6145_v54 = vpop.eup %4693 }
 0x584   : > { %v1851_v34 = vsel %vm1648_vm11, %v6145_v54, 0.0 }
 0x585   : > { %1852 = vadd.xlane.f32.xlu0 %v1851_v34 }
 0x586   : > { %v1974_v59 = vpop.xlane.xlu1 %1973 }
 0x587   : > { %v1982_v60 = vsub.f32 %v6059_v49, %v1974_v59 }
 0x588   : > { %v1835_v63 = vpop.xlane.xlu0 %1834 }
 0x589   : > { %v1987_v38 = vmul.f32 1.442695, %v1982_v60  ;;  %v1839_v4 = vsub.f32 %v6065_v51, %v1835_v63 }
 0x58b   : > { %4695 = vpow2.f32 %v1987_v38  ;;  %v1846_v8 = vmul.f32 1.442695, %v1839_v4 }
 0x58e   : > { %v1832_v1 = vpop.xlane.xlu1 %1831 }
 0x58f   : > { %v1838_v2 = vsub.f32 %v6073_v56, %v1832_v1 }
 0x591   : > { %v6151_v3 = vpop.eup %4695  ;;  %v1844_v5 = vmul.f32 1.442695, %v1838_v2 }
 0x592   : > { %v1996_v6 = vsel %vm1648_vm11, %v6151_v3, 0.0 }
 0x593   : > { %4697 = vpow2.f32 %v1844_v5  ;;  %1997 = vadd.xlane.f32.xlu0 %v1996_v6 }
 0x594   : > { %4699 = vpow2.f32 %v1846_v8 }
 0x596   : > { %2017 = vrot.lane.b32.xlu1 %v5995_v58, %s5413_s25  ;;  %v6158_v49 = vpop.xlane.xlu0 %1979  ;;  %v1977_v16 = vpop.xlane.xlu1 %1976 }
 0x597   : > { %v1983_v21 = vsub.f32 %v6079_v62, %v1977_v16 }
 0x599   : > { %v6160_v9 = vpop.eup %4697  ;;  %v1989_v25 = vmul.f32 1.442695, %v1983_v21 }
 0x59a   : > { %v1854_v56 = vsel %vm1648_vm11, %v6160_v9, 0.0  ;;  %v6164_v53 = vpop.eup %4699 }
 0x59b   : > { %1855 = vadd.xlane.f32.xlu0 %v1854_v56  ;;  %v1857_v12 = vsel %vm1648_vm11, %v6164_v53, 0.0 }
 0x59e   : > { %v2116_v51 = vpop.xlane.xlu0 %2115 }
 0x59f   : > { %v2126_v45 = vsub.f32 %v6091_v7, %v2116_v51 }
 0x5a1   : > { %v2130_v11 = vmul.f32 1.442695, %v2126_v45 }
 0x5a2   : > { %v1719_v7 = vpop.xlane.xlu1 %1718 }
 0x5a3   : > { %4701 = vpow2.f32 %v2130_v11  ;;  %1858 = vadd.xlane.f32.xlu0 %v1857_v12 }
 0x5a9   : > { %v6169_v13 = vpop.eup %4701 }
 0x5aa   : > { %v2138_v15 = vsel %vm1648_vm11, %v6169_v13, 0.0  ;;  %v1722_v47 = vpop.xlane.xlu1 %1721 }
 0x5ab   : > { %2139 = vadd.xlane.f32.xlu0 %v2138_v15 }
 0x5b1   : > { %v1971_v18 = vpop.xlane.xlu2 %1970 }
 0x5b2   : > { %v1981_v20 = vsub.f32 %v6107_v24, %v1971_v18  ;;  %v1725_v23 = vpop.xlane.xlu0 %1724 }
 0x5b4   : > { %v1985_v22 = vmul.f32 1.442695, %v1981_v20 }
 0x5b6   : > { %4703 = vpow2.f32 %v1985_v22 }
 0x5b7   : > { %4705 = vrcp.f32 %v1719_v7 }
 0x5b9   : > { %v1716_v17 = vpop.xlane.xlu2 %1715 }
 0x5ba   : > { %4707 = vrcp.f32 %v1716_v17  ;;  %v2122_v33 = vpop.xlane.xlu0 %2121 }
 0x5bb   : > { %4709 = vpow2.f32 %v1989_v25  ;;  %v2128_v43 = vsub.f32 %v6119_v30, %v2122_v33 }
 0x5bc   : > { %v6175_v27 = vpop.eup %4703  ;;  %4711 = vrcp.f32 %v1725_v23 }
 0x5bd   : > { %v1993_v28 = vsel %vm1648_vm11, %v6175_v27, 0.0  ;;  %v4706_v31 = vpop.eup %4705 }
 0x5be   : > { %1994 = vadd.xlane.f32.xlu2 %v1993_v28  ;;  %v1731_v24 = vmul.f32 %v4706_v31, %v6095_v10  ;;  %v2134_v10 = vmul.f32 1.442695, %v2128_v43 }
 0x5bf   : > { %2162 = vrot.lane.b32.xlu0 %v5995_v58, %s5414_s30 }
 0x5c0   : > { %v4708_v62 = vpop.eup %4707 }
 0x5c1   : > { %v1730_v32 = vmul.f32 %v4708_v62, %v6115_v29  ;;  %v2119_v36 = vpop.xlane.xlu2 %2118  ;;  %v6183_v37 = vpop.eup %4709 }
 0x5c2   : > { %v2127_v39 = vsub.f32 %v6127_v35, %v2119_v36  ;;  %v1999_v58 = vsel %vm1648_vm11, %v6183_v37, 0.0  ;;  %v4712_v48 = vpop.eup %4711 }
 0x5c3   : > { %v1734_v42 = vpack.c.bf16 %v1731_v24, %v1730_v32  ;;  %v1733_v52 = vmul.f32 %v4712_v48, %v6109_v26 }
 0x5c4   : > { %v2132_v44 = vmul.f32 1.442695, %v2127_v39 }
 0x5c5   : > { %3974 = vmatmul.msk.bf16.vlgmr.msrb.gmra.mxu3 %vm1648_vm11, %v1734_v42 }
 0x5c6   : > { %4713 = vpow2.f32 %v2132_v44  ;;  %2000 = vadd.xlane.f32.xlu2 %v1999_v58 }
 0x5c7   : > { %4715 = vrcp.f32 %v1722_v47 }
 0x5c8   : > { %4717 = vpow2.f32 %v2134_v10 }
 0x5c9   : > { %v2125_v29 = vpop.xlane.xlu2 %2124 }
 0x5ca   : > { %v2129_v35 = vsub.f32 %v6133_v41, %v2125_v29  ;;  %v1984_v41 = vsub.f32 %v6083_v0, %v6158_v49 }
 0x5cc   : > { %v6190_v46 = vpop.eup %4713  ;;  %v2136_v55 = vmul.f32 1.442695, %v2129_v35  ;;  %v1991_v63 = vmul.f32 1.442695, %v1984_v41 }
 0x5cd   : > { %v2141_v30 = vsel %vm1648_vm11, %v6190_v46, 0.0  ;;  %v4716_v50 = vpop.eup %4715  ;;  %v2016_v2 = vpop.permute.xlu0 %2015 }
 0x5ce   : > { %2142 = vadd.xlane.f32.xlu1 %v2141_v30  ;;  %v1732_v57 = vmul.f32 %v4716_v50, %v6101_v19  ;;  %v6197_v34 = vpop.eup %4717  ;;  %4719 = vpow2.f32 %v2136_v55 }
 0x5cf   : > { %v2144_v60 = vsel %vm1648_vm11, %v6197_v34, 0.0  ;;  %4721 = vpow2.f32 %v1991_v63 }
 0x5d0   : > { %v1735_v59 = vpack.c.bf16 %v1733_v52, %v1732_v57 }
 0x5d4   : > { %v6204_v38 = vpop.eup %4719 }
 0x5d5   : > { %3975 = vmatmul.msk.bf16.gmra.mxu3 %vm1648_vm11, %v1735_v59  ;;  %v2147_v26 = vsel %vm1648_vm11, %v6204_v38, 0.0  ;;  %v6210_v19 = vpop.eup %4721 }
 0x5d6   : > { %2145 = vadd.xlane.f32.xlu1 %v2144_v60  ;;  %v2002_v1 = vsel %vm1648_vm11, %v6210_v19, 0.0 }
 0x5de   : > { %2160 = vrot.lane.b32.xlu2 %v6002_v61, %s5414_s30  ;;  %2148 = vadd.xlane.f32.xlu1 %v2147_v26 }
 0x5e9   : > { %2003 = vadd.xlane.f32.xlu0 %v2002_v1 }
 0x5f0   : > { %v1850_v4 = vpop.xlane.xlu1 %1849 }
 0x5f1   : > { %4723 = vrcp.f32 %v1850_v4  ;;  %v4367_v4 = vld [vmem:[%s5840_s14 + $0x38] sm:$0xff] }
 0x5f2   : > { %2286 = vmatpush.bf16.msra.mxu2 %v4367_v4  ;;  %v4399_v4 = vld [vmem:[%s5854_s9 + $0xf4] sm:$0xf0] }
 0x5f7   : > { %v4724_v5 = vpop.eup %4723 }
 0x5f8   : > { %v1853_v0 = vpop.xlane.xlu0 %1852  ;;  %v1864_v8 = vmul.f32 %v4724_v5, %v6141_v14  ;;  %v4365_v5 = vld [vmem:[%s5840_s14 + $0x28] sm:$0xff] }
 0x5f9   : > { %4725 = vrcp.f32 %v1853_v0  ;;  %v4366_v0 = vld [vmem:[%s5840_s14 + $0x30] sm:$0xff] }
 0x5fa   : > { %2287 = vmatpush.bf16.msra.mxu2 %v4366_v0 }
 0x5fe   : > { %2288 = vmatpush.bf16.msra.mxu2 %v4365_v5 }
 0x5ff   : > { %v4726_v6 = vpop.eup %4725 }
 0x600   : > { %v1865_v49 = vmul.f32 %v4726_v6, %v6145_v54  ;;  %v4364_v6 = vld [vmem:[%s5840_s14 + $0x20] sm:$0xff] }
 0x602   : > { %v1868_v61 = vpack.c.bf16 %v1865_v49, %v1864_v8  ;;  %2289 = vmatpush.bf16.msra.mxu2 %v4364_v6  ;;  %v4363_v49 = vld [vmem:[%s5840_s14 + $0x18] sm:$0xff]  ;;  %v4397_v6 = vld [vmem:[%s5854_s9 + $0xec] sm:$0xf] }
 0x604   : > { %3978 = vmatmul.msk.bf16.vlgmr.msrb.gmra.mxu1 %vm1648_vm11, %v1868_v61  ;;  %v4362_v61 = vld [vmem:[%s5840_s14 + $0x10] sm:$0xff] }
 0x606   : > { %v1998_v56 = vpop.xlane.xlu0 %1997  ;;  %2290 = vmatpush.bf16.msra.mxu2 %v4363_v49 }
 0x608   : > { %v2018_v51 = vpop.permute.xlu1 %2017 }
 0x609   : > { %2033 = vmatpush.bf16.msra.mxu3 %v2018_v51  ;;  %v4361_v51 = vld [vmem:[%s5840_s14 + $0x8] sm:$0xff] }
 0x60a   : > { %2291 = vmatpush.bf16.msra.mxu2 %v4362_v61  ;;  %v4118_v61 = vld [vmem:[%s5854_s9 + $0xc0] sm:$0xf] }
 0x60d   : > { %2034 = vmatpush.bf16.msra.mxu3 %v2016_v2 }
 0x60e   : > { %v1856_v45 = vpop.xlane.xlu0 %1855  ;;  %2292 = vmatpush.bf16.msra.mxu2 %v4361_v51  ;;  %v4392_v51 = vld [vmem:[%s5854_s9 + $0xc4] sm:$0xf] }
 0x60f   : > { %4727 = vrcp.f32 %v1856_v45  ;;  %v4360_v45 = vld [vmem:[%s5840_s14] sm:$0xff] }
 0x612   : > { %2293 = vmatpush.bf16.msra.mxu2 %v4360_v45 }
 0x615   : > { %v4728_v12 = vpop.eup %4727 }
 0x616   : > { %v1859_v11 = vpop.xlane.xlu0 %1858  ;;  %v1866_v16 = vmul.f32 %v4728_v12, %v6160_v9 }
 0x617   : > { %4729 = vrcp.f32 %v1859_v11 }
 0x618   : > { %4731 = vrcp.f32 %v1998_v56 }
 0x61d   : > { %v4730_v15 = vpop.eup %4729 }
 0x61e   : > { %v1867_v18 = vmul.f32 %v4730_v15, %v6164_v53  ;;  %v2140_v54 = vpop.xlane.xlu0 %2139  ;;  %v4732_v22 = vpop.eup %4731 }
 0x61f   : > { %v2010_v23 = vmul.f32 %v4732_v22, %v6151_v3 }
 0x620   : > { %v1869_v14 = vpack.c.bf16 %v1867_v18, %v1866_v16 }
 0x622   : > { %3979 = vmatmul.msk.bf16.gmra.mxu1 %vm1648_vm11, %v1869_v14 }
 0x631   : > { %v1995_v20 = vpop.xlane.xlu2 %1994  ;;  %v2163_v21 = vpop.permute.xlu0 %2162 }
 0x632   : > { %4733 = vrcp.f32 %v1995_v20  ;;  %2178 = vmatpush.bf16.msra.mxu1 %v2163_v21 }
 0x633   : > { %4735 = vrcp.f32 %v2140_v54 }
 0x638   : > { %v4734_v7 = vpop.eup %4733 }
 0x639   : > { %v2009_v25 = vmul.f32 %v4734_v7, %v6175_v27  ;;  %v2001_v17 = vpop.xlane.xlu2 %2000  ;;  %v4736_v31 = vpop.eup %4735 }
 0x63a   : > { %v2154_v32 = vmul.f32 %v4736_v31, %v6169_v13  ;;  %v4819_v31 = vld [vmem:[#allocation2 + $0x10] sm:$0xff] }
 0x63b   : > { %v2013_v28 = vpack.c.bf16 %v2010_v23, %v2009_v25 }
 0x63d   : > { %3982 = vmatmul.msk.bf16.vlgmr.msra.gmra.mxu3 %vm1648_vm11, %v2013_v28  ;;  %v4669_v28 = vld [vmem:[%s1088_s23] ss:$0 sm:$0xff] }
 0x641   : > { %v2161_v9 = vpop.permute.xlu2 %2160  ;;  %v2143_v53 = vpop.xlane.xlu1 %2142 }
 0x642   : > { %4737 = vrcp.f32 %v2143_v53  ;;  %2179 = vmatpush.bf16.msra.mxu1 %v2161_v9 }
 0x648   : > { %v4738_v62 = vpop.eup %4737  ;;  %v1763_v24 = vpop.f32.mrf.mxu3 }
 0x649   : > { %v2155_v33 = vmul.f32 %v4738_v62, %v6190_v46  ;;  %1773 = vst.msk [vmem:[#allocation3] sm:$0xff] %vm1648_vm11, %v1763_v24  ;;  %v2146_v3 = vpop.xlane.xlu1 %2145 }
 0x64a   : > { %4739 = vrcp.f32 %v2146_v3 }
 0x64b   : > { %v2158_v27 = vpack.c.bf16 %v2155_v33, %v2154_v32  ;;  %v4820_v33 = vld [vmem:[#allocation2] sm:$0xff] }
 0x64d   : > { %3986 = vmatmul.msk.bf16.vlgmr.msra.gmra.mxu1 %vm1648_vm11, %v2158_v27 }
 0x650   : > { %v1765_v36 = vpop.f32.mrf.mxu3  ;;  %v4740_v42 = vpop.eup %4739 }
 0x651   : > { %1774 = vst.msk [vmem:[#allocation3 + $0x8] sm:$0xff] %vm1648_vm11, %v1765_v36  ;;  %v2149_v39 = vpop.xlane.xlu1 %2148  ;;  %v2156_v13 = vmul.f32 %v4740_v42, %v6197_v34 }
 0x652   : > { %4741 = vrcp.f32 %v2149_v39  ;;  %v4821_v39 = vld [vmem:[#allocation2 + $0x18] sm:$0xff] }
 0x653   : > { %4743 = vrcp.f32 %v2001_v17 }
 0x658   : > { %v4742_v43 = vpop.eup %4741  ;;  %v1768_v44 = vpop.f32.mrf.mxu3 }
 0x659   : > { %1775 = vst.msk [vmem:[#allocation3 + $0x10] sm:$0xff] %vm1648_vm11, %v1768_v44  ;;  %v2157_v47 = vmul.f32 %v4742_v43, %v6204_v38  ;;  %v4744_v48 = vpop.eup %4743 }
 0x65a   : > { %v2011_v35 = vmul.f32 %v4744_v48, %v6183_v37 }
 0x65b   : > { %v2159_v58 = vpack.c.bf16 %v2157_v47, %v2156_v13  ;;  %v4822_v13 = vld [vmem:[#allocation2 + $0x8] sm:$0xff] }
 0x65c   : > { %v2004_v10 = vpop.xlane.xlu0 %2003 }
 0x65d   : > { %4745 = vrcp.f32 %v2004_v10  ;;  %3987 = vmatmul.msk.bf16.gmra.mxu1 %vm1648_vm11, %v2159_v58 }
 0x660   : > { %v1770_v29 = vpop.f32.mrf.mxu3 }
 0x661   : > { %1776 = vst.msk [vmem:[#allocation3 + $0x18] sm:$0xff] %vm1648_vm11, %v1770_v29 }
 0x663   : > { %v4746_v46 = vpop.eup %4745 }
 0x664   : > { %v2012_v30 = vmul.f32 %v4746_v46, %v6210_v19 }
 0x666   : > { %v2014_v50 = vpack.c.bf16 %v2012_v30, %v2011_v35 }
 0x668   : > { %3983 = vmatmul.msk.bf16.gmra.mxu3 %vm1648_vm11, %v2014_v50 }
 0x681   : > { %v1891_v52 = vpop.f32.mrf.mxu1 }
 0x682   : > { %1905 = vrot.lane.b32.xlu2 %v1891_v52, %s5414_s30 }
 0x689   : > { %v1893_v55 = vpop.f32.mrf.mxu1 }
 0x68a   : > { %1907 = vrot.lane.b32.xlu1 %v1893_v55, %s5414_s30 }
 0x69f   : > { %v1896_v57 = vpop.f32.mrf.mxu1 }
 0x6a0   : > { %1909 = vrot.lane.b32.xlu1 %v1896_v57, %s5414_s30 }
 0x6a7   : > { %v1898_v59 = vpop.f32.mrf.mxu1 }
 0x6c0   : > { %v2036_v34 = vpop.f32.mrf.mxu3 }
 0x6c1   : > { %2050 = vrot.lane.b32.xlu2 %v2036_v34, %s5413_s25 }
 0x6c8   : > { %v2038_v60 = vpop.f32.mrf.mxu3 }
 0x6c9   : > { %2052 = vrot.lane.b32.xlu2 %v2038_v60, %s5413_s25 }
 0x6ca   : > { %v2181_v37 = vpop.f32.mrf.mxu1 }
 0x6cb   : > { %2195 = vrot.lane.b32.xlu0 %v2181_v37, %s5412_s7 }
 0x6d2   : > { %v2183_v41 = vpop.f32.mrf.mxu1 }
 0x6d3   : > { %2197 = vrot.lane.b32.xlu2 %v2183_v41, %s5412_s7 }
 0x6da   : > { %v2186_v63 = vpop.f32.mrf.mxu1 }
 0x6db   : > { %1911 = vrot.lane.b32.xlu2 %v1898_v59, %s5414_s30 }
 0x6dc   : > { %v1906_v38 = vpop.permute.xlu2 %1905 }
 0x6dd   : > { %1918 = vst.msk [vmem:[#allocation3] sm:$0xff] %vm1917_vm13, %v1906_v38  ;;  %v4134_v38 = vld [vmem:[%s5854_s9 + $0xe0] sm:$0xf] }
 0x6e2   : > { %v2188_v19 = vpop.f32.mrf.mxu1 }
 0x6e3   : > { %2199 = vrot.lane.b32.xlu2 %v2186_v63, %s5412_s7  ;;  %v4398_v63 = vld [vmem:[%s5854_s9 + $0xec] sm:$0xf0] }
 0x6eb   : > { %v2041_v26 = vpop.f32.mrf.mxu3 }
 0x6ec   : > { %2054 = vrot.lane.b32.xlu1 %v2041_v26, %s5413_s25  ;;  %v4396_v26 = vld [vmem:[%s5854_s9 + $0xe4] sm:$0xf] }
 0x6f3   : > { %v2043_v1 = vpop.f32.mrf.mxu3 }
 0x6f4   : > { %2201 = vrot.lane.b32.xlu1 %v2188_v19, %s5412_s7  ;;  %2056 = vrot.lane.b32.xlu0 %v2043_v1, %s5413_s25  ;;  %v4135_v19 = vor.u32 %v4398_v63, %v4134_v38  ;;  %v4136_v1 = vld [vmem:[%s5854_s9 + $0xf0] sm:$0xf0] }
 0x6f5   : > { %v4139_v0 = vor.u32 %v4396_v26, %v4136_v1  ;;  %v4381_v26 = vld [vmem:[%s5854_s9 + $0x6c] sm:$0xf] }
 0x6f6   : > { %2609 = vmatpush.bf16.msrb.mxu3 %v4135_v19  ;;  %v4080_v19 = vld [vmem:[%s5854_s9 + $0x78] sm:$0xf0] }
 0x6f7   : > { %2628 = vmatpush.bf16.msrb.mxu0 %v4139_v0  ;;  %v4083_v1 = vor.u32 %v4381_v26, %v4080_v19  ;;  %v4376_v0 = vld [vmem:[%s5854_s9 + $0x44] sm:$0xf] }
 0x6fc   : > { %v1908_v2 = vpop.permute.xlu1 %1907 }
 0x6fd   : > { %1919 = vst.msk [vmem:[#allocation3 + $0x8] sm:$0xff] %vm1917_vm13, %v1908_v2  ;;  %v4142_v2 = vld [vmem:[%s5854_s9 + $0xe8] sm:$0xf] }
 0x6fe   : > { %v4143_v5 = vor.u32 %v4399_v4, %v4142_v2  ;;  %v4054_v2 = vld [vmem:[%s5854_s9 + $0x40] sm:$0xf]  ;;  %v4378_v4 = vld [vmem:[%s5854_s9 + $0x4c] sm:$0xf0] }
 0x700   : > { %2647 = vmatpush.bf16.msrb.mxu1 %v4143_v5  ;;  %v4055_v5 = vor.u32 %v4378_v4, %v4054_v2 }
 0x712   : > { %v1910_v8 = vpop.permute.xlu1 %1909 }
 0x713   : > { %1920 = vst.msk [vmem:[#allocation3 + $0x10] sm:$0xff] %vm1917_vm13, %v1910_v8  ;;  %v4144_v8 = vld [vmem:[%s5854_s9 + $0xf8] sm:$0xf0] }
 0x714   : > { %v4147_v49 = vor.u32 %v4397_v6, %v4144_v8  ;;  %v4056_v6 = vld [vmem:[%s5854_s9 + $0x50] sm:$0xf0]  ;;  %v4062_v8 = vld [vmem:[%s5854_s9 + $0x48] sm:$0xf] }
 0x716   : > { %2666 = vmatpush.bf16.msrb.mxu2 %v4147_v49  ;;  %v4379_v49 = vld [vmem:[%s5854_s9 + $0x54] sm:$0xf0] }
 0x71b   : > { %v2051_v56 = vpop.permute.xlu2 %2050 }
 0x71c   : > { %2063 = vst.msk [vmem:[#allocation3] sm:$0xff] %vm2062_vm14, %v2051_v56  ;;  %v4394_v56 = vld [vmem:[%s5854_s9 + $0xcc] sm:$0xf0] }
 0x71d   : > { %v4119_v45 = vor.u32 %v4394_v56, %v4118_v61  ;;  %v4059_v61 = vor.u32 %v4376_v0, %v4056_v6  ;;  %v4063_v56 = vor.u32 %v4379_v49, %v4062_v8  ;;  %v4671_v8 = vld [vmem:[%s6993_s22] ss:$0 sm:$0xff] }
 0x71f   : > { %2610 = vmatpush.bf16.msrb.mxu3 %v4119_v45  ;;  %v4064_v45 = vld [vmem:[%s5854_s9 + $0x58] sm:$0xf0] }
 0x723   : > { %v2053_v11 = vpop.permute.xlu2 %2052 }
 0x724   : > { %2064 = vst.msk [vmem:[#allocation3 + $0x8] sm:$0xff] %vm2062_vm14, %v2053_v11  ;;  %v4120_v11 = vld [vmem:[%s5854_s9 + $0xd0] sm:$0xf0] }
 0x72d   : > { %v2198_v12 = vpop.permute.xlu2 %2197 }
 0x72e   : > { %2209 = vst.msk [vmem:[#allocation3 + $0x8] sm:$0xff] %vm2207_vm15, %v2198_v12  ;;  %v4126_v12 = vld [vmem:[%s5854_s9 + $0xc8] sm:$0xf] }
 0x735   : > { %v1912_v15 = vpop.permute.xlu2 %1911  ;;  %v2213_v14 = vld [vmem:[#allocation3 + $0x8] sm:$0xff] }
 0x736   : > { %1921 = vst.msk [vmem:[#allocation3 + $0x18] sm:$0xff] %vm1917_vm13, %v1912_v15  ;;  %v4395_v15 = vld [vmem:[%s5854_s9 + $0xd4] sm:$0xf0] }
 0x73d   : > { %v2196_v16 = vpop.permute.xlu0 %2195  ;;  %v2200_v21 = vpop.permute.xlu2 %2199 }
 0x73e   : > { %2208 = vst.msk [vmem:[#allocation3] sm:$0xff] %vm2207_vm15, %v2196_v16  ;;  %v4123_v16 = vor.u32 %v4392_v51, %v4120_v11  ;;  %v4377_v51 = vld [vmem:[%s5854_s9 + $0x4c] sm:$0xf] }
 0x73f   : > { %v4067_v11 = vor.u32 %v4377_v51, %v4064_v45 }
 0x740   : > { %2629 = vmatpush.bf16.msrb.mxu0 %v4123_v16  ;;  %v4372_v16 = vld [vmem:[%s5854_s9 + $0x24] sm:$0xf] }
 0x745   : > { %v2212_v18 = vld [vmem:[#allocation3] sm:$0xff] }
 0x746   : > { %v2216_v54 = vpack.c.bf16 %v2213_v14, %v2212_v18  ;;  %v4127_v18 = vor.u32 %v4395_v15, %v4126_v12  ;;  %v4393_v14 = vld [vmem:[%s5854_s9 + $0xcc] sm:$0xf]  ;;  %v4038_v12 = vld [vmem:[%s5854_s9 + $0x20] sm:$0xf]  ;;  %v4374_v15 = vld [vmem:[%s5854_s9 + $0x2c] sm:$0xf0] }
 0x748   : > { %2294 = vmatmul.bf16.vlgmr.msra.gmra.mxu2 %v2216_v54  ;;  %v4128_v54 = vld [vmem:[%s5854_s9 + $0xd8] sm:$0xf0]  ;;  %2648 = vmatpush.bf16.msrb.mxu1 %v4127_v18  ;;  %v4039_v18 = vor.u32 %v4374_v15, %v4038_v12 }
 0x75e   : > { %v2055_v20 = vpop.permute.xlu1 %2054 }
 0x75f   : > { %2065 = vst.msk [vmem:[#allocation3 + $0x10] sm:$0xff] %vm2062_vm14, %v2055_v20  ;;  %v4131_v20 = vor.u32 %v4393_v14, %v4128_v54  ;;  %v4040_v14 = vld [vmem:[%s5854_s9 + $0x30] sm:$0xf0]  ;;  %v4046_v54 = vld [vmem:[%s5854_s9 + $0x28] sm:$0xf] }
 0x760   : > { %2210 = vst.msk [vmem:[#allocation3 + $0x10] sm:$0xff] %vm2207_vm15, %v2200_v21  ;;  %v4102_v21 = vld [vmem:[%s5854_s9 + $0xa0] sm:$0xf] }
 0x761   : > { %2667 = vmatpush.bf16.msrb.mxu2 %v4131_v20  ;;  %v4375_v20 = vld [vmem:[%s5854_s9 + $0x34] sm:$0xf0] }
 0x766   : > { %v2202_v22 = vpop.permute.xlu1 %2201  ;;  %v2057_v7 = vpop.permute.xlu0 %2056 }
 0x767   : > { %2066 = vst.msk [vmem:[#allocation3 + $0x18] sm:$0xff] %vm2062_vm14, %v2057_v7  ;;  %v2214_v23 = vld [vmem:[#allocation3 + $0x10] sm:$0xff]  ;;  %v4388_v7 = vld [vmem:[%s5854_s9 + $0xa4] sm:$0xf] }
 0x768   : > { %2211 = vst.msk [vmem:[#allocation3 + $0x18] sm:$0xff] %vm2207_vm15, %v2202_v22  ;;  %v4390_v22 = vld [vmem:[%s5854_s9 + $0xac] sm:$0xf0] }
 0x76f   : > { %v2215_v25 = vld [vmem:[#allocation3 + $0x18] sm:$0xff] }
 0x770   : > { %v2217_v17 = vpack.c.bf16 %v2215_v25, %v2214_v23  ;;  %v4103_v23 = vor.u32 %v4390_v22, %v4102_v21  ;;  %v4104_v25 = vld [vmem:[%s5854_s9 + $0xb0] sm:$0xf0]  ;;  %v4043_v22 = vor.u32 %v4372_v16, %v4040_v14 }
 0x772   : > { %2299 = vmatmul.bf16.gmra.mxu2 %v2217_v17  ;;  %v4110_v17 = vld [vmem:[%s5854_s9 + $0xa8] sm:$0xf]  ;;  %2611 = vmatpush.bf16.msrb.mxu3 %v4103_v23  ;;  %v4373_v23 = vld [vmem:[%s5854_s9 + $0x2c] sm:$0xf] }
 0x7cb   : > { %v2295_v9 = vpop.f32.mrf.mxu2 }
 0x7cc   : > { %v2296_v53 = vadd.f32 %v4669_v28, %v2295_v9  ;;  %v4107_v9 = vor.u32 %v4388_v7, %v4104_v25  ;;  %v4047_v7 = vor.u32 %v4375_v20, %v4046_v54  ;;  %v4048_v25 = vld [vmem:[%s5854_s9 + $0x38] sm:$0xf0] }
 0x7ce   : > { %v6273_v62 = vadd.f32 %v4819_v31, %v2296_v53  ;;  %v4389_v31 = vld [vmem:[%s5854_s9 + $0xac] sm:$0xf]  ;;  %2630 = vmatpush.bf16.msrb.mxu0 %v4107_v9  ;;  %v4051_v9 = vor.u32 %v4373_v23, %v4048_v25 }
 0x7d0   : > { %2311 = vadd.xlane.f32.xlu0 %v6273_v62 }
 0x7d3   : > { %v2297_v24 = vpop.f32.mrf.mxu2 }
 0x7d4   : > { %v2298_v32 = vadd.f32 %v4669_v28, %v2297_v24  ;;  %v4112_v24 = vld [vmem:[%s5854_s9 + $0xb8] sm:$0xf0] }
 0x7d6   : > { %v6276_v3 = vadd.f32 %v4820_v33, %v2298_v32  ;;  %v4115_v32 = vor.u32 %v4389_v31, %v4112_v24  ;;  %v4086_v33 = vld [vmem:[%s5854_s9 + $0x80] sm:$0xf]  ;;  %v4368_v31 = vld [vmem:[%s5854_s9 + $0x4] sm:$0xf]  ;;  %v4024_v24 = vld [vmem:[%s5854_s9 + $0x10] sm:$0xf0] }
 0x7d8   : > { %2313 = vadd.xlane.f32.xlu2 %v6276_v3  ;;  %2668 = vmatpush.bf16.msrb.mxu2 %v4115_v32 }
 0x7f5   : > { %v2300_v27 = vpop.f32.mrf.mxu2 }
 0x7f6   : > { %v2301_v36 = vadd.f32 %v4669_v28, %v2300_v27  ;;  %v4386_v27 = vld [vmem:[%s5854_s9 + $0x8c] sm:$0xf0] }
 0x7f8   : > { %v6279_v42 = vadd.f32 %v4821_v39, %v2301_v36  ;;  %v4384_v36 = vld [vmem:[%s5854_s9 + $0x84] sm:$0xf]  ;;  %v4087_v39 = vor.u32 %v4386_v27, %v4086_v33  ;;  %v4027_v33 = vor.u32 %v4368_v31, %v4024_v24  ;;  %v4030_v27 = vld [vmem:[%s5854_s9 + $0x8] sm:$0xf] }
 0x7fa   : > { %2315 = vadd.xlane.f32.xlu1 %v6279_v42  ;;  %2612 = vmatpush.bf16.msrb.mxu3 %v4087_v39  ;;  %v4369_v39 = vld [vmem:[%s5854_s9 + $0xc] sm:$0xf] }
 0x7fd   : > { %v2302_v43 = vpop.f32.mrf.mxu2 }
 0x7fe   : > { %v2303_v44 = vadd.f32 %v4669_v28, %v2302_v43  ;;  %v4391_v28 = vld [vmem:[%s5854_s9 + $0xb4] sm:$0xf0]  ;;  %v4088_v43 = vld [vmem:[%s5854_s9 + $0x90] sm:$0xf0] }
 0x7ff   : > { %v4111_v53 = vor.u32 %v4391_v28, %v4110_v17  ;;  %v4022_v17 = vld [vmem:[%s5854_s9] sm:$0xf] }
 0x800   : > { %v6282_v47 = vadd.f32 %v4822_v13, %v2303_v44  ;;  %v4094_v44 = vld [vmem:[%s5854_s9 + $0x88] sm:$0xf]  ;;  %v4387_v13 = vld [vmem:[%s5854_s9 + $0x94] sm:$0xf0] }
 0x801   : > { %2649 = vmatpush.bf16.msrb.mxu1 %v4111_v53  ;;  %v4370_v53 = vld [vmem:[%s5854_s9 + $0xc] sm:$0xf0] }
 0x802   : > { %2317 = vadd.xlane.f32.xlu0 %v6282_v47  ;;  %v4023_v32 = vor.u32 %v4370_v53, %v4022_v17 }
 0x843   : > { %v2312_v58 = vpop.xlane.xlu0 %2311 }
 0x844   : > { %v2319_v10 = vmul.f32 %v2312_v58, %v5902_v40  ;;  %v4091_v58 = vor.u32 %v4384_v36, %v4088_v43  ;;  %v4371_v36 = vld [vmem:[%s5854_s9 + $0x14] sm:$0xf0] }
 0x846   : > { %v6287_v29 = vsub.f32 %v6273_v62, %v2319_v10  ;;  %v4095_v10 = vor.u32 %v4387_v13, %v4094_v44  ;;  %2631 = vmatpush.bf16.msrb.mxu0 %v4091_v58  ;;  %v4031_v44 = vor.u32 %v4371_v36, %v4030_v27  ;;  %v4032_v13 = vld [vmem:[%s5854_s9 + $0x18] sm:$0xf0] }
 0x847   : > { %v4035_v58 = vor.u32 %v4369_v39, %v4032_v13  ;;  %v4415_v13 = vld [vmem:[%s5860_s20 + $0x78] sm:$0xff] }
 0x848   : > { %v2327_v48 = vmul.f32 %v6287_v29, %v6287_v29  ;;  %2650 = vmatpush.bf16.msrb.mxu1 %v4095_v10 }
 0x84a   : > { %2331 = vadd.xlane.f32.xlu2 %v2327_v48  ;;  %v4385_v48 = vld [vmem:[%s5854_s9 + $0x8c] sm:$0xf] }
 0x84b   : > { %v2314_v46 = vpop.xlane.xlu2 %2313 }
 0x84c   : > { %v2320_v35 = vmul.f32 %v2314_v46, %v5902_v40  ;;  %v4096_v46 = vld [vmem:[%s5854_s9 + $0x98] sm:$0xf0] }
 0x84e   : > { %v6293_v30 = vsub.f32 %v6276_v3, %v2320_v35  ;;  %v4099_v35 = vor.u32 %v4385_v48, %v4096_v46 }
 0x850   : > { %v2328_v50 = vmul.f32 %v6293_v30, %v6293_v30  ;;  %2669 = vmatpush.bf16.msrb.mxu2 %v4099_v35 }
 0x852   : > { %2333 = vadd.xlane.f32.xlu1 %v2328_v50  ;;  %v4070_v50 = vld [vmem:[%s5854_s9 + $0x60] sm:$0xf] }
 0x854   : > { %2670 = vmatpush.bf16.msrb.mxu2 %v4083_v1 }
 0x858   : > { %2671 = vmatpush.bf16.msrb.mxu2 %v4067_v11 }
 0x85c   : > { %2672 = vmatpush.bf16.msrb.mxu2 %v4051_v9 }
 0x860   : > { %2673 = vmatpush.bf16.msrb.mxu2 %v4035_v58  ;;  %v4423_v58 = vld [vmem:[%s5860_s20 + $0xb8] sm:$0xff] }
 0x86d   : > { %v2316_v52 = vpop.xlane.xlu1 %2315 }
 0x86e   : > { %v2321_v55 = vmul.f32 %v2316_v52, %v5902_v40  ;;  %v4382_v52 = vld [vmem:[%s5854_s9 + $0x6c] sm:$0xf0] }
 0x870   : > { %v6299_v57 = vsub.f32 %v6279_v42, %v2321_v55  ;;  %v4380_v55 = vld [vmem:[%s5854_s9 + $0x64] sm:$0xf] }
 0x872   : > { %v2329_v34 = vmul.f32 %v6299_v57, %v6299_v57 }
 0x874   : > { %2335 = vadd.xlane.f32.xlu0 %v2329_v34  ;;  %v4071_v34 = vor.u32 %v4382_v52, %v4070_v50 }
 0x875   : > { %v2318_v59 = vpop.xlane.xlu0 %2317 }
 0x876   : > { %v2322_v60 = vmul.f32 %v2318_v59, %v5902_v40  ;;  %v4072_v59 = vld [vmem:[%s5854_s9 + $0x70] sm:$0xf0]  ;;  %2613 = vmatpush.bf16.msrb.mxu3 %v4071_v34 }
 0x877   : > { %v4075_v38 = vor.u32 %v4380_v55, %v4072_v59 }
 0x878   : > { %v6305_v37 = vsub.f32 %v6282_v47, %v2322_v60  ;;  %v4078_v60 = vld [vmem:[%s5854_s9 + $0x68] sm:$0xf] }
 0x879   : > { %2632 = vmatpush.bf16.msrb.mxu0 %v4075_v38 }
 0x87a   : > { %v2330_v41 = vmul.f32 %v6305_v37, %v6305_v37  ;;  %2614 = vmatpush.bf16.msrb.mxu3 %v4055_v5 }
 0x87c   : > { %2337 = vadd.xlane.f32.xlu2 %v2330_v41  ;;  %v4383_v41 = vld [vmem:[%s5854_s9 + $0x74] sm:$0xf0]  ;;  %s6992_s9 = scalar_lea.vmem [#allocation19], %s5827_s12 }
 0x87d   : > { %v4079_v63 = vor.u32 %v4383_v41, %v4078_v60  ;;  %2633 = vmatpush.bf16.msrb.mxu0 %v4059_v61  ;;  %v4670_v2 = vld [vmem:[%s6992_s9] ss:$0 sm:$0xff] }
 0x87e   : > { %2615 = vmatpush.bf16.msrb.mxu3 %v4039_v18 }
 0x87f   : > { %2651 = vmatpush.bf16.msrb.mxu1 %v4079_v63 }
 0x881   : > { %2634 = vmatpush.bf16.msrb.mxu0 %v4043_v22 }
 0x882   : > { %2616 = vmatpush.bf16.msrb.mxu3 %v4023_v32 }
 0x883   : > { %2652 = vmatpush.bf16.msrb.mxu1 %v4063_v56 }
 0x885   : > { %2635 = vmatpush.bf16.msrb.mxu0 %v4027_v33 }
 0x887   : > { %2653 = vmatpush.bf16.msrb.mxu1 %v4047_v7 }
 0x889   : > { %3308 = vmatpush.bf16.msra.mxu0 %v4415_v13  ;;  %v4403_v13 = vld [vmem:[%s5860_s20 + $0x18] sm:$0xff] }
 0x88b   : > { %2654 = vmatpush.bf16.msrb.mxu1 %v4031_v44 }
 0x88f   : > { %3327 = vmatpush.bf16.msra.mxu1 %v4423_v58  ;;  %v4427_v58 = vld [vmem:[%s5860_s20 + $0xd8] sm:$0xff] }
 0x8bd   : > { %v2332_v21 = vpop.xlane.xlu2 %2331 }
 0x8be   : > { %v2339_v28 = vmul.f32 %v2332_v21, %v5902_v40 }
 0x8c0   : > { %v2343_v43 = vadd.f32 1e-05, %v2339_v28 }
 0x8c2   : > { %4747 = vrsqrt.f32 %v2343_v43  ;;  %vm2353_vm1 = vweird.f32 %v2343_v43 }
 0x8c5   : > { %v2334_v10 = vpop.xlane.xlu1 %2333 }
 0x8c6   : > { %v2340_v48 = vmul.f32 %v2334_v10, %v5902_v40 }
 0x8c8   : > { %v4748_v46 = vpop.eup %4747  ;;  %v2344_v35 = vadd.f32 1e-05, %v2340_v48 }
 0x8c9   : > { %v2348_v50 = vmul.f32 %v4748_v46, %v2343_v43  ;;  %vm2354_vm0 = vweird.f32 %v4748_v46 }
 0x8ca   : > { %4749 = vrsqrt.f32 %v2344_v35  ;;  %vm2355_vm2 = vmor %vm2353_vm1, %vm2354_vm0  ;;  %vm2363_vm4 = vweird.f32 %v2344_v35 }
 0x8cb   : > { %v2349_v52 = vmul.f32 %v4748_v46, %v2348_v50 }
 0x8cd   : > { %v2350_v55 = vmul.f32 0.5, %v2349_v52  ;;  %v4414_v52 = vld [vmem:[%s5860_s20 + $0x70] sm:$0xff] }
 0x8ce   : > { %3309 = vmatpush.bf16.msra.mxu0 %v4414_v52 }
 0x8cf   : > { %v2351_v34 = vsub.f32 1.5, %v2350_v55  ;;  %v4422_v55 = vld [vmem:[%s5860_s20 + $0xb0] sm:$0xff] }
 0x8d0   : > { %v4750_v59 = vpop.eup %4749  ;;  %3328 = vmatpush.bf16.msra.mxu1 %v4422_v55  ;;  %v4409_v55 = vld [vmem:[%s5860_s20 + $0x48] sm:$0xff] }
 0x8d1   : > { %v2352_v60 = vmul.f32 %v4748_v46, %v2351_v34  ;;  %v2358_v41 = vmul.f32 %v4750_v59, %v2344_v35  ;;  %vm2364_vm3 = vweird.f32 %v4750_v59 }
 0x8d2   : > { %vm2365_vm5 = vmor %vm2363_vm4, %vm2364_vm3 }
 0x8d3   : > { %v2359_v38 = vmul.f32 %v4750_v59, %v2358_v41  ;;  %v2356_v63 = vsel %vm2355_vm2, %v4748_v46, %v2352_v60  ;;  %v4407_v41 = vld [vmem:[%s5860_s20 + $0x38] sm:$0xff] }
 0x8d4   : > { %v2387_v1 = vmul.f32 %v2356_v63, %v6287_v29  ;;  %3289 = vmatpush.bf16.msra.mxu3 %v4407_v41 }
 0x8d5   : > { %v2360_v26 = vmul.f32 0.5, %v2359_v38  ;;  %v4431_v38 = vld [vmem:[%s5860_s20 + $0xf8] sm:$0xff] }
 0x8d6   : > { %v2394_v6 = vmul.f32 %v4670_v2, %v2387_v1  ;;  %3346 = vmatpush.bf16.msra.mxu2 %v4431_v38 }
 0x8d7   : > { %v2361_v19 = vsub.f32 1.5, %v2360_v26 }
 0x8d8   : > { %v2401_v61 = vadd.f32 %v4671_v8, %v2394_v6 }
 0x8d9   : > { %v2362_v4 = vmul.f32 %v4750_v59, %v2361_v19 }
 0x8db   : > { %v2366_v0 = vsel %vm2365_vm5, %v4750_v59, %v2362_v4  ;;  %v4421_v4 = vld [vmem:[%s5860_s20 + $0xa8] sm:$0xff] }
 0x8dc   : > { %v2388_v5 = vmul.f32 %v2366_v0, %v6293_v30  ;;  %3329 = vmatpush.bf16.msra.mxu1 %v4421_v4 }
 0x8de   : > { %v2395_v49 = vmul.f32 %v4670_v2, %v2388_v5 }
 0x8e0   : > { %v2402_v56 = vadd.f32 %v4671_v8, %v2395_v49 }
 0x8e2   : > { %v2405_v51 = vpack.c.bf16 %v2402_v56, %v2401_v61  ;;  %v4406_v61 = vld [vmem:[%s5860_s20 + $0x30] sm:$0xff] }
 0x8e3   : > { %v4430_v56 = vld [vmem:[%s5860_s20 + $0xf0] sm:$0xff]  ;;  %3290 = vmatpush.bf16.msra.mxu3 %v4406_v61  ;;  %v4408_v61 = vld [vmem:[%s5860_s20 + $0x40] sm:$0xff] }
 0x8e4   : > { %2617 = vmatmul.bf16.vlgmr.msrb.gmra.mxu3 %v2405_v51  ;;  %2636 = vmatmul.bf16.vlgmr.msrb.gmra.mxu0 %v2405_v51 }
 0x8e5   : > { %2655 = vmatmul.bf16.vlgmr.msrb.gmra.mxu1 %v2405_v51  ;;  %2674 = vmatmul.bf16.vlgmr.msrb.gmra.mxu2 %v2405_v51 }
 0x8e6   : > { %3347 = vmatpush.bf16.msra.mxu2 %v4430_v56  ;;  %v4416_v56 = vld [vmem:[%s5860_s20 + $0x80] sm:$0xff] }
 0x8e7   : > { %v2336_v29 = vpop.xlane.xlu0 %2335 }
 0x8e8   : > { %v2341_v45 = vmul.f32 %v2336_v29, %v5902_v40 }
 0x8ea   : > { %v2345_v11 = vadd.f32 1e-05, %v2341_v45 }
 0x8ec   : > { %4751 = vrsqrt.f32 %v2345_v11  ;;  %vm2373_vm7 = vweird.f32 %v2345_v11 }
 0x8ef   : > { %v2338_v12 = vpop.xlane.xlu2 %2337 }
 0x8f0   : > { %v2342_v15 = vmul.f32 %v2338_v12, %v5902_v40  ;;  %v4412_v12 = vld [vmem:[%s5860_s20 + $0x60] sm:$0xff] }
 0x8f2   : > { %v4752_v30 = vpop.eup %4751  ;;  %v2346_v16 = vadd.f32 1e-05, %v2342_v15  ;;  %v4420_v15 = vld [vmem:[%s5860_s20 + $0xa0] sm:$0xff] }
 0x8f3   : > { %v2368_v18 = vmul.f32 %v4752_v30, %v2345_v11  ;;  %vm2374_vm6 = vweird.f32 %v4752_v30  ;;  %3330 = vmatpush.bf16.msra.mxu1 %v4420_v15 }
 0x8f4   : > { %4753 = vrsqrt.f32 %v2346_v16  ;;  %vm2375_vm8 = vmor %vm2373_vm7, %vm2374_vm6  ;;  %vm2383_vm10 = vweird.f32 %v2346_v16 }
 0x8f5   : > { %v2369_v14 = vmul.f32 %v4752_v30, %v2368_v18 }
 0x8f7   : > { %v2370_v54 = vmul.f32 0.5, %v2369_v14 }
 0x8f9   : > { %v2371_v20 = vsub.f32 1.5, %v2370_v54  ;;  %v4405_v54 = vld [vmem:[%s5860_s20 + $0x28] sm:$0xff] }
 0x8fa   : > { %v4754_v21 = vpop.eup %4753  ;;  %3291 = vmatpush.bf16.msra.mxu3 %v4405_v54 }
 0x8fb   : > { %v2372_v22 = vmul.f32 %v4752_v30, %v2371_v20  ;;  %v2378_v7 = vmul.f32 %v4754_v21, %v2346_v16  ;;  %vm2384_vm9 = vweird.f32 %v4754_v21  ;;  %v4429_v20 = vld [vmem:[%s5860_s20 + $0xe8] sm:$0xff] }
 0x8fc   : > { %vm2385_vm11 = vmor %vm2383_vm10, %vm2384_vm9  ;;  %3348 = vmatpush.bf16.msra.mxu2 %v4429_v20 }
 0x8fd   : > { %v2379_v23 = vmul.f32 %v4754_v21, %v2378_v7  ;;  %v2376_v25 = vsel %vm2375_vm8, %v4752_v30, %v2372_v22 }
 0x8fe   : > { %v2389_v9 = vmul.f32 %v2376_v25, %v6299_v57  ;;  %v2439_v57 = vld [vmem:[%s5886_s2] sm:$0xf] }
 0x8ff   : > { %v2380_v17 = vmul.f32 0.5, %v2379_v23  ;;  %v6386_v43 = vperm.slane %v2439_v57, 1  ;;  %v6388_v44 = vperm.slane %v2439_v57, 2  ;;  %v6399_v50 = vperm.slane %v2439_v57, 0 }
 0x900   : > { %v2396_v32 = vmul.f32 %v4670_v2, %v2389_v9  ;;  %v6404_v59 = vperm.slane %v2439_v57, 3  ;;  %v4419_v9 = vld [vmem:[%s5860_s20 + $0x98] sm:$0xff] }
 0x901   : > { %v2381_v28 = vsub.f32 1.5, %v2380_v17  ;;  %3331 = vmatpush.bf16.msra.mxu1 %v4419_v9 }
 0x902   : > { %v2403_v27 = vadd.f32 %v4671_v8, %v2396_v32 }
 0x903   : > { %v2382_v53 = vmul.f32 %v4754_v21, %v2381_v28  ;;  %v4411_v28 = vld [vmem:[%s5860_s20 + $0x58] sm:$0xff] }
 0x905   : > { %v2386_v31 = vsel %vm2385_vm11, %v4754_v21, %v2382_v53  ;;  %v4404_v53 = vld [vmem:[%s5860_s20 + $0x20] sm:$0xff] }
 0x906   : > { %v2390_v24 = vmul.f32 %v2386_v31, %v6305_v37  ;;  %v4428_v31 = vld [vmem:[%s5860_s20 + $0xe0] sm:$0xff]  ;;  %3292 = vmatpush.bf16.msra.mxu3 %v4404_v53 }
 0x907   : > { %3349 = vmatpush.bf16.msra.mxu2 %v4428_v31 }
 0x908   : > { %v2397_v33 = vmul.f32 %v4670_v2, %v2390_v24  ;;  %v4413_v2 = vld [vmem:[%s5860_s20 + $0x68] sm:$0xff] }
 0x909   : > { %3310 = vmatpush.bf16.msra.mxu0 %v4413_v2  ;;  %v4402_v2 = vld [vmem:[%s5860_s20 + $0x10] sm:$0xff] }
 0x90a   : > { %v2404_v36 = vadd.f32 %v4671_v8, %v2397_v33  ;;  %v4410_v33 = vld [vmem:[%s5860_s20 + $0x50] sm:$0xff]  ;;  %3293 = vmatpush.bf16.msra.mxu3 %v4403_v13 }
 0x90b   : > { %3350 = vmatpush.bf16.msra.mxu2 %v4427_v58 }
 0x90c   : > { %v2406_v39 = vpack.c.bf16 %v2404_v36, %v2403_v27  ;;  %v4418_v27 = vld [vmem:[%s5860_s20 + $0x90] sm:$0xff] }
 0x90d   : > { %3311 = vmatpush.bf16.msra.mxu0 %v4412_v12  ;;  %3332 = vmatpush.bf16.msra.mxu1 %v4418_v27  ;;  %v4424_v27 = vld [vmem:[%s5860_s20 + $0xc0] sm:$0xff] }
 0x90e   : > { %2622 = vmatmul.bf16.gmra.mxu3 %v2406_v39  ;;  %2641 = vmatmul.bf16.gmra.mxu0 %v2406_v39 }
 0x90f   : > { %2660 = vmatmul.bf16.gmra.mxu1 %v2406_v39  ;;  %2679 = vmatmul.bf16.gmra.mxu2 %v2406_v39 }
 0x910   : > { %3294 = vmatpush.bf16.msra.mxu3 %v4402_v2 }
 0x911   : > { %3312 = vmatpush.bf16.msra.mxu0 %v4411_v28 }
 0x915   : > { %3313 = vmatpush.bf16.msra.mxu0 %v4410_v33  ;;  %v4400_v33 = vld [vmem:[%s5860_s20] sm:$0xff] }
 0x919   : > { %3314 = vmatpush.bf16.msra.mxu0 %v4409_v55 }
 0x91d   : > { %3315 = vmatpush.bf16.msra.mxu0 %v4408_v61 }
 0x961   : > { %v2637_v37 = vpop.f32.mrf.mxu0 }
 0x962   : > { %v6393_v10 = vadd.f32 %v2637_v37, %v6386_v43  ;;  %v2656_v48 = vpop.f32.mrf.mxu1 }
 0x963   : > { %v6396_v46 = vadd.f32 %v2656_v48, %v6388_v44 }
 0x964   : > { %v4149_v35 = vmul.f32 -1.702, %v6393_v10 }
 0x965   : > { %v4150_v34 = vmul.f32 -1.702, %v6396_v46 }
 0x966   : > { %v2719_v60 = vmul.f32 1.442695, %v4149_v35 }
 0x967   : > { %v2721_v63 = vmul.f32 1.442695, %v4150_v34  ;;  %v2618_v26 = vpop.f32.mrf.mxu3  ;;  %v4417_v34 = vld [vmem:[%s5860_s20 + $0x88] sm:$0xff] }
 0x968   : > { %4755 = vpow2.f32 %v2719_v60  ;;  %v6409_v19 = vadd.f32 %v2618_v26, %v6399_v50  ;;  %v2675_v1 = vpop.f32.mrf.mxu2  ;;  %3333 = vmatpush.bf16.msra.mxu1 %v4417_v34 }
 0x969   : > { %4757 = vpow2.f32 %v2721_v63  ;;  %v6414_v0 = vadd.f32 %v2675_v1, %v6404_v59  ;;  %v2639_v5 = vpop.f32.mrf.mxu0 }
 0x96a   : > { %v4148_v6 = vmul.f32 -1.702, %v6409_v19  ;;  %v6418_v8 = vadd.f32 %v2639_v5, %v6386_v43  ;;  %v2658_v49 = vpop.f32.mrf.mxu1 }
 0x96b   : > { %v4151_v51 = vmul.f32 -1.702, %v6414_v0  ;;  %v6424_v29 = vadd.f32 %v2658_v49, %v6388_v44 }
 0x96c   : > { %v2717_v45 = vmul.f32 1.442695, %v4148_v6  ;;  %v4153_v11 = vmul.f32 -1.702, %v6418_v8  ;;  %v4426_v6 = vld [vmem:[%s5860_s20 + $0xd0] sm:$0xff]  ;;  %3334 = vmatpush.bf16.msra.mxu1 %v4416_v56 }
 0x96d   : > { %v2723_v30 = vmul.f32 1.442695, %v4151_v51  ;;  %v4154_v16 = vmul.f32 -1.702, %v6424_v29  ;;  %3351 = vmatpush.bf16.msra.mxu2 %v4426_v6 }
 0x96e   : > { %v4756_v18 = vpop.eup %4755  ;;  %4759 = vpow2.f32 %v2717_v45  ;;  %v2727_v14 = vmul.f32 1.442695, %v4153_v11 }
 0x96f   : > { %v4758_v21 = vpop.eup %4757  ;;  %v6432_v22 = vadd.f32 1.0, %v4756_v18  ;;  %4761 = vpow2.f32 %v2723_v30  ;;  %v2729_v7 = vmul.f32 1.442695, %v4154_v16  ;;  %v2620_v23 = vpop.f32.mrf.mxu3  ;;  %v4401_v18 = vld [vmem:[%s5860_s20 + $0x8] sm:$0xff] }
 0x970   : > { %v6434_v25 = vadd.f32 1.0, %v4758_v21  ;;  %4763 = vpow2.f32 %v2727_v14  ;;  %v6437_v17 = vadd.f32 %v2620_v23, %v6399_v50  ;;  %v2677_v63 = vpop.f32.mrf.mxu2  ;;  %v4425_v14 = vld [vmem:[%s5860_s20 + $0xc8] sm:$0xff]  ;;  %3295 = vmatpush.bf16.msra.mxu3 %v4401_v18 }
 0x971   : > { %4765 = vrcp.f32 %v6432_v22  ;;  %v6473_v49 = vadd.f32 %v2677_v63, %v6404_v59  ;;  %v2789_v11 = vand.u32 2147483647, %v6432_v22  ;;  %v2791_v15 = vand.u32 2147483648, %v6432_v22  ;;  %3352 = vmatpush.bf16.msra.mxu2 %v4425_v14 }
 0x972   : > { %4767 = vrcp.f32 %v6434_v25  ;;  %v4152_v24 = vmul.f32 -1.702, %v6437_v17  ;;  %v2804_v30 = vand.u32 2147483647, %v6434_v25  ;;  %v2806_v54 = vand.u32 2147483648, %v6434_v25 }
 0x973   : > { %4769 = vpow2.f32 %v2729_v7  ;;  %vm2785_vm12 = vweird.f32 %v6432_v22  ;;  %v4155_v21 = vmul.f32 -1.702, %v6473_v49  ;;  %vm2800_vm14 = vweird.f32 %v6434_v25 }
 0x974   : > { %v4760_v32 = vpop.eup %4759  ;;  %v2725_v48 = vmul.f32 1.442695, %v4152_v24  ;;  %vm6499_vm0 = vcmp.eq.f32.partialorder %v2789_v11, 8.507059e+37  ;;  %v2792_v31 = vor.u32 1.1754944e-38, %v2791_v15  ;;  %vm6503_vm1 = vcmp.eq.f32.partialorder %v2804_v30, 8.507059e+37  ;;  %3296 = vmatpush.bf16.msra.mxu3 %v4400_v33 }
 0x975   : > { %v4762_v36 = vpop.eup %4761  ;;  %v6448_v39 = vadd.f32 1.0, %v4760_v32  ;;  %v2807_v13 = vor.u32 1.1754944e-38, %v2806_v54  ;;  %3353 = vmatpush.bf16.msra.mxu2 %v4424_v27 }
 0x976   : > { %v4764_v57 = vpop.eup %4763  ;;  %v6463_v38 = vadd.f32 1.0, %v4762_v36 }
 0x977   : > { %v6452_v37 = vpop.eup %4765  ;;  %4771 = vrcp.f32 %v6448_v39  ;;  %v6465_v1 = vadd.f32 1.0, %v4764_v57  ;;  %v2776_v20 = vand.u32 2147483648, %v6448_v39  ;;  %v2774_v58 = vand.u32 2147483647, %v6448_v39 }
 0x978   : > { %v6455_v35 = vpop.eup %4767  ;;  %v2781_v52 = vmul.f32 %v6452_v37, %v6432_v22  ;;  %4773 = vpow2.f32 %v2725_v48  ;;  %vm2786_vm13 = vweird.f32 %v6452_v37  ;;  %vm2770_vm4 = vweird.f32 %v6448_v39 }
 0x979   : > { %v4770_v60 = vpop.eup %4769  ;;  %v2796_v41 = vmul.f32 %v6455_v35, %v6434_v25  ;;  %4775 = vrcp.f32 %v6465_v1  ;;  %vm2801_vm15 = vweird.f32 %v6455_v35  ;;  %vm6515_vm2 = vmor %vm2785_vm12, %vm2786_vm13  ;;  %v6520_v48 = vor.u32 1.1754944e-38, %v2776_v20 }
 0x97a   : > { %v2782_v26 = vsub.f32 1.0, %v2781_v52  ;;  %v6468_v5 = vadd.f32 1.0, %v4770_v60  ;;  %4777 = vrcp.f32 %v6463_v38  ;;  %vm6527_vm3 = vmor %vm2800_vm14, %vm2801_vm15  ;;  %vm2845_vm5 = vweird.f32 %v6465_v1 }
 0x97b   : > { %v2797_v4 = vsub.f32 1.0, %v2796_v41  ;;  %v2849_v22 = vand.u32 2147483647, %v6465_v1  ;;  %v2731_v41 = vmul.f32 1.442695, %v4155_v21  ;;  %v2851_v6 = vand.u32 2147483648, %v6465_v1 }
 0x97c   : > { %v2783_v45 = vmul.f32 %v6452_v37, %v2782_v26  ;;  %4779 = vrcp.f32 %v6468_v5  ;;  %v2864_v11 = vand.u32 2147483647, %v6468_v5  ;;  %vm6555_vm8 = vcmp.eq.f32.partialorder %v2774_v58, 8.507059e+37 }
 0x97d   : > { %v6477_v51 = vpop.eup %4771  ;;  %v2798_v12 = vmul.f32 %v6455_v35, %v2797_v4  ;;  %vm2850_vm11 = vcmp.eq.f32.partialorder %v2849_v22, 8.507059e+37  ;;  %v2852_v14 = vor.u32 1.1754944e-38, %v2851_v6  ;;  %vm2860_vm12 = vweird.f32 %v6468_v5 }
 0x97e   : > { %v2766_v16 = vmul.f32 %v6477_v51, %v6448_v39  ;;  %v4774_v7 = vpop.eup %4773  ;;  %v2784_v23 = vadd.f32 %v6452_v37, %v2783_v45  ;;  %vm2771_vm6 = vweird.f32 %v6477_v51  ;;  %vm2865_vm15 = vcmp.eq.f32.partialorder %v2864_v11, 8.507059e+37 }
 0x97f   : > { %v2799_v28 = vadd.f32 %v6455_v35, %v2798_v12  ;;  %v4776_v9 = vpop.eup %4775  ;;  %v6534_v60 = vadd.f32 1.0, %v4774_v7  ;;  %v2866_v12 = vand.u32 2147483648, %v6468_v5  ;;  %vm6573_vm14 = vmor %vm2770_vm4, %vm2771_vm6 }
 0x980   : > { %v2767_v32 = vsub.f32 1.0, %v2766_v16  ;;  %v6509_v36 = vpop.eup %4777  ;;  %v2841_v52 = vmul.f32 %v4776_v9, %v6465_v1  ;;  %v2788_v63 = vsel %vm6515_vm2, %v6452_v37, %v2784_v23  ;;  %vm2846_vm7 = vweird.f32 %v4776_v9 }
 0x981   : > { %v2803_v25 = vsel %vm6527_vm3, %v6455_v35, %v2799_v28  ;;  %4781 = vrcp.f32 %v6534_v60  ;;  %v2811_v61 = vmul.f32 %v6509_v36, %v6463_v38  ;;  %v2793_v35 = vsel %vm6499_vm0, %v2792_v31, %v2788_v63  ;;  %vm2847_vm10 = vmor %vm2845_vm5, %vm2846_vm7 }
 0x982   : > { %v4780_v55 = vpop.eup %4779  ;;  %v2842_v26 = vsub.f32 1.0, %v2841_v52  ;;  %v2768_v4 = vmul.f32 %v6477_v51, %v2767_v32  ;;  %v2808_v45 = vsel %vm6503_vm1, %v2807_v13, %v2803_v25  ;;  %4783 = vpow2.f32 %v2731_v41 }
 0x983   : > { %v2856_v2 = vmul.f32 %v4780_v55, %v6468_v5  ;;  %vm2861_vm9 = vweird.f32 %v4780_v55  ;;  %v3006_v54 = vmul.f32 %v2793_v35, %v6393_v10  ;;  %v2812_v20 = vsub.f32 1.0, %v2811_v61 }
 0x984   : > { %v2843_v37 = vmul.f32 %v4776_v9, %v2842_v26  ;;  %v2769_v18 = vadd.f32 %v6477_v51, %v2768_v4  ;;  %v3007_v53 = vmul.f32 %v2808_v45, %v6396_v46  ;;  %vm2862_vm13 = vmor %vm2860_vm12, %vm2861_vm9  ;;  %v2867_v24 = vor.u32 1.1754944e-38, %v2866_v12 }
 0x985   : > { %v2857_v56 = vsub.f32 1.0, %v2856_v2  ;;  %v2821_v63 = vand.u32 2147483648, %v6463_v38  ;;  %v2813_v4 = vmul.f32 %v6509_v36, %v2812_v20  ;;  %vm2830_vm1 = vweird.f32 %v6534_v60 }
 0x986   : > { %v2844_v30 = vadd.f32 %v4776_v9, %v2843_v37  ;;  %v2773_v33 = vsel %vm6573_vm14, %v6477_v51, %v2769_v18  ;;  %vm2816_vm4 = vweird.f32 %v6509_v36  ;;  %vm2815_vm5 = vweird.f32 %v6463_v38 }
 0x987   : > { %v2858_v16 = vmul.f32 %v4780_v55, %v2857_v56  ;;  %v4782_v28 = vpop.eup %4781  ;;  %vm6623_vm6 = vmor %vm2815_vm5, %vm2816_vm4 }
 0x988   : > { %v2848_v21 = vsel %vm2847_vm10, %v4776_v9, %v2844_v30  ;;  %v2826_v46 = vmul.f32 %v4782_v28, %v6534_v60  ;;  %v4784_v39 = vpop.eup %4783  ;;  %vm2831_vm0 = vweird.f32 %v4782_v28 }
 0x989   : > { %v2859_v7 = vadd.f32 %v4780_v55, %v2858_v16  ;;  %v2853_v31 = vsel %vm2850_vm11, %v2852_v14, %v2848_v21  ;;  %v6589_v22 = vadd.f32 1.0, %v4784_v39  ;;  %vm2832_vm2 = vmor %vm2830_vm1, %vm2831_vm0 }
 0x98a   : > { %v3010_v5 = vmul.f32 %v2853_v31, %v6418_v8  ;;  %v2827_v34 = vsub.f32 1.0, %v2826_v46  ;;  %v2834_v8 = vand.u32 2147483647, %v6534_v60  ;;  %v2822_v46 = vor.u32 1.1754944e-38, %v2821_v63 }
 0x98b   : > { %v2642_v23 = vpop.f32.mrf.mxu0  ;;  %v2863_v9 = vsel %vm2862_vm13, %v4780_v55, %v2859_v7  ;;  %v2836_v55 = vand.u32 2147483648, %v6534_v60  ;;  %4785 = vrcp.f32 %v6589_v22  ;;  %vm2875_vm9 = vweird.f32 %v6589_v22 }
 0x98c   : > { %v6567_v1 = vadd.f32 %v2642_v23, %v6386_v43  ;;  %v2661_v32 = vpop.f32.mrf.mxu1  ;;  %v2868_v27 = vsel %vm2865_vm15, %v2867_v24, %v2863_v9  ;;  %v3022_v58 = vpack.c.bf16 %v3010_v5, %v3006_v54  ;;  %v2828_v26 = vmul.f32 %v4782_v28, %v2827_v34 }
 0x98d   : > { %v6584_v13 = vadd.f32 %v2661_v32, %v6388_v44  ;;  %v3011_v52 = vmul.f32 %v2868_v27, %v6424_v29  ;;  %v2778_v29 = vsel %vm6555_vm8, %v6520_v48, %v2773_v33  ;;  %vm2835_vm3 = vcmp.eq.f32.partialorder %v2834_v8, 8.507059e+37 }
 0x98e   : > { %v4157_v57 = vmul.f32 -1.702, %v6567_v1  ;;  %3316 = vmatmul.bf16.vlgmr.msra.gmra.mxu0 %v3022_v58  ;;  %v2829_v61 = vadd.f32 %v4782_v28, %v2828_v26  ;;  %v2837_v45 = vor.u32 1.1754944e-38, %v2836_v55  ;;  %v3005_v54 = vmul.f32 %v2778_v29, %v6409_v19 }
 0x98f   : > { %v4158_v51 = vmul.f32 -1.702, %v6584_v13  ;;  %v3023_v25 = vpack.c.bf16 %v3011_v52, %v3007_v53  ;;  %v2879_v27 = vand.u32 2147483647, %v6589_v22 }
 0x990   : > { %v2735_v41 = vmul.f32 1.442695, %v4157_v57  ;;  %v2833_v12 = vsel %vm2832_vm2, %v4782_v28, %v2829_v61  ;;  %v2881_v57 = vand.u32 2147483648, %v6589_v22 }
 0x991   : > { %v2623_v2 = vpop.f32.mrf.mxu3  ;;  %v2737_v37 = vmul.f32 1.442695, %v4158_v51  ;;  %3335 = vmatmul.bf16.vlgmr.msra.gmra.mxu1 %v3023_v25  ;;  %v2838_v16 = vsel %vm2835_vm3, %v2837_v45, %v2833_v12  ;;  %v4786_v7 = vpop.eup %4785  ;;  %vm2880_vm11 = vcmp.eq.f32.partialorder %v2879_v27, 8.507059e+37 }
 0x992   : > { %v2680_v6 = vpop.f32.mrf.mxu2  ;;  %4787 = vpow2.f32 %v2735_v41  ;;  %v6600_v56 = vadd.f32 %v2623_v2, %v6399_v50  ;;  %v3009_v20 = vmul.f32 %v2838_v16, %v6437_v17  ;;  %v2871_v53 = vmul.f32 %v4786_v7, %v6589_v22 }
 0x993   : > { %v2644_v35 = vpop.f32.mrf.mxu0  ;;  %v6603_v48 = vadd.f32 %v2680_v6, %v6404_v59  ;;  %4789 = vpow2.f32 %v2737_v37  ;;  %v2819_v17 = vand.u32 2147483647, %v6463_v38  ;;  %vm2876_vm7 = vweird.f32 %v4786_v7 }
 0x994   : > { %v6606_v11 = vadd.f32 %v2644_v35, %v6386_v43  ;;  %v2663_v60 = vpop.f32.mrf.mxu1  ;;  %v4156_v15 = vmul.f32 -1.702, %v6600_v56  ;;  %v2814_v43 = vadd.f32 %v6509_v36, %v2813_v4  ;;  %v3021_v28 = vpack.c.bf16 %v3009_v20, %v3005_v54  ;;  %vm2877_vm10 = vmor %vm2875_vm9, %vm2876_vm7 }
 0x995   : > { %v6610_v30 = vadd.f32 %v2663_v60, %v6388_v44  ;;  %v4159_v18 = vmul.f32 -1.702, %v6603_v48  ;;  %v2872_v33 = vsub.f32 1.0, %v2871_v53  ;;  %vm2820_vm8 = vcmp.eq.f32.partialorder %v2819_v17, 8.507059e+37 }
 0x996   : > { %v4161_v14 = vmul.f32 -1.702, %v6606_v11  ;;  %v2733_v21 = vmul.f32 1.442695, %v4156_v15  ;;  %v2818_v9 = vsel %vm6623_vm6, %v6509_v36, %v2814_v43  ;;  %3297 = vmatmul.bf16.vlgmr.msra.gmra.mxu3 %v3021_v28  ;;  %v2882_v55 = vor.u32 1.1754944e-38, %v2881_v57 }
 0x997   : > { %v4162_v44 = vmul.f32 -1.702, %v6610_v30  ;;  %v2739_v31 = vmul.f32 1.442695, %v4159_v18  ;;  %v2873_v58 = vmul.f32 %v4786_v7, %v2872_v33  ;;  %v2823_v34 = vsel %vm2820_vm8, %v2822_v46, %v2818_v9 }
 0x998   : > { %v4788_v23 = vpop.eup %4787  ;;  %4791 = vpow2.f32 %v2733_v21  ;;  %v2743_v10 = vmul.f32 1.442695, %v4161_v14  ;;  %v3008_v2 = vmul.f32 %v2823_v34, %v6414_v0 }
 0x999   : > { %v2625_v24 = vpop.f32.mrf.mxu3  ;;  %v6628_v32 = vadd.f32 1.0, %v4788_v23  ;;  %v4790_v5 = vpop.eup %4789  ;;  %v2745_v39 = vmul.f32 1.442695, %v4162_v44  ;;  %v2874_v8 = vadd.f32 %v4786_v7, %v2873_v58 }
 0x99a   : > { %v6637_v38 = vadd.f32 %v2625_v24, %v6399_v50  ;;  %v6639_v52 = vadd.f32 1.0, %v4790_v5  ;;  %v2682_v61 = vpop.f32.mrf.mxu2 }
 0x99b   : > { %4793 = vrcp.f32 %v6628_v32  ;;  %v2878_v51 = vsel %vm2877_vm10, %v4786_v7, %v2874_v8  ;;  %v6662_v0 = vadd.f32 %v2682_v61, %v6404_v59  ;;  %v2909_v54 = vand.u32 2147483647, %v6628_v32 }
 0x99c   : > { %4795 = vpow2.f32 %v2739_v31  ;;  %v4160_v50 = vmul.f32 -1.702, %v6637_v38  ;;  %v2883_v25 = vsel %vm2880_vm11, %v2882_v55, %v2878_v51  ;;  %v2911_v20 = vand.u32 2147483648, %v6628_v32 }
 0x99d   : > { %4797 = vpow2.f32 %v2743_v10  ;;  %v3012_v22 = vmul.f32 %v2883_v25, %v6473_v49  ;;  %v4163_v21 = vmul.f32 -1.702, %v6662_v0  ;;  %v2924_v7 = vand.u32 2147483647, %v6639_v52 }
 0x99e   : > { %v4792_v36 = vpop.eup %4791  ;;  %4799 = vrcp.f32 %v6639_v52  ;;  %v2741_v6 = vmul.f32 1.442695, %v4160_v50  ;;  %v2926_v44 = vand.u32 2147483648, %v6639_v52  ;;  %vm2905_vm13 = vweird.f32 %v6628_v32 }
 0x99f   : > { %v6643_v41 = vadd.f32 1.0, %v4792_v36  ;;  %4801 = vpow2.f32 %v2745_v39  ;;  %v3024_v35 = vpack.c.bf16 %v3012_v22, %v3008_v2  ;;  %vm6682_vm14 = vcmp.eq.f32.partialorder %v2909_v54, 8.507059e+37 }
 0x9a0   : > { %v2912_v19 = vor.u32 1.1754944e-38, %v2911_v20  ;;  %v2747_v5 = vmul.f32 1.442695, %v4163_v21  ;;  %vm2920_vm0 = vweird.f32 %v6639_v52  ;;  %vm6696_vm1 = vcmp.eq.f32.partialorder %v2924_v7, 8.507059e+37 }
 0x9a1   : > { %v6646_v63 = vpop.eup %4793  ;;  %4803 = vrcp.f32 %v6643_v41  ;;  %3354 = vmatmul.bf16.vlgmr.msra.gmra.mxu2 %v3024_v35  ;;  %v2927_v33 = vor.u32 1.1754944e-38, %v2926_v44  ;;  %vm2890_vm2 = vweird.f32 %v6643_v41  ;;  %v2894_v39 = vand.u32 2147483647, %v6643_v41 }
 0x9a2   : > { %v4796_v26 = vpop.eup %4795  ;;  %v2901_v29 = vmul.f32 %v6646_v63, %v6628_v32  ;;  %4805 = vpow2.f32 %v2741_v6  ;;  %vm2906_vm12 = vweird.f32 %v6646_v63  ;;  %v2896_v51 = vand.u32 2147483648, %v6643_v41 }
 0x9a3   : > { %v4798_v4 = vpop.eup %4797  ;;  %v6657_v15 = vadd.f32 1.0, %v4796_v26  ;;  %vm6691_vm15 = vmor %vm2905_vm13, %vm2906_vm12 }
 0x9a4   : > { %v6653_v37 = vpop.eup %4799  ;;  %v2902_v45 = vsub.f32 1.0, %v2901_v29  ;;  %v6659_v16 = vadd.f32 1.0, %v4798_v4 }
 0x9a5   : > { %v4802_v60 = vpop.eup %4801  ;;  %v2916_v12 = vmul.f32 %v6653_v37, %v6639_v52  ;;  %vm2921_vm3 = vweird.f32 %v6653_v37 }
 0x9a6   : > { %v2903_v18 = vmul.f32 %v6646_v63, %v2902_v45  ;;  %4807 = vrcp.f32 %v6659_v16  ;;  %v6668_v14 = vadd.f32 1.0, %v4802_v60  ;;  %v2969_v58 = vand.u32 2147483647, %v6659_v16  ;;  %vm6720_vm5 = vmor %vm2920_vm0, %vm2921_vm3 }
 0x9a7   : > { %v6664_v49 = vpop.eup %4803  ;;  %v2917_v43 = vsub.f32 1.0, %v2916_v12  ;;  %4809 = vrcp.f32 %v6657_v15  ;;  %v2971_v8 = vand.u32 2147483648, %v6659_v16  ;;  %vm2965_vm7 = vweird.f32 %v6659_v16 }
 0x9a8   : > { %v2886_v59 = vmul.f32 %v6664_v49, %v6643_v41  ;;  %v2904_v23 = vadd.f32 %v6646_v63, %v2903_v18  ;;  %4811 = vrcp.f32 %v6668_v14  ;;  %v4806_v28 = vpop.eup %4805  ;;  %vm2891_vm6 = vweird.f32 %v6664_v49 }
 0x9a9   : > { %v2918_v31 = vmul.f32 %v6653_v37, %v2917_v43  ;;  %v6687_v10 = vadd.f32 1.0, %v4806_v28  ;;  %vm6726_vm8 = vcmp.eq.f32.partialorder %v2969_v58, 8.507059e+37  ;;  %v2984_v4 = vand.u32 2147483647, %v6668_v14  ;;  %vm6752_vm13 = vmor %vm2890_vm2, %vm2891_vm6 }
 0x9aa   : > { %v2887_v17 = vsub.f32 1.0, %v2886_v59  ;;  %v2908_v57 = vsel %vm6691_vm15, %v6646_v63, %v2904_v23  ;;  %v2972_v52 = vor.u32 1.1754944e-38, %v2971_v8  ;;  %vm2980_vm11 = vweird.f32 %v6668_v14 }
 0x9ab   : > { %4813 = vrcp.f32 %v6687_v10  ;;  %v2919_v36 = vadd.f32 %v6653_v37, %v2918_v31  ;;  %v2913_v25 = vsel %vm6682_vm14, %v2912_v19, %v2908_v57  ;;  %vm6744_vm12 = vcmp.eq.f32.partialorder %v2984_v4, 8.507059e+37 }
 0x9ac   : > { %v4808_v24 = vpop.eup %4807  ;;  %v2888_v50 = vmul.f32 %v6664_v49, %v2887_v17  ;;  %4815 = vpow2.f32 %v2747_v5  ;;  %v3014_v60 = vmul.f32 %v2913_v25, %v6567_v1  ;;  %v2956_v19 = vand.u32 2147483648, %v6687_v10 }
 0x9ad   : > { %v6689_v9 = vpop.eup %4809  ;;  %v2961_v27 = vmul.f32 %v4808_v24, %v6659_v16  ;;  %vm2966_vm4 = vweird.f32 %v4808_v24  ;;  %v2923_v6 = vsel %vm6720_vm5, %v6653_v37, %v2919_v36  ;;  %v2986_v16 = vand.u32 2147483648, %v6668_v14 }
 0x9ae   : > { %v4812_v55 = vpop.eup %4811  ;;  %v2931_v63 = vmul.f32 %v6689_v9, %v6657_v15  ;;  %v2889_v12 = vadd.f32 %v6664_v49, %v2888_v50  ;;  %vm2967_vm9 = vmor %vm2965_vm7, %vm2966_vm4  ;;  %v2928_v37 = vsel %vm6696_vm1, %v2927_v33, %v2923_v6  ;;  %vm2895_vm0 = vcmp.eq.f32.partialorder %v2894_v39, 8.507059e+37 }
 0x9af   : > { %v2962_v34 = vsub.f32 1.0, %v2961_v27  ;;  %v2976_v2 = vmul.f32 %v4812_v55, %v6668_v14  ;;  %vm2981_vm10 = vweird.f32 %v4812_v55  ;;  %v2987_v31 = vor.u32 1.1754944e-38, %v2986_v16 }
 0x9b0   : > { %v2932_v18 = vsub.f32 1.0, %v2931_v63  ;;  %v2893_v14 = vsel %vm6752_vm13, %v6664_v49, %v2889_v12  ;;  %vm2982_vm14 = vmor %vm2980_vm11, %vm2981_vm10  ;;  %v2897_v5 = vor.u32 1.1754944e-38, %v2896_v51  ;;  %v3015_v32 = vmul.f32 %v2928_v37, %v6584_v13 }
 0x9b1   : > { %v2963_v26 = vmul.f32 %v4808_v24, %v2962_v34  ;;  %v2977_v35 = vsub.f32 1.0, %v2976_v2  ;;  %v4814_v45 = vpop.eup %4813  ;;  %vm2950_vm1 = vweird.f32 %v6687_v10  ;;  %v2957_v58 = vor.u32 1.1754944e-38, %v2956_v19 }
 0x9b2   : > { %v2946_v20 = vmul.f32 %v4814_v45, %v6687_v10  ;;  %v4816_v59 = vpop.eup %4815  ;;  %vm2951_vm15 = vweird.f32 %v4814_v45  ;;  %v2898_v27 = vsel %vm2895_vm0, %v2897_v5, %v2893_v14  ;;  %v2933_v57 = vmul.f32 %v6689_v9, %v2932_v18 }
 0x9b3   : > { %v2964_v61 = vadd.f32 %v4808_v24, %v2963_v26  ;;  %v2978_v43 = vmul.f32 %v4812_v55, %v2977_v35  ;;  %v2764_v53 = vadd.f32 1.0, %v4816_v59  ;;  %vm2952_vm2 = vmor %vm2950_vm1, %vm2951_vm15  ;;  %vm2936_vm4 = vweird.f32 %v6689_v9 }
 0x9b4   : > { %v2947_v28 = vsub.f32 1.0, %v2946_v20  ;;  %v2941_v50 = vand.u32 2147483648, %v6657_v15  ;;  %vm2935_vm5 = vweird.f32 %v6657_v15  ;;  %v2939_v63 = vand.u32 2147483647, %v6657_v15 }
 0x9b5   : > { %v2968_v54 = vsel %vm2967_vm9, %v4808_v24, %v2964_v61  ;;  %v2979_v23 = vadd.f32 %v4812_v55, %v2978_v43  ;;  %v2954_v24 = vand.u32 2147483647, %v6687_v10  ;;  %4817 = vrcp.f32 %v2764_v53  ;;  %vm2937_vm6 = vmor %vm2935_vm5, %vm2936_vm4 }
 0x9b6   : > { %v2973_v21 = vsel %vm6726_vm8, %v2972_v52, %v2968_v54  ;;  %v2948_v17 = vmul.f32 %v4814_v45, %v2947_v28  ;;  %v3001_v26 = vand.u32 2147483648, %v2764_v53  ;;  %v2999_v2 = vand.u32 2147483647, %v2764_v53 }
 0x9b7   : > { %v3018_v44 = vmul.f32 %v2973_v21, %v6606_v11  ;;  %v2983_v41 = vsel %vm2982_vm14, %v4812_v55, %v2979_v23  ;;  %vm2955_vm3 = vcmp.eq.f32.partialorder %v2954_v24, 8.507059e+37  ;;  %v3013_v55 = vmul.f32 %v2898_v27, %v6600_v56 }
 0x9b8   : > { %v2988_v11 = vsel %vm6744_vm12, %v2987_v31, %v2983_v41  ;;  %v2949_v33 = vadd.f32 %v4814_v45, %v2948_v17  ;;  %v2942_v22 = vor.u32 1.1754944e-38, %v2941_v50  ;;  %vm2940_vm8 = vcmp.eq.f32.partialorder %v2939_v63, 8.507059e+37 }
 0x9b9   : > { %v3026_v46 = vpack.c.bf16 %v3018_v44, %v3014_v60  ;;  %v3019_v49 = vmul.f32 %v2988_v11, %v6610_v30  ;;  %v2934_v30 = vadd.f32 %v6689_v9, %v2933_v57  ;;  %vm2995_vm9 = vweird.f32 %v2764_v53 }
 0x9ba   : > { %v2953_v36 = vsel %vm2952_vm2, %v4814_v45, %v2949_v33  ;;  %v3002_v6 = vor.u32 1.1754944e-38, %v3001_v26  ;;  %vm3000_vm11 = vcmp.eq.f32.partialorder %v2999_v2, 8.507059e+37 }
 0x9bb   : > { %3321 = vmatmul.bf16.gmra.mxu0 %v3026_v46  ;;  %v3027_v39 = vpack.c.bf16 %v3019_v49, %v3015_v32  ;;  %v2958_v34 = vsel %vm2955_vm3, %v2957_v58, %v2953_v36  ;;  %v4818_v8 = vpop.eup %4817  ;;  %v2938_v56 = vsel %vm2937_vm6, %v6689_v9, %v2934_v30  ;;  %v4672_v9 = vld [vmem:[%s1098_s0] ss:$0 sm:$0xff]  ;;  %s7023_s0 = sld [smem:[#allocation41_spill]] }
 0x9bc   : > { %v3017_v13 = vmul.f32 %v2958_v34, %v6637_v38  ;;  %v2991_v10 = vmul.f32 %v4818_v8, %v2764_v53  ;;  %vm2996_vm7 = vweird.f32 %v4818_v8  ;;  %v2943_v4 = vsel %vm2940_vm8, %v2942_v22, %v2938_v56 }
 0x9bd   : > { %3340 = vmatmul.bf16.gmra.mxu1 %v3027_v39  ;;  %vm2997_vm10 = vmor %vm2995_vm9, %vm2996_vm7  ;;  %v3016_v52 = vmul.f32 %v2943_v4, %v6603_v48 }
 0x9be   : > { %v3025_v51 = vpack.c.bf16 %v3017_v13, %v3013_v55  ;;  %v2992_v25 = vsub.f32 1.0, %v2991_v10 }
 0x9c0   : > { %3302 = vmatmul.bf16.gmra.mxu3 %v3025_v51  ;;  %v2993_v38 = vmul.f32 %v4818_v8, %v2992_v25 }
 0x9c1   : > { %p4292_p8 = scmp.ne.s32.totalorder %s7023_s0, 1 }
 0x9c2   : > { %v2994_v29 = vadd.f32 %v4818_v8, %v2993_v38  ;;  %s7024_s5 = sld [smem:[#allocation71_spill]] (!%p4292_p8) }
 0x9c3   : > { %s7025_s1 = sld [smem:[#allocation72_spill]] (!%p4292_p8) }
 0x9c4   : > { %v2998_v61 = vsel %vm2997_vm10, %v4818_v8, %v2994_v29 }
 0x9c5   : > { %v3003_v15 = vsel %vm3000_vm11, %v3002_v6, %v2998_v61 }
 0x9c6   : > { %v3020_v35 = vmul.f32 %v3003_v15, %v6662_v0 }
 0x9c8   : > { %v3028_v45 = vpack.c.bf16 %v3020_v35, %v3016_v52 }
 0x9ca   : > { %3359 = vmatmul.bf16.gmra.mxu2 %v3028_v45 }
 0xa0b   : > { %v3317_v18 = vpop.f32.mrf.mxu0 }
 0xa0e   : > { %v3336_v54 = vpop.f32.mrf.mxu1 }
 0xa13   : > { %v3319_v37 = vpop.f32.mrf.mxu0 }
 0xa16   : > { %v3338_v7 = vpop.f32.mrf.mxu1 }
 0xa19   : > { %v3298_v60 = vpop.f32.mrf.mxu3 }
 0xa1a   : > { %v3299_v12 = vadd.f32 %v4672_v9, %v3298_v60 }
 0xa1c   : > { %v3318_v16 = vadd.f32 %v3317_v18, %v3299_v12 }
 0xa1e   : > { %v3337_v20 = vadd.f32 %v3336_v54, %v3318_v16 }
 0xa21   : > { %v3300_v43 = vpop.f32.mrf.mxu3 }
 0xa22   : > { %v3301_v59 = vadd.f32 %v4672_v9, %v3300_v43 }
 0xa24   : > { %v3355_v21 = vpop.f32.mrf.mxu2  ;;  %v3320_v1 = vadd.f32 %v3319_v37, %v3301_v59 }
 0xa25   : > { %v3356_v48 = vadd.f32 %v3355_v21, %v3337_v20 }
 0xa26   : > { %v3339_v44 = vadd.f32 %v3338_v7, %v3320_v1 }
 0xa27   : > { %v3365_v0 = vadd.f32 %v3356_v48, %v6273_v62 }
 0xa29   : > { %3369 = vst [vmem:[#allocation2 + $0x10] sm:$0xff] %v3365_v0 }
 0xa2c   : > { %v3357_v23 = vpop.f32.mrf.mxu2 }
 0xa2d   : > { %v3358_v28 = vadd.f32 %v3357_v23, %v3339_v44 }
 0xa2f   : > { %v3366_v53 = vadd.f32 %v3358_v28, %v6276_v3 }
 0xa31   : > { %3370 = vst [vmem:[#allocation2] sm:$0xff] %v3366_v53 }
 0xa38   : > { %v3322_v31 = vpop.f32.mrf.mxu0 }
 0xa3a   : > { %v3341_v41 = vpop.f32.mrf.mxu1 }
 0xa40   : > { %v3324_v46 = vpop.f32.mrf.mxu0 }
 0xa42   : > { %v3343_v27 = vpop.f32.mrf.mxu1 }
 0xa43   : > { %v3303_v14 = vpop.f32.mrf.mxu3 }
 0xa44   : > { %v3304_v24 = vadd.f32 %v4672_v9, %v3303_v14 }
 0xa46   : > { %v3323_v19 = vadd.f32 %v3322_v31, %v3304_v24 }
 0xa48   : > { %v3342_v17 = vadd.f32 %v3341_v41, %v3323_v19 }
 0xa4b   : > { %v3305_v5 = vpop.f32.mrf.mxu3 }
 0xa4c   : > { %v3306_v11 = vadd.f32 %v4672_v9, %v3305_v5 }
 0xa4d   : > { %v3360_v32 = vpop.f32.mrf.mxu2 }
 0xa4e   : > { %v3361_v49 = vadd.f32 %v3360_v32, %v3342_v17  ;;  %v3325_v62 = vadd.f32 %v3324_v46, %v3306_v11 }
 0xa50   : > { %v3367_v33 = vadd.f32 %v3361_v49, %v6279_v42  ;;  %v3344_v57 = vadd.f32 %v3343_v27, %v3325_v62 }
 0xa52   : > { %3371 = vst [vmem:[#allocation2 + $0x18] sm:$0xff] %v3367_v33 }
 0xa55   : > { %v3362_v58 = vpop.f32.mrf.mxu2 }
 0xa56   : > { %v3363_v3 = vadd.f32 %v3362_v58, %v3344_v57  ;;  %3376 = sbr.rel (%p4292_p8) target bundleno = 3056 (0xbf0), region = 164 }
 0xa58   : > { %v3368_v36 = vadd.f32 %v3363_v3, %v6282_v47 }
 0xa5a   : > { %3372 = vst [vmem:[#allocation2 + $0x8] sm:$0xff] %v3368_v36 }
 0xa5b   : > { %vm3379_vm12 = vcmask 1040384   ;;  %v4439_v34 = vld [vmem:[#allocation25 + $0x38] sm:$0xff]  ;;  %v4438_v10 = vld [vmem:[#allocation25 + $0x30] sm:$0xff]  ;;  %v4437_v50 = vld [vmem:[#allocation25 + $0x28] sm:$0xff] }
 0xa5c   : > { %v3380_v39 = vsel %vm3379_vm12, %v3365_v0, 0.0  ;;  %3469 = vmatpush.bf16.msra.mxu0 %v4439_v34  ;;  %v4436_v47 = vld [vmem:[#allocation25 + $0x20] sm:$0xff]  ;;  %v4435_v51 = vld [vmem:[#allocation25 + $0x18] sm:$0xff]  ;;  %v4434_v63 = vld [vmem:[#allocation25 + $0x10] sm:$0xff] }
 0xa5d   : > { %3381 = vadd.xlane.f32.xlu0 %v3380_v39  ;;  %v4433_v25 = vld [vmem:[#allocation25 + $0x8] sm:$0xff]  ;;  %v4432_v26 = vld [vmem:[#allocation25] sm:$0xff]  ;;  %v3377_v52 = vld [vmem:[%s7024_s5] sm:$0x1] }
 0xa60   : > { %3470 = vmatpush.bf16.msra.mxu0 %v4438_v10 }
 0xa64   : > { %3471 = vmatpush.bf16.msra.mxu0 %v4437_v50 }
 0xa68   : > { %3472 = vmatpush.bf16.msra.mxu0 %v4436_v47 }
 0xa6c   : > { %3473 = vmatpush.bf16.msra.mxu0 %v4435_v51 }
 0xa70   : > { %3474 = vmatpush.bf16.msra.mxu0 %v4434_v63 }
 0xa74   : > { %3475 = vmatpush.bf16.msra.mxu0 %v4433_v25 }
 0xa78   : > { %3476 = vmatpush.bf16.msra.mxu0 %v4432_v26 }
 0xad0   : > { %v3382_v8 = vpop.xlane.xlu0 %3381 }
 0xad1   : > { %v3383_v55 = vmul.f32 %v3382_v8, %v5902_v40 }
 0xad3   : > { %v3384_v42 = vsub.f32 %v3365_v0, %v3383_v55 }
 0xad5   : > { %v3385_v13 = vmul.f32 %v3384_v42, %v3384_v42 }
 0xad7   : > { %v3386_v30 = vsel %vm3379_vm12, %v3385_v13, 0.0 }
 0xad8   : > { %3387 = vadd.xlane.f32.xlu0 %v3386_v30 }
 0xb4b   : > { %v3388_v56 = vpop.xlane.xlu0 %3387 }
 0xb4c   : > { %v3389_v38 = vmul.f32 %v3388_v56, %v5902_v40  ;;  %v3378_v40 = vld [vmem:[%s7025_s1] sm:$0x1] }
 0xb4e   : > { %v3390_v2 = vadd.f32 1e-05, %v3389_v38 }
 0xb50   : > { %4823 = vrsqrt.f32 %v3390_v2  ;;  %vm3397_vm14 = vweird.f32 %v3390_v2 }
 0xb56   : > { %v4824_v22 = vpop.eup %4823 }
 0xb57   : > { %v3392_v29 = vmul.f32 %v4824_v22, %v3390_v2  ;;  %vm3398_vm13 = vweird.f32 %v4824_v22 }
 0xb58   : > { %vm3399_vm15 = vmor %vm3397_vm14, %vm3398_vm13 }
 0xb59   : > { %v3393_v4 = vmul.f32 %v4824_v22, %v3392_v29 }
 0xb5b   : > { %v3394_v6 = vmul.f32 0.5, %v3393_v4 }
 0xb5d   : > { %v3395_v61 = vsub.f32 1.5, %v3394_v6 }
 0xb5f   : > { %v3396_v15 = vmul.f32 %v4824_v22, %v3395_v61 }
 0xb61   : > { %v3400_v35 = vsel %vm3399_vm15, %v4824_v22, %v3396_v15 }
 0xb62   : > { %v3401_v45 = vmul.f32 %v3400_v35, %v3384_v42 }
 0xb64   : > { %v3402_v9 = vmul.f32 %v3401_v45, %v3377_v52 }
 0xb66   : > { %v3403_v60 = vadd.f32 %v3402_v9, %v3378_v40 }
 0xb68   : > { %v3404_v12 = vpack.c.bf16 %v3403_v60, %v3403_v60 }
 0xb6a   : > { %3477 = vmatmul.bf16.vlgmr.msra.gmra.mxu0 %v3404_v12 }
 0xbe7   : > { %v3478_v18 = vpop.f32.mrf.mxu0 }
 0xbe8   : > { %3482 = vst [vmem:[%s1085_s13] sm:$0x1] %v3478_v18 }
 0xbef   : > { %v3480_v16 = vpop.f32.mrf.mxu0 }
 0xbf0 PF: > { %s7026_s29 = sld [smem:[#allocation42_spill]]  ;;  %s3494_s3 = sshll.u32 %s1085_s13, 4  ;;  %s3495_s3 = int_to_ptr.vmem [resolvable:$true] %s3494_s3 }
 0xbf1   : > { %s7027_s16 = sld [smem:[#allocation74_spill]]  ;;  %s3484_s10 = scalar_lea.sflag [#allocation6], %s5807_s28 }
 0xbf7   : > { %s3492_s27 = scalar_lea.hbm %s7027_s16, %s7026_s29  ;;  %s5265_s19 = scalar_lea.hbm %s7027_s16, 2 }
 0xbf8   : > { %s3496_s6 = sshll.u32 %s3492_s27, 4  ;;  %s3497_s6 = int_to_ptr.hbm [resolvable:$true] %s3496_s6 }
 0xbf9   : > { %s5259_s7 = sshra.s32 %s3497_s6, 4  ;;  %s5260_s7 = int_to_ptr.hbm [resolvable:$true] %s5259_s7 }
 0xbfa   : > { %s5261_s25 = scalar_lea.hbm %s5260_s7, 1  ;;  %p5266_p10 = scmp.lt.s32.totalorder %s5260_s7, %s7027_s16 }
 0xbfb   : > { %p5262_p11 = scmp.ne.s32.totalorder %s5260_s7, %s5261_s25  ;;  %p5267_p5 = scmp.lt.s32.totalorder %s5265_s19, %s5261_s25 }
 0xbfd   : > { %p5263_p13 = pnand %p5262_p11, %p5742_p1  ;;  %p5268_p12 = por %p5267_p5, %p5266_p10 }
 0xbff   : > { %p5264_p0 = pneg %p5263_p13 }
 0xc01   : > { %p5269_p2 = pnand %p5268_p12, %p5264_p0 }
 0xc03   : > { %5272 = shalt.err (!%p5269_p2)
}
 0xc04   : > { %4487 = dma.vmem_to_hbm [thread:$0]  (%p5742_p1), %s3495_s3, 16, %s3497_s6, %s3484_s10  }
 0xc05 PF: > { %p4548_p3 = scmp.ge.s32.totalorder %s5395_s4, 2  ;;  %s3508_s28 = sand.u32 1, %s5367_s24  }
 0xc06   : > { %s3509_s22 = scalar_lea.sflag [#allocation6], %s3508_s28 }
 0xc07   : > { %p4534_p7 = pnand %p4548_p3, %p5753_p6 }
 0xc09   : > { %p4535_p9 = pneg %p4534_p7 }
 0xc0b   : > { %5350 = dma.done.wait (%p4535_p9), %s3509_s22, 16  }
 0xc0c   : > { %5352 = vsyncadd (%p4535_p9), %s3509_s22, 4294967280  ;;  %s51_s4 = sadd.s32 1, %s5395_s4   ;;  %s7029_s1 = sld [smem:[#allocation37_spill]] }
 0xc0d   : > { %p48_p4 = scmp.ge.s32.totalorder %s51_s4, 6   ;;  %s7030_s22 = sld [smem:[#allocation38_spill]] }
 0xc0e   : > { %s7031_s23 = sld [smem:[#allocation52_spill]] }
 0xc0f   : > { %s7032_s24 = sld [smem:[#allocation39_spill]] }
 0xc10   : > { %s7033_s2 = sld [smem:[#allocation40_spill]] }
 0xc11   : > { %s7034_s25 = sld [smem:[#allocation53_spill]]  ;;  %50 = sbr.rel (!%p48_p4) target bundleno = 42 (0x2a), region = 281 }
 0xc12   : > { %s7035_s3 = sld [smem:[#allocation43_spill]] }
 0xc13   : > { %s7036_s26 = sld [smem:[#allocation44_spill]] }
 0xc14   : > { %s7037_s27 = sld [smem:[#allocation50_spill]] }
 0xc15   : > { %s7038_s28 = sld [smem:[#allocation51_spill]] }
 0xc16   :  { %3514 = vsyncpa [#allocation5], 1 }
 0xc17   :  { %3516 = vsyncpa [#allocation5 + $0x1], 1 }
 0xc18   :  { %3517 = vsyncpa [#allocation8], 1 }
 0xc19   :  { %3518 = vsyncpa [#allocation11], 1 }
 0xc1a   :  { %3519 = vsyncpa [#allocation14], 1 }
 0xc1b   :  { %3521 = vsyncpa [#allocation14 + $0x1], 1 }
 0xc1c   :  { %3522 = vsyncpa [#allocation17], 1 }
 0xc1d   :  { %3524 = vsyncpa [#allocation17 + $0x1], 1 }
 0xc1e   :  { %3525 = vsyncpa [#allocation20], 1 }
 0xc1f   :  { %3527 = vsyncpa [#allocation20 + $0x1], 1 }
 0xc20   :  { %3528 = vsyncpa [#allocation23], 1 }
 0xc21   :  { %3530 = vsyncpa [#allocation23 + $0x1], 1 }
 0xc22   :  { %3531 = vsyncpa [#allocation26], 1 }
 0xc23   :  { %3532 = vsyncpa [#allocation6], 1 }
 0xc24   :  { %3534 = vsyncpa [#allocation6 + $0x1], 1 }

</bundles_post_ra>
